<compile_context>
chip_gen: v6e
topology: v6e:2x2x1
jax: 0.10.0
libtpu: 0.0.40
codegen_flags: <defaults>
</compile_context>

<pallas_src>
import jax
import jax.numpy as jnp
from jax.experimental import pallas as pl
from jax.experimental.pallas import tpu as pltpu

EPS = 1e-5
LANE = 128


def _round_up(x, m):
    return (x + m - 1) // m * m


# ---------------------------------------------------------------------------
# shared in-kernel 3x3 "same" convolution on one NHWC image
# ---------------------------------------------------------------------------
def _conv3x3(x, w_ref):
    """x     : (H, W, Cin_p) f32 value (no halo).
       w_ref : (3, 3*Cin_p, Cout_p) bf16 VMEM ref, laid out [kh, kw*Cin_p + ci, co].
       Returns (H, W, Cout_p) f32."""
    H, W, cin_p = x.shape
    cout_p = w_ref.shape[-1]

    # Zero halo: one row top/bottom (cheap major-dim concat); the left/right halo
    # columns are folded into the W-shifted slabs below.
    zrow = jnp.zeros((1, W, cin_p), jnp.float32)
    xp = jnp.concatenate([zrow, x, zrow], axis=0)                # (H+2, W, Cin_p)
    zcol = jnp.zeros((H + 2, 1, cin_p), jnp.float32)
    x_m1 = jnp.concatenate([zcol, xp[:, :W - 1, :]], axis=1)     # x[.., w-1, ..]
    x_p1 = jnp.concatenate([xp[:, 1:, :], zcol], axis=1)         # x[.., w+1, ..]

    # Fold kw into the contraction: K = 3*Cin_p (lane-aligned concat of 128-wide slabs),
    # bf16 MXU operands with f32 accumulation.
    xcat = jnp.concatenate([x_m1, xp, x_p1], axis=-1).astype(jnp.bfloat16)

    acc = jnp.zeros((H * W, cout_p), jnp.float32)
    for kh in range(3):           # kh taps = free row offsets into the H-padded slab
        lhs = xcat[kh:kh + H].reshape(H * W, 3 * cin_p)          # 2-D matmul, M = H*W
        acc = acc + jnp.dot(lhs, w_ref[kh], preferred_element_type=jnp.float32)
    return acc.reshape(H, W, cout_p)


def _write_stats(st_ref, acc):
    # Per-image partial sums for batch-stat BN (reduced across images in JAX glue).
    st_ref[0, 0:1, :] = jnp.sum(acc, axis=(0, 1), keepdims=True)[0]
    st_ref[0, 1:2, :] = jnp.sum(acc * acc, axis=(0, 1), keepdims=True)[0]


# ---------------------------------------------------------------------------
# pass A: conv1 + bias -> y1 + per-image (sum, sum_sq)
# ---------------------------------------------------------------------------
def _conv1_kernel(x_ref, w_ref, b_ref, y_ref, st_ref):
    c_p = y_ref.shape[-1]
    acc = _conv3x3(x_ref[0], w_ref) + b_ref[...].reshape(1, 1, c_p)
    y_ref[0] = acc
    _write_stats(st_ref, acc)


# ---------------------------------------------------------------------------
# pass B: BN1 (folded scale/shift) + ReLU + conv2 + bias -> y2 + per-image stats
# ---------------------------------------------------------------------------
def _bn_conv2_kernel(y1_ref, sc_ref, sh_ref, w_ref, b_ref, y2_ref, st_ref):
    c_p = y2_ref.shape[-1]
    sc = sc_ref[...].reshape(1, 1, c_p)
    sh = sh_ref[...].reshape(1, 1, c_p)
    h = jnp.maximum(y1_ref[0] * sc + sh, 0.0)        # BN folded to one FMA + ReLU (f32)
    acc = _conv3x3(h, w_ref) + b_ref[...].reshape(1, 1, c_p)
    y2_ref[0] = acc
    _write_stats(st_ref, acc)


# ---------------------------------------------------------------------------
# pass C: BN2 (folded scale/shift) + ReLU
# ---------------------------------------------------------------------------
def _bn_relu_kernel(y2_ref, sc_ref, sh_ref, o_ref):
    c_p = o_ref.shape[-1]
    sc = sc_ref[...].reshape(1, 1, c_p)
    sh = sh_ref[...].reshape(1, 1, c_p)
    o_ref[0] = jnp.maximum(y2_ref[0] * sc + sh, 0.0)


# ---------------------------------------------------------------------------
# host-side helpers
# ---------------------------------------------------------------------------
def _pack_conv_weight(w_oihw, cin_p, cout_p):
    """PyTorch (Cout, Cin, 3, 3) -> (3, 3*Cin_p, Cout_p) bf16, [kh, kw*Cin_p + ci, co]."""
    cout, cin = w_oihw.shape[0], w_oihw.shape[1]
    w = jnp.transpose(w_oihw, (2, 3, 1, 0))                       # (kh, kw, Cin, Cout)
    w = jnp.pad(w, ((0, 0), (0, 0), (0, cin_p - cin), (0, cout_p - cout)))
    return w.reshape(3, 3 * cin_p, cout_p).astype(jnp.bfloat16)


def _bn_scale_shift(stats, gamma, beta, count, c_p):
    """Training-mode BN (biased variance) folded into per-channel scale/shift."""
    ssum = jnp.sum(stats[:, 0, :], axis=0)
    ssq = jnp.sum(stats[:, 1, :], axis=0)
    mu = ssum / count
    var = jnp.maximum(ssq / count - mu * mu, 0.0)
    g = jnp.pad(gamma.astype(jnp.float32), (0, c_p - gamma.shape[0]))
    b = jnp.pad(beta.astype(jnp.float32), (0, c_p - beta.shape[0]))
    scale = g * jax.lax.rsqrt(var + EPS)
    shift = b - mu * scale
    return scale.reshape(1, c_p), shift.reshape(1, c_p)


@jax.jit
def double_conv(x_nchw, conv1_w, conv1_b, bn1_gamma, bn1_beta,
                conv2_w, conv2_b, bn2_gamma, bn2_beta):
    N, Cin, H, W = x_nchw.shape
    Cout = conv1_w.shape[0]
    cin_p = _round_up(Cin, LANE)
    c_p = _round_up(Cout, LANE)

    # NCHW <-> NHWC only at the module boundary; pad channels up to the 128-lane width.
    x = jnp.transpose(x_nchw, (0, 2, 3, 1)).astype(jnp.float32)
    x = jnp.pad(x, ((0, 0), (0, 0), (0, 0), (0, cin_p - Cin)))

    w1k = _pack_conv_weight(conv1_w, cin_p, c_p)
    w2k = _pack_conv_weight(conv2_w, c_p, c_p)
    b1 = jnp.pad(conv1_b.astype(jnp.float32), (0, c_p - Cout)).reshape(1, c_p)
    b2 = jnp.pad(conv2_b.astype(jnp.float32), (0, c_p - Cout)).reshape(1, c_p)

    parallel = pltpu.CompilerParams(dimension_semantics=("parallel",))

    # ---- pass A: conv1 + per-image stats ----
    y1, s1 = pl.pallas_call(
        _conv1_kernel,
        grid=(N,),
        in_specs=[
            pl.BlockSpec((1, H, W, cin_p), lambda n: (n, 0, 0, 0)),
            pl.BlockSpec((3, 3 * cin_p, c_p), lambda n: (0, 0, 0)),
            pl.BlockSpec((1, c_p), lambda n: (0, 0)),
        ],
        out_specs=[
            pl.BlockSpec((1, H, W, c_p), lambda n: (n, 0, 0, 0)),
            pl.BlockSpec((1, 2, c_p), lambda n: (n, 0, 0)),
        ],
        out_shape=[
            jax.ShapeDtypeStruct((N, H, W, c_p), jnp.float32),
            jax.ShapeDtypeStruct((N, 2, c_p), jnp.float32),
        ],
        compiler_params=parallel,
    )(x, w1k, b1)

    count = float(N * H * W)
    sc1, sh1 = _bn_scale_shift(s1, bn1_gamma, bn1_beta, count, c_p)

    # ---- pass B: BN1 + ReLU + conv2 + per-image stats ----
    y2, s2 = pl.pallas_call(
        _bn_conv2_kernel,
        grid=(N,),
        in_specs=[
            pl.BlockSpec((1, H, W, c_p), lambda n: (n, 0, 0, 0)),
            pl.BlockSpec((1, c_p), lambda n: (0, 0)),
            pl.BlockSpec((1, c_p), lambda n: (0, 0)),
            pl.BlockSpec((3, 3 * c_p, c_p), lambda n: (0, 0, 0)),
            pl.BlockSpec((1, c_p), lambda n: (0, 0)),
        ],
        out_specs=[
            pl.BlockSpec((1, H, W, c_p), lambda n: (n, 0, 0, 0)),
            pl.BlockSpec((1, 2, c_p), lambda n: (n, 0, 0)),
        ],
        out_shape=[
            jax.ShapeDtypeStruct((N, H, W, c_p), jnp.float32),
            jax.ShapeDtypeStruct((N, 2, c_p), jnp.float32),
        ],
        compiler_params=parallel,
    )(y1, sc1, sh1, w2k, b2)

    sc2, sh2 = _bn_scale_shift(s2, bn2_gamma, bn2_beta, count, c_p)

    # ---- pass C: BN2 + ReLU ----
    out = pl.pallas_call(
        _bn_relu_kernel,
        grid=(N,),
        in_specs=[
            pl.BlockSpec((1, H, W, c_p), lambda n: (n, 0, 0, 0)),
            pl.BlockSpec((1, c_p), lambda n: (0, 0)),
            pl.BlockSpec((1, c_p), lambda n: (0, 0)),
        ],
        out_specs=pl.BlockSpec((1, H, W, c_p), lambda n: (n, 0, 0, 0)),
        out_shape=jax.ShapeDtypeStruct((N, H, W, c_p), jnp.float32),
        compiler_params=parallel,
    )(y2, sc2, sh2)

    # back to the PyTorch NCHW convention, drop the channel padding
    return jnp.transpose(out[..., :Cout], (0, 3, 1, 2))


def make_params(key, in_channels, out_channels):
    """Deterministic synthetic parameters in PyTorch layouts."""
    k1, k2, k3, k4 = jax.random.split(key, 4)

    def conv_w(k, cin, cout):
        fan = 1.0 / (3.0 * jnp.sqrt(float(cin)))
        return jax.random.normal(k, (cout, cin, 3, 3), jnp.float32) * fan

    def conv_b(k, cin, cout):
        bound = 1.0 / (3.0 * jnp.sqrt(float(cin)))
        return jax.random.uniform(k, (cout,), jnp.float32, -bound, bound)

    c = out_channels
    return dict(
        conv1_w=conv_w(k1, in_channels, c),
        conv1_b=conv_b(k3, in_channels, c),
        bn1_gamma=1.0 + 0.05 * jnp.arange(c, dtype=jnp.float32),
        bn1_beta=0.03 * jnp.arange(c, dtype=jnp.float32),
        conv2_w=conv_w(k2, c, c),
        conv2_b=conv_b(k4, c, c),
        bn2_gamma=1.0 - 0.02 * jnp.arange(c, dtype=jnp.float32),
        bn2_beta=-0.01 * jnp.arange(c, dtype=jnp.float32),
    )


def reference_double_conv(x_nchw, p):
    """Pure-JAX reference.  Conv inputs/weights are rounded to bf16 exactly as the
    kernel feeds the MXU, so the comparison isolates layout/indexing bugs."""
    def conv(x, w_oihw, b):
        xb = x.astype(jnp.bfloat16).astype(jnp.float32)
        wb = jnp.transpose(w_oihw, (2, 3, 1, 0)).astype(jnp.bfloat16).astype(jnp.float32)
        y = jax.lax.conv_general_dilated(
            xb, wb, window_strides=(1, 1), padding="SAME",
            dimension_numbers=("NHWC", "HWIO", "NHWC"),
            precision=jax.lax.Precision.HIGHEST)
        return y + b

    def bn_relu(y, g, b):
        mu = jnp.mean(y, axis=(0, 1, 2))
        var = jnp.mean(jnp.square(y - mu), axis=(0, 1, 2))   # biased: train-mode BN
        return jnp.maximum((y - mu) * jax.lax.rsqrt(var + EPS) * g + b, 0.0)

    x = jnp.transpose(x_nchw, (0, 2, 3, 1)).astype(jnp.float32)
    h = bn_relu(conv(x, p["conv1_w"], p["conv1_b"]), p["bn1_gamma"], p["bn1_beta"])
    o = bn_relu(conv(h, p["conv2_w"], p["conv2_b"]), p["bn2_gamma"], p["bn2_beta"])
    return jnp.transpose(o, (0, 3, 1, 2))


if __name__ == "__main__":
    key = jax.random.PRNGKey(0)
    kx, kp = jax.random.split(key)

    N, Cin, Cout, H, W = 2, 4, 8, 16, 16
    x = jax.random.normal(kx, (N, Cin, H, W), jnp.float32)
    p = make_params(kp, Cin, Cout)

    y = double_conv(x, p["conv1_w"], p["conv1_b"], p["bn1_gamma"], p["bn1_beta"],
                    p["conv2_w"], p["conv2_b"], p["bn2_gamma"], p["bn2_beta"])
    y = jax.block_until_ready(y)
    assert y.shape == (N, Cout, H, W), y.shape

    y_ref = reference_double_conv(x, p)
    err = float(jnp.max(jnp.abs(y - y_ref)))
    assert err < 2e-2, f"max abs error vs reference: {err}"
    print("KERNEL_OK")
</pallas_src>

<mosaic_0001>
module attributes {stable_mosaic.version = 11 : i64} {
  func.func @_conv1_kernel(%arg0: i32, %arg1: memref<1x16x16x128xf32, #tpu.memory_space<vmem>>, %arg2: memref<3x384x128xbf16, #tpu.memory_space<vmem>>, %arg3: memref<1x128xf32, #tpu.memory_space<vmem>>, %arg4: memref<1x16x16x128xf32, #tpu.memory_space<vmem>>, %arg5: memref<1x2x128xf32, #tpu.memory_space<vmem>>) attributes {dimension_semantics = [#tpu.dimension_semantics<parallel>], iteration_bounds = array<i64: 2>, scalar_prefetch = 0 : i64, scratch_operands = 0 : i64, tpu.core_type = #tpu.core_type<tc>, window_params = [{transform_indices = @transform_0, window_bounds = array<i64: 1, 16, 16, 128>}, {pipeline_mode = #tpu.pipeline_mode<synchronous>, transform_indices = @transform_1, window_bounds = array<i64: 3, 384, 128>}, {pipeline_mode = #tpu.pipeline_mode<synchronous>, transform_indices = @transform_2, window_bounds = array<i64: 1, 128>}, {transform_indices = @transform_3, window_bounds = array<i64: 1, 16, 16, 128>}, {transform_indices = @transform_4, window_bounds = array<i64: 1, 2, 128>}]} {
    %c0 = arith.constant 0 : index
    %c0_0 = arith.constant 0 : index
    %c0_1 = arith.constant 0 : index
    %c0_2 = arith.constant 0 : index
    %0 = vector.load %arg1[%c0, %c0_0, %c0_1, %c0_2] : memref<1x16x16x128xf32, #tpu.memory_space<vmem>>, vector<1x16x16x128xf32>
    %1 = vector.shape_cast %0 : vector<1x16x16x128xf32> to vector<16x16x128xf32>
    %cst = arith.constant 0.000000e+00 : f32
    %2 = vector.broadcast %cst : f32 to vector<1x16x128xf32>
    %3 = tpu.concatenate %2, %1, %2 in 0 : vector<1x16x128xf32>, vector<16x16x128xf32>, vector<1x16x128xf32> -> vector<18x16x128xf32>
    %cst_3 = arith.constant 0.000000e+00 : f32
    %4 = vector.broadcast %cst_3 : f32 to vector<18x1x128xf32>
    %5 = vector.extract_strided_slice %3 {offsets = [0, 0, 0], sizes = [18, 15, 128], strides = [1, 1, 1]} : vector<18x16x128xf32> to vector<18x15x128xf32>
    %6 = tpu.concatenate %4, %5 in 1 : vector<18x1x128xf32>, vector<18x15x128xf32> -> vector<18x16x128xf32>
    %7 = vector.extract_strided_slice %3 {offsets = [0, 1, 0], sizes = [18, 15, 128], strides = [1, 1, 1]} : vector<18x16x128xf32> to vector<18x15x128xf32>
    %8 = tpu.concatenate %7, %4 in 1 : vector<18x15x128xf32>, vector<18x1x128xf32> -> vector<18x16x128xf32>
    %9 = tpu.concatenate %6, %3, %8 in 2 : vector<18x16x128xf32>, vector<18x16x128xf32>, vector<18x16x128xf32> -> vector<18x16x384xf32>
    %10 = arith.truncf %9 : vector<18x16x384xf32> to vector<18x16x384xbf16>
    %cst_4 = arith.constant 0.000000e+00 : f32
    %11 = vector.broadcast %cst_4 : f32 to vector<256x128xf32>
    %12 = vector.extract_strided_slice %10 {offsets = [0, 0, 0], sizes = [16, 16, 384], strides = [1, 1, 1]} : vector<18x16x384xbf16> to vector<16x16x384xbf16>
    %13 = vector.shape_cast %12 : vector<16x16x384xbf16> to vector<256x384xbf16>
    %c0_5 = arith.constant 0 : index
    %c0_6 = arith.constant 0 : index
    %c0_7 = arith.constant 0 : index
    %14 = vector.load %arg2[%c0_5, %c0_6, %c0_7] : memref<3x384x128xbf16, #tpu.memory_space<vmem>>, vector<1x384x128xbf16>
    %15 = vector.shape_cast %14 : vector<1x384x128xbf16> to vector<384x128xbf16>
    %cst_8 = arith.constant dense<0.000000e+00> : vector<256x128xf32>
    %16 = tpu.matmul %13, %15, %cst_8 {dimension_numbers = #tpu.dot_dimension_numbers<[1], [0], [0], [1], [0, 0, 1, 1], [], []>} : vector<256x384xbf16>, vector<384x128xbf16>, vector<256x128xf32> -> vector<256x128xf32>
    %17 = arith.addf %11, %16 : vector<256x128xf32>
    %18 = vector.extract_strided_slice %10 {offsets = [1, 0, 0], sizes = [16, 16, 384], strides = [1, 1, 1]} : vector<18x16x384xbf16> to vector<16x16x384xbf16>
    %19 = vector.shape_cast %18 : vector<16x16x384xbf16> to vector<256x384xbf16>
    %c1 = arith.constant 1 : index
    %c0_9 = arith.constant 0 : index
    %c0_10 = arith.constant 0 : index
    %20 = vector.load %arg2[%c1, %c0_9, %c0_10] : memref<3x384x128xbf16, #tpu.memory_space<vmem>>, vector<1x384x128xbf16>
    %21 = vector.shape_cast %20 : vector<1x384x128xbf16> to vector<384x128xbf16>
    %cst_11 = arith.constant dense<0.000000e+00> : vector<256x128xf32>
    %22 = tpu.matmul %19, %21, %cst_11 {dimension_numbers = #tpu.dot_dimension_numbers<[1], [0], [0], [1], [0, 0, 1, 1], [], []>} : vector<256x384xbf16>, vector<384x128xbf16>, vector<256x128xf32> -> vector<256x128xf32>
    %23 = arith.addf %17, %22 : vector<256x128xf32>
    %24 = vector.extract_strided_slice %10 {offsets = [2, 0, 0], sizes = [16, 16, 384], strides = [1, 1, 1]} : vector<18x16x384xbf16> to vector<16x16x384xbf16>
    %25 = vector.shape_cast %24 : vector<16x16x384xbf16> to vector<256x384xbf16>
    %c2 = arith.constant 2 : index
    %c0_12 = arith.constant 0 : index
    %c0_13 = arith.constant 0 : index
    %26 = vector.load %arg2[%c2, %c0_12, %c0_13] : memref<3x384x128xbf16, #tpu.memory_space<vmem>>, vector<1x384x128xbf16>
    %27 = vector.shape_cast %26 : vector<1x384x128xbf16> to vector<384x128xbf16>
    %cst_14 = arith.constant dense<0.000000e+00> : vector<256x128xf32>
    %28 = tpu.matmul %25, %27, %cst_14 {dimension_numbers = #tpu.dot_dimension_numbers<[1], [0], [0], [1], [0, 0, 1, 1], [], []>} : vector<256x384xbf16>, vector<384x128xbf16>, vector<256x128xf32> -> vector<256x128xf32>
    %29 = arith.addf %23, %28 : vector<256x128xf32>
    %30 = vector.shape_cast %29 : vector<256x128xf32> to vector<16x16x128xf32>
    %c0_15 = arith.constant 0 : index
    %c0_16 = arith.constant 0 : index
    %31 = vector.load %arg3[%c0_15, %c0_16] : memref<1x128xf32, #tpu.memory_space<vmem>>, vector<1x128xf32>
    %32 = vector.shape_cast %31 : vector<1x128xf32> to vector<1x1x128xf32>
    %33 = vector.broadcast %32 : vector<1x1x128xf32> to vector<16x16x128xf32>
    %34 = arith.addf %30, %33 : vector<16x16x128xf32>
    %c0_17 = arith.constant 0 : index
    %c0_18 = arith.constant 0 : index
    %c0_19 = arith.constant 0 : index
    %c0_20 = arith.constant 0 : index
    %35 = vector.load %arg4[%c0_17, %c0_18, %c0_19, %c0_20] : memref<1x16x16x128xf32, #tpu.memory_space<vmem>>, vector<1x16x16x128xf32>
    %36 = vector.shape_cast %35 : vector<1x16x16x128xf32> to vector<16x16x128xf32>
    %37 = vector.shape_cast %34 : vector<16x16x128xf32> to vector<1x16x16x128xf32>
    tpu.vector_store %arg4[%c0_17, %c0_18, %c0_19, %c0_20], %37 {strides = array<i32>} : memref<1x16x16x128xf32, #tpu.memory_space<vmem>>, vector<1x16x16x128xf32>,
    %cst_21 = arith.constant dense<0.000000e+00> : vector<128xf32>
    %38 = vector.multi_reduction <add>, %34, %cst_21 [0, 1] : vector<16x16x128xf32> to vector<128xf32>
    %39 = vector.shape_cast %38 : vector<128xf32> to vector<1x1x128xf32>
    %40 = vector.shape_cast %39 : vector<1x1x128xf32> to vector<1x128xf32>
    %c0_22 = arith.constant 0 : index
    %c0_23 = arith.constant 0 : index
    %c0_24 = arith.constant 0 : index
    %41 = vector.load %arg5[%c0_22, %c0_23, %c0_24] : memref<1x2x128xf32, #tpu.memory_space<vmem>>, vector<1x1x128xf32>
    %42 = vector.shape_cast %41 : vector<1x1x128xf32> to vector<1x128xf32>
    %43 = vector.shape_cast %40 : vector<1x128xf32> to vector<1x1x128xf32>
    tpu.vector_store %arg5[%c0_22, %c0_23, %c0_24], %43 {strides = array<i32>} : memref<1x2x128xf32, #tpu.memory_space<vmem>>, vector<1x1x128xf32>,
    %44 = arith.mulf %34, %34 : vector<16x16x128xf32>
    %cst_25 = arith.constant dense<0.000000e+00> : vector<128xf32>
    %45 = vector.multi_reduction <add>, %44, %cst_25 [0, 1] : vector<16x16x128xf32> to vector<128xf32>
    %46 = vector.shape_cast %45 : vector<128xf32> to vector<1x1x128xf32>
    %47 = vector.shape_cast %46 : vector<1x1x128xf32> to vector<1x128xf32>
    %c0_26 = arith.constant 0 : index
    %c1_27 = arith.constant 1 : index
    %c0_28 = arith.constant 0 : index
    %48 = vector.load %arg5[%c0_26, %c1_27, %c0_28] : memref<1x2x128xf32, #tpu.memory_space<vmem>>, vector<1x1x128xf32>
    %49 = vector.shape_cast %48 : vector<1x1x128xf32> to vector<1x128xf32>
    %50 = vector.shape_cast %47 : vector<1x128xf32> to vector<1x1x128xf32>
    tpu.vector_store %arg5[%c0_26, %c1_27, %c0_28], %50 {strides = array<i32>} : memref<1x2x128xf32, #tpu.memory_space<vmem>>, vector<1x1x128xf32>,
    return
  }
  func.func @transform_0(%arg0: i32) -> (i32, i32, i32, i32) {
    %c0_i32 = arith.constant 0 : i32
    %c0_i32_0 = arith.constant 0 : i32
    %c0_i32_1 = arith.constant 0 : i32
    %c0_i32_2 = arith.constant 0 : i32
    return %arg0, %c0_i32, %c0_i32_0, %c0_i32_1 : i32, i32, i32, i32
  }
  func.func @transform_1(%arg0: i32) -> (i32, i32, i32) {
    %c0_i32 = arith.constant 0 : i32
    %c0_i32_0 = arith.constant 0 : i32
    %c0_i32_1 = arith.constant 0 : i32
    %c0_i32_2 = arith.constant 0 : i32
    return %c0_i32, %c0_i32_0, %c0_i32_1 : i32, i32, i32
  }
  func.func @transform_2(%arg0: i32) -> (i32, i32) {
    %c0_i32 = arith.constant 0 : i32
    %c0_i32_0 = arith.constant 0 : i32
    %c0_i32_1 = arith.constant 0 : i32
    return %c0_i32, %c0_i32_0 : i32, i32
  }
  func.func @transform_3(%arg0: i32) -> (i32, i32, i32, i32) {
    %c0_i32 = arith.constant 0 : i32
    %c0_i32_0 = arith.constant 0 : i32
    %c0_i32_1 = arith.constant 0 : i32
    %c0_i32_2 = arith.constant 0 : i32
    return %arg0, %c0_i32, %c0_i32_0, %c0_i32_1 : i32, i32, i32, i32
  }
  func.func @transform_4(%arg0: i32) -> (i32, i32, i32) {
    %c0_i32 = arith.constant 0 : i32
    %c0_i32_0 = arith.constant 0 : i32
    %c0_i32_1 = arith.constant 0 : i32
    return %arg0, %c0_i32, %c0_i32_0 : i32, i32, i32
  }
}

module attributes {stable_mosaic.version = 11 : i64} {
  func.func @_bn_conv2_kernel(%arg0: i32, %arg1: memref<1x16x16x128xf32, #tpu.memory_space<vmem>>, %arg2: memref<1x128xf32, #tpu.memory_space<vmem>>, %arg3: memref<1x128xf32, #tpu.memory_space<vmem>>, %arg4: memref<3x384x128xbf16, #tpu.memory_space<vmem>>, %arg5: memref<1x128xf32, #tpu.memory_space<vmem>>, %arg6: memref<1x16x16x128xf32, #tpu.memory_space<vmem>>, %arg7: memref<1x2x128xf32, #tpu.memory_space<vmem>>) attributes {dimension_semantics = [#tpu.dimension_semantics<parallel>], iteration_bounds = array<i64: 2>, scalar_prefetch = 0 : i64, scratch_operands = 0 : i64, tpu.core_type = #tpu.core_type<tc>, window_params = [{transform_indices = @transform_0, window_bounds = array<i64: 1, 16, 16, 128>}, {pipeline_mode = #tpu.pipeline_mode<synchronous>, transform_indices = @transform_1, window_bounds = array<i64: 1, 128>}, {pipeline_mode = #tpu.pipeline_mode<synchronous>, transform_indices = @transform_2, window_bounds = array<i64: 1, 128>}, {pipeline_mode = #tpu.pipeline_mode<synchronous>, transform_indices = @transform_3, window_bounds = array<i64: 3, 384, 128>}, {pipeline_mode = #tpu.pipeline_mode<synchronous>, transform_indices = @transform_4, window_bounds = array<i64: 1, 128>}, {transform_indices = @transform_5, window_bounds = array<i64: 1, 16, 16, 128>}, {transform_indices = @transform_6, window_bounds = array<i64: 1, 2, 128>}]} {
    %c0 = arith.constant 0 : index
    %c0_0 = arith.constant 0 : index
    %0 = vector.load %arg2[%c0, %c0_0] : memref<1x128xf32, #tpu.memory_space<vmem>>, vector<1x128xf32>
    %1 = vector.shape_cast %0 : vector<1x128xf32> to vector<1x1x128xf32>
    %c0_1 = arith.constant 0 : index
    %c0_2 = arith.constant 0 : index
    %2 = vector.load %arg3[%c0_1, %c0_2] : memref<1x128xf32, #tpu.memory_space<vmem>>, vector<1x128xf32>
    %3 = vector.shape_cast %2 : vector<1x128xf32> to vector<1x1x128xf32>
    %c0_3 = arith.constant 0 : index
    %c0_4 = arith.constant 0 : index
    %c0_5 = arith.constant 0 : index
    %c0_6 = arith.constant 0 : index
    %4 = vector.load %arg1[%c0_3, %c0_4, %c0_5, %c0_6] : memref<1x16x16x128xf32, #tpu.memory_space<vmem>>, vector<1x16x16x128xf32>
    %5 = vector.shape_cast %4 : vector<1x16x16x128xf32> to vector<16x16x128xf32>
    %6 = vector.broadcast %1 : vector<1x1x128xf32> to vector<16x16x128xf32>
    %7 = arith.mulf %5, %6 : vector<16x16x128xf32>
    %8 = vector.broadcast %3 : vector<1x1x128xf32> to vector<16x16x128xf32>
    %9 = arith.addf %7, %8 : vector<16x16x128xf32>
    %cst = arith.constant 0.000000e+00 : f32
    %10 = vector.broadcast %cst : f32 to vector<16x16x128xf32>
    %11 = arith.maximumf %9, %10 : vector<16x16x128xf32>
    %cst_7 = arith.constant 0.000000e+00 : f32
    %12 = vector.broadcast %cst_7 : f32 to vector<1x16x128xf32>
    %13 = tpu.concatenate %12, %11, %12 in 0 : vector<1x16x128xf32>, vector<16x16x128xf32>, vector<1x16x128xf32> -> vector<18x16x128xf32>
    %cst_8 = arith.constant 0.000000e+00 : f32
    %14 = vector.broadcast %cst_8 : f32 to vector<18x1x128xf32>
    %15 = vector.extract_strided_slice %13 {offsets = [0, 0, 0], sizes = [18, 15, 128], strides = [1, 1, 1]} : vector<18x16x128xf32> to vector<18x15x128xf32>
    %16 = tpu.concatenate %14, %15 in 1 : vector<18x1x128xf32>, vector<18x15x128xf32> -> vector<18x16x128xf32>
    %17 = vector.extract_strided_slice %13 {offsets = [0, 1, 0], sizes = [18, 15, 128], strides = [1, 1, 1]} : vector<18x16x128xf32> to vector<18x15x128xf32>
    %18 = tpu.concatenate %17, %14 in 1 : vector<18x15x128xf32>, vector<18x1x128xf32> -> vector<18x16x128xf32>
    %19 = tpu.concatenate %16, %13, %18 in 2 : vector<18x16x128xf32>, vector<18x16x128xf32>, vector<18x16x128xf32> -> vector<18x16x384xf32>
    %20 = arith.truncf %19 : vector<18x16x384xf32> to vector<18x16x384xbf16>
    %cst_9 = arith.constant 0.000000e+00 : f32
    %21 = vector.broadcast %cst_9 : f32 to vector<256x128xf32>
    %22 = vector.extract_strided_slice %20 {offsets = [0, 0, 0], sizes = [16, 16, 384], strides = [1, 1, 1]} : vector<18x16x384xbf16> to vector<16x16x384xbf16>
    %23 = vector.shape_cast %22 : vector<16x16x384xbf16> to vector<256x384xbf16>
    %c0_10 = arith.constant 0 : index
    %c0_11 = arith.constant 0 : index
    %c0_12 = arith.constant 0 : index
    %24 = vector.load %arg4[%c0_10, %c0_11, %c0_12] : memref<3x384x128xbf16, #tpu.memory_space<vmem>>, vector<1x384x128xbf16>
    %25 = vector.shape_cast %24 : vector<1x384x128xbf16> to vector<384x128xbf16>
    %cst_13 = arith.constant dense<0.000000e+00> : vector<256x128xf32>
    %26 = tpu.matmul %23, %25, %cst_13 {dimension_numbers = #tpu.dot_dimension_numbers<[1], [0], [0], [1], [0, 0, 1, 1], [], []>} : vector<256x384xbf16>, vector<384x128xbf16>, vector<256x128xf32> -> vector<256x128xf32>
    %27 = arith.addf %21, %26 : vector<256x128xf32>
    %28 = vector.extract_strided_slice %20 {offsets = [1, 0, 0], sizes = [16, 16, 384], strides = [1, 1, 1]} : vector<18x16x384xbf16> to vector<16x16x384xbf16>
    %29 = vector.shape_cast %28 : vector<16x16x384xbf16> to vector<256x384xbf16>
    %c1 = arith.constant 1 : index
    %c0_14 = arith.constant 0 : index
    %c0_15 = arith.constant 0 : index
    %30 = vector.load %arg4[%c1, %c0_14, %c0_15] : memref<3x384x128xbf16, #tpu.memory_space<vmem>>, vector<1x384x128xbf16>
    %31 = vector.shape_cast %30 : vector<1x384x128xbf16> to vector<384x128xbf16>
    %cst_16 = arith.constant dense<0.000000e+00> : vector<256x128xf32>
    %32 = tpu.matmul %29, %31, %cst_16 {dimension_numbers = #tpu.dot_dimension_numbers<[1], [0], [0], [1], [0, 0, 1, 1], [], []>} : vector<256x384xbf16>, vector<384x128xbf16>, vector<256x128xf32> -> vector<256x128xf32>
    %33 = arith.addf %27, %32 : vector<256x128xf32>
    %34 = vector.extract_strided_slice %20 {offsets = [2, 0, 0], sizes = [16, 16, 384], strides = [1, 1, 1]} : vector<18x16x384xbf16> to vector<16x16x384xbf16>
    %35 = vector.shape_cast %34 : vector<16x16x384xbf16> to vector<256x384xbf16>
    %c2 = arith.constant 2 : index
    %c0_17 = arith.constant 0 : index
    %c0_18 = arith.constant 0 : index
    %36 = vector.load %arg4[%c2, %c0_17, %c0_18] : memref<3x384x128xbf16, #tpu.memory_space<vmem>>, vector<1x384x128xbf16>
    %37 = vector.shape_cast %36 : vector<1x384x128xbf16> to vector<384x128xbf16>
    %cst_19 = arith.constant dense<0.000000e+00> : vector<256x128xf32>
    %38 = tpu.matmul %35, %37, %cst_19 {dimension_numbers = #tpu.dot_dimension_numbers<[1], [0], [0], [1], [0, 0, 1, 1], [], []>} : vector<256x384xbf16>, vector<384x128xbf16>, vector<256x128xf32> -> vector<256x128xf32>
    %39 = arith.addf %33, %38 : vector<256x128xf32>
    %40 = vector.shape_cast %39 : vector<256x128xf32> to vector<16x16x128xf32>
    %c0_20 = arith.constant 0 : index
    %c0_21 = arith.constant 0 : index
    %41 = vector.load %arg5[%c0_20, %c0_21] : memref<1x128xf32, #tpu.memory_space<vmem>>, vector<1x128xf32>
    %42 = vector.shape_cast %41 : vector<1x128xf32> to vector<1x1x128xf32>
    %43 = vector.broadcast %42 : vector<1x1x128xf32> to vector<16x16x128xf32>
    %44 = arith.addf %40, %43 : vector<16x16x128xf32>
    %c0_22 = arith.constant 0 : index
    %c0_23 = arith.constant 0 : index
    %c0_24 = arith.constant 0 : index
    %c0_25 = arith.constant 0 : index
    %45 = vector.load %arg6[%c0_22, %c0_23, %c0_24, %c0_25] : memref<1x16x16x128xf32, #tpu.memory_space<vmem>>, vector<1x16x16x128xf32>
    %46 = vector.shape_cast %45 : vector<1x16x16x128xf32> to vector<16x16x128xf32>
    %47 = vector.shape_cast %44 : vector<16x16x128xf32> to vector<1x16x16x128xf32>
    tpu.vector_store %arg6[%c0_22, %c0_23, %c0_24, %c0_25], %47 {strides = array<i32>} : memref<1x16x16x128xf32, #tpu.memory_space<vmem>>, vector<1x16x16x128xf32>,
    %cst_26 = arith.constant dense<0.000000e+00> : vector<128xf32>
    %48 = vector.multi_reduction <add>, %44, %cst_26 [0, 1] : vector<16x16x128xf32> to vector<128xf32>
    %49 = vector.shape_cast %48 : vector<128xf32> to vector<1x1x128xf32>
    %50 = vector.shape_cast %49 : vector<1x1x128xf32> to vector<1x128xf32>
    %c0_27 = arith.constant 0 : index
    %c0_28 = arith.constant 0 : index
    %c0_29 = arith.constant 0 : index
    %51 = vector.load %arg7[%c0_27, %c0_28, %c0_29] : memref<1x2x128xf32, #tpu.memory_space<vmem>>, vector<1x1x128xf32>
    %52 = vector.shape_cast %51 : vector<1x1x128xf32> to vector<1x128xf32>
    %53 = vector.shape_cast %50 : vector<1x128xf32> to vector<1x1x128xf32>
    tpu.vector_store %arg7[%c0_27, %c0_28, %c0_29], %53 {strides = array<i32>} : memref<1x2x128xf32, #tpu.memory_space<vmem>>, vector<1x1x128xf32>,
    %54 = arith.mulf %44, %44 : vector<16x16x128xf32>
    %cst_30 = arith.constant dense<0.000000e+00> : vector<128xf32>
    %55 = vector.multi_reduction <add>, %54, %cst_30 [0, 1] : vector<16x16x128xf32> to vector<128xf32>
    %56 = vector.shape_cast %55 : vector<128xf32> to vector<1x1x128xf32>
    %57 = vector.shape_cast %56 : vector<1x1x128xf32> to vector<1x128xf32>
    %c0_31 = arith.constant 0 : index
    %c1_32 = arith.constant 1 : index
    %c0_33 = arith.constant 0 : index
    %58 = vector.load %arg7[%c0_31, %c1_32, %c0_33] : memref<1x2x128xf32, #tpu.memory_space<vmem>>, vector<1x1x128xf32>
    %59 = vector.shape_cast %58 : vector<1x1x128xf32> to vector<1x128xf32>
    %60 = vector.shape_cast %57 : vector<1x128xf32> to vector<1x1x128xf32>
    tpu.vector_store %arg7[%c0_31, %c1_32, %c0_33], %60 {strides = array<i32>} : memref<1x2x128xf32, #tpu.memory_space<vmem>>, vector<1x1x128xf32>,
    return
  }
  func.func @transform_0(%arg0: i32) -> (i32, i32, i32, i32) {
    %c0_i32 = arith.constant 0 : i32
    %c0_i32_0 = arith.constant 0 : i32
    %c0_i32_1 = arith.constant 0 : i32
    %c0_i32_2 = arith.constant 0 : i32
    return %arg0, %c0_i32, %c0_i32_0, %c0_i32_1 : i32, i32, i32, i32
  }
  func.func @transform_1(%arg0: i32) -> (i32, i32) {
    %c0_i32 = arith.constant 0 : i32
    %c0_i32_0 = arith.constant 0 : i32
    %c0_i32_1 = arith.constant 0 : i32
    return %c0_i32, %c0_i32_0 : i32, i32
  }
  func.func @transform_2(%arg0: i32) -> (i32, i32) {
    %c0_i32 = arith.constant 0 : i32
    %c0_i32_0 = arith.constant 0 : i32
    %c0_i32_1 = arith.constant 0 : i32
    return %c0_i32, %c0_i32_0 : i32, i32
  }
  func.func @transform_3(%arg0: i32) -> (i32, i32, i32) {
    %c0_i32 = arith.constant 0 : i32
    %c0_i32_0 = arith.constant 0 : i32
    %c0_i32_1 = arith.constant 0 : i32
    %c0_i32_2 = arith.constant 0 : i32
    return %c0_i32, %c0_i32_0, %c0_i32_1 : i32, i32, i32
  }
  func.func @transform_4(%arg0: i32) -> (i32, i32) {
    %c0_i32 = arith.constant 0 : i32
    %c0_i32_0 = arith.constant 0 : i32
    %c0_i32_1 = arith.constant 0 : i32
    return %c0_i32, %c0_i32_0 : i32, i32
  }
  func.func @transform_5(%arg0: i32) -> (i32, i32, i32, i32) {
    %c0_i32 = arith.constant 0 : i32
    %c0_i32_0 = arith.constant 0 : i32
    %c0_i32_1 = arith.constant 0 : i32
    %c0_i32_2 = arith.constant 0 : i32
    return %arg0, %c0_i32, %c0_i32_0, %c0_i32_1 : i32, i32, i32, i32
  }
  func.func @transform_6(%arg0: i32) -> (i32, i32, i32) {
    %c0_i32 = arith.constant 0 : i32
    %c0_i32_0 = arith.constant 0 : i32
    %c0_i32_1 = arith.constant 0 : i32
    return %arg0, %c0_i32, %c0_i32_0 : i32, i32, i32
  }
}

module attributes {stable_mosaic.version = 11 : i64} {
  func.func @_bn_relu_kernel(%arg0: i32, %arg1: memref<1x16x16x128xf32, #tpu.memory_space<vmem>>, %arg2: memref<1x128xf32, #tpu.memory_space<vmem>>, %arg3: memref<1x128xf32, #tpu.memory_space<vmem>>, %arg4: memref<1x16x16x128xf32, #tpu.memory_space<vmem>>) attributes {dimension_semantics = [#tpu.dimension_semantics<parallel>], iteration_bounds = array<i64: 2>, scalar_prefetch = 0 : i64, scratch_operands = 0 : i64, tpu.core_type = #tpu.core_type<tc>, window_params = [{transform_indices = @transform_0, window_bounds = array<i64: 1, 16, 16, 128>}, {pipeline_mode = #tpu.pipeline_mode<synchronous>, transform_indices = @transform_1, window_bounds = array<i64: 1, 128>}, {pipeline_mode = #tpu.pipeline_mode<synchronous>, transform_indices = @transform_2, window_bounds = array<i64: 1, 128>}, {transform_indices = @transform_3, window_bounds = array<i64: 1, 16, 16, 128>}]} {
    %c0 = arith.constant 0 : index
    %c0_0 = arith.constant 0 : index
    %0 = vector.load %arg2[%c0, %c0_0] : memref<1x128xf32, #tpu.memory_space<vmem>>, vector<1x128xf32>
    %1 = vector.shape_cast %0 : vector<1x128xf32> to vector<1x1x128xf32>
    %c0_1 = arith.constant 0 : index
    %c0_2 = arith.constant 0 : index
    %2 = vector.load %arg3[%c0_1, %c0_2] : memref<1x128xf32, #tpu.memory_space<vmem>>, vector<1x128xf32>
    %3 = vector.shape_cast %2 : vector<1x128xf32> to vector<1x1x128xf32>
    %c0_3 = arith.constant 0 : index
    %c0_4 = arith.constant 0 : index
    %c0_5 = arith.constant 0 : index
    %c0_6 = arith.constant 0 : index
    %4 = vector.load %arg1[%c0_3, %c0_4, %c0_5, %c0_6] : memref<1x16x16x128xf32, #tpu.memory_space<vmem>>, vector<1x16x16x128xf32>
    %5 = vector.shape_cast %4 : vector<1x16x16x128xf32> to vector<16x16x128xf32>
    %6 = vector.broadcast %1 : vector<1x1x128xf32> to vector<16x16x128xf32>
    %7 = arith.mulf %5, %6 : vector<16x16x128xf32>
    %8 = vector.broadcast %3 : vector<1x1x128xf32> to vector<16x16x128xf32>
    %9 = arith.addf %7, %8 : vector<16x16x128xf32>
    %cst = arith.constant 0.000000e+00 : f32
    %10 = vector.broadcast %cst : f32 to vector<16x16x128xf32>
    %11 = arith.maximumf %9, %10 : vector<16x16x128xf32>
    %c0_7 = arith.constant 0 : index
    %c0_8 = arith.constant 0 : index
    %c0_9 = arith.constant 0 : index
    %c0_10 = arith.constant 0 : index
    %12 = vector.load %arg4[%c0_7, %c0_8, %c0_9, %c0_10] : memref<1x16x16x128xf32, #tpu.memory_space<vmem>>, vector<1x16x16x128xf32>
    %13 = vector.shape_cast %12 : vector<1x16x16x128xf32> to vector<16x16x128xf32>
    %14 = vector.shape_cast %11 : vector<16x16x128xf32> to vector<1x16x16x128xf32>
    tpu.vector_store %arg4[%c0_7, %c0_8, %c0_9, %c0_10], %14 {strides = array<i32>} : memref<1x16x16x128xf32, #tpu.memory_space<vmem>>, vector<1x16x16x128xf32>,
    return
  }
  func.func @transform_0(%arg0: i32) -> (i32, i32, i32, i32) {
    %c0_i32 = arith.constant 0 : i32
    %c0_i32_0 = arith.constant 0 : i32
    %c0_i32_1 = arith.constant 0 : i32
    %c0_i32_2 = arith.constant 0 : i32
    return %arg0, %c0_i32, %c0_i32_0, %c0_i32_1 : i32, i32, i32, i32
  }
  func.func @transform_1(%arg0: i32) -> (i32, i32) {
    %c0_i32 = arith.constant 0 : i32
    %c0_i32_0 = arith.constant 0 : i32
    %c0_i32_1 = arith.constant 0 : i32
    return %c0_i32, %c0_i32_0 : i32, i32
  }
  func.func @transform_2(%arg0: i32) -> (i32, i32) {
    %c0_i32 = arith.constant 0 : i32
    %c0_i32_0 = arith.constant 0 : i32
    %c0_i32_1 = arith.constant 0 : i32
    return %c0_i32, %c0_i32_0 : i32, i32
  }
  func.func @transform_3(%arg0: i32) -> (i32, i32, i32, i32) {
    %c0_i32 = arith.constant 0 : i32
    %c0_i32_0 = arith.constant 0 : i32
    %c0_i32_1 = arith.constant 0 : i32
    %c0_i32_2 = arith.constant 0 : i32
    return %arg0, %c0_i32, %c0_i32_0, %c0_i32_1 : i32, i32, i32, i32
  }
}

</mosaic_0001>

<bundles_post_ra>
// kernel: double_conv.5
= control target key start
LH: loop header
LB: loop body
LE: loop exit
PB: predicated region body
PF: predicated region fallthrough
CT: control target
= control target key end

     0   :  { %s451_s12 = smov 0   ;;  %s610_s0 = inlined_call_operand.vmem [shape: f32[2,16,16,128], index: 0, kind: input, shape index: {}]   ;;  %s611_s1 = inlined_call_operand.vmem [shape: f32[1,128], index: 1, kind: input, shape index: {}]   ;;  %s612_s2 = inlined_call_operand.vmem [shape: f32[1,128], index: 2, kind: input, shape index: {}]   ;;  %s613_s3 = inlined_call_operand.vmem [shape: f32[2,16,16,128], index: 3, kind: output, shape index: {}]  }
   0x1 LB: > { %s400_s13 = sadd.s32 4294967295, %s429_s12   ;;  %p404_p0 = scmp.ge.s32.totalorder %s429_s12, 1  ;;  %s429_s12 = sphi %s451_s12, %s13_s12  }
   0x2   : > { %p137_p1 = scmp.lt.s32.totalorder %s429_s12, 3 }
   0x4   : > { %p138_p2 = pnand %p404_p0, %p137_p1 }
   0x5   : > { %p161_p3 = scmp.lt.s32.totalorder (!%p138_p2), %s400_s13, 1 }
   0x6   : > { %141 = sbr.rel (%p138_p2) target bundleno = 44 (0x2c), region = 32 }
   0xb   : > { %s615_s13 = smov (!%p161_p3, %s400_s13), 1  ;;  %v462_v0 = vld [vmem:[%s611_s1] ss:$0 sm:$0xff] }
   0xc   : > { %s413_s14 = sshll.u32 %s615_s13, 8  ;;  %v472_v1 = vld [vmem:[%s612_s2] ss:$0 sm:$0xff] }
   0xd   : > { %s467_s19 = scalar_lea.vmem %s610_s0, %s413_s14  ;;  %s495_s24 = scalar_lea.vmem %s613_s3, %s413_s14 }
   0xe   : > { %v173_v2 = vld [vmem:[%s467_s19] sm:$0xff]  ;;  %v174_v3 = vld [vmem:[%s467_s19 + $0x8] sm:$0xff]  ;;  %v175_v4 = vld [vmem:[%s467_s19 + $0x10] sm:$0xff] }
   0xf   : > { %v211_v5 = vmul.f32 %v462_v0, %v173_v2  ;;  %v212_v6 = vmul.f32 %v462_v0, %v174_v3  ;;  %v213_v7 = vmul.f32 %v462_v0, %v175_v4  ;;  %v176_v8 = vld [vmem:[%s467_s19 + $0x18] sm:$0xff]  ;;  %v177_v9 = vld [vmem:[%s467_s19 + $0x20] sm:$0xff]  ;;  %v178_v10 = vld [vmem:[%s467_s19 + $0x28] sm:$0xff] }
  0x10   : > { %v214_v11 = vmul.f32 %v462_v0, %v176_v8  ;;  %v215_v12 = vmul.f32 %v462_v0, %v177_v9  ;;  %v216_v13 = vmul.f32 %v462_v0, %v178_v10  ;;  %v179_v14 = vld [vmem:[%s467_s19 + $0x30] sm:$0xff]  ;;  %v180_v15 = vld [vmem:[%s467_s19 + $0x38] sm:$0xff]  ;;  %v181_v24 = vld [vmem:[%s467_s19 + $0x40] sm:$0xff] }
  0x11   : > { %v249_v16 = vadd.f32 %v472_v1, %v211_v5  ;;  %v250_v17 = vadd.f32 %v472_v1, %v212_v6  ;;  %v251_v18 = vadd.f32 %v472_v1, %v213_v7  ;;  %v217_v19 = vmul.f32 %v462_v0, %v179_v14  ;;  %v182_v25 = vld [vmem:[%s467_s19 + $0x48] sm:$0xff]  ;;  %v183_v26 = vld [vmem:[%s467_s19 + $0x50] sm:$0xff]  ;;  %v184_v31 = vld [vmem:[%s467_s19 + $0x58] sm:$0xff] }
  0x12   : > { %v252_v20 = vadd.f32 %v472_v1, %v214_v11  ;;  %v253_v21 = vadd.f32 %v472_v1, %v215_v12  ;;  %v254_v22 = vadd.f32 %v472_v1, %v216_v13  ;;  %v218_v23 = vmul.f32 %v462_v0, %v180_v15  ;;  %v185_v32 = vld [vmem:[%s467_s19 + $0x60] sm:$0xff]  ;;  %v186_v33 = vld [vmem:[%s467_s19 + $0x68] sm:$0xff]  ;;  %v187_v38 = vld [vmem:[%s467_s19 + $0x70] sm:$0xff] }
  0x13   : > { %v281_v27 = vmax.f32 %v249_v16, 0.0  ;;  %v282_v28 = vmax.f32 %v250_v17, 0.0  ;;  %v283_v29 = vmax.f32 %v251_v18, 0.0  ;;  %v255_v30 = vadd.f32 %v472_v1, %v217_v19  ;;  %v188_v43 = vld [vmem:[%s467_s19 + $0x78] sm:$0xff]  ;;  %v189_v56 = vld [vmem:[%s467_s19 + $0x80] sm:$0xff]  ;;  %v190_v57 = vld [vmem:[%s467_s19 + $0x88] sm:$0xff] }
  0x14   : > { %v284_v34 = vmax.f32 %v252_v20, 0.0  ;;  %v285_v35 = vmax.f32 %v253_v21, 0.0  ;;  %v286_v36 = vmax.f32 %v254_v22, 0.0  ;;  %v256_v37 = vadd.f32 %v472_v1, %v218_v23  ;;  %v191_v58 = vld [vmem:[%s467_s19 + $0x90] sm:$0xff]  ;;  %v192_v63 = vld [vmem:[%s467_s19 + $0x98] sm:$0xff]  ;;  %v193_v2 = vld [vmem:[%s467_s19 + $0xa0] sm:$0xff] }
  0x15   : > { %313 = vst [vmem:[%s495_s24] sm:$0xff] %v281_v27  ;;  %314 = vst [vmem:[%s495_s24 + $0x8] sm:$0xff] %v282_v28  ;;  %v287_v39 = vmax.f32 %v255_v30, 0.0  ;;  %v219_v40 = vmul.f32 %v462_v0, %v181_v24  ;;  %v220_v41 = vmul.f32 %v462_v0, %v182_v25  ;;  %v221_v42 = vmul.f32 %v462_v0, %v183_v26  ;;  %v194_v3 = vld [vmem:[%s467_s19 + $0xa8] sm:$0xff]  ;;  %v195_v8 = vld [vmem:[%s467_s19 + $0xb0] sm:$0xff] }
  0x16   : > { %315 = vst [vmem:[%s495_s24 + $0x10] sm:$0xff] %v283_v29  ;;  %316 = vst [vmem:[%s495_s24 + $0x18] sm:$0xff] %v284_v34  ;;  %v288_v44 = vmax.f32 %v256_v37, 0.0  ;;  %v222_v45 = vmul.f32 %v462_v0, %v184_v31  ;;  %v223_v46 = vmul.f32 %v462_v0, %v185_v32  ;;  %v224_v47 = vmul.f32 %v462_v0, %v186_v33  ;;  %v196_v13 = vld [vmem:[%s467_s19 + $0xb8] sm:$0xff]  ;;  %v197_v26 = vld [vmem:[%s467_s19 + $0xc0] sm:$0xff] }
  0x17   : > { %317 = vst [vmem:[%s495_s24 + $0x20] sm:$0xff] %v285_v35  ;;  %318 = vst [vmem:[%s495_s24 + $0x28] sm:$0xff] %v286_v36  ;;  %v257_v48 = vadd.f32 %v472_v1, %v219_v40  ;;  %v258_v49 = vadd.f32 %v472_v1, %v220_v41  ;;  %v259_v50 = vadd.f32 %v472_v1, %v221_v42  ;;  %v198_v27 = vld [vmem:[%s467_s19 + $0xc8] sm:$0xff]  ;;  %v199_v28 = vld [vmem:[%s467_s19 + $0xd0] sm:$0xff] }
  0x18   : > { %319 = vst [vmem:[%s495_s24 + $0x30] sm:$0xff] %v287_v39  ;;  %v225_v51 = vmul.f32 %v462_v0, %v187_v38  ;;  %320 = vst [vmem:[%s495_s24 + $0x38] sm:$0xff] %v288_v44  ;;  %v260_v52 = vadd.f32 %v472_v1, %v222_v45  ;;  %v261_v53 = vadd.f32 %v472_v1, %v223_v46  ;;  %v200_v33 = vld [vmem:[%s467_s19 + $0xd8] sm:$0xff]  ;;  %v201_v34 = vld [vmem:[%s467_s19 + $0xe0] sm:$0xff] }
  0x19   : > { %v262_v54 = vadd.f32 %v472_v1, %v224_v47  ;;  %v226_v55 = vmul.f32 %v462_v0, %v188_v43  ;;  %v289_v59 = vmax.f32 %v257_v48, 0.0  ;;  %v290_v60 = vmax.f32 %v258_v49, 0.0  ;;  %v202_v35 = vld [vmem:[%s467_s19 + $0xe8] sm:$0xff]  ;;  %v203_v40 = vld [vmem:[%s467_s19 + $0xf0] sm:$0xff]  ;;  %v204_v45 = vld [vmem:[%s467_s19 + $0xf8] sm:$0xff] }
  0x1a   : > { %v291_v61 = vmax.f32 %v259_v50, 0.0  ;;  %v263_v62 = vadd.f32 %v472_v1, %v225_v51  ;;  %v292_v4 = vmax.f32 %v260_v52, 0.0  ;;  %v293_v5 = vmax.f32 %v261_v53, 0.0 }
  0x1b   : > { %v294_v6 = vmax.f32 %v262_v54, 0.0  ;;  %v264_v7 = vadd.f32 %v472_v1, %v226_v55  ;;  %321 = vst [vmem:[%s495_s24 + $0x40] sm:$0xff] %v289_v59  ;;  %322 = vst [vmem:[%s495_s24 + $0x48] sm:$0xff] %v290_v60  ;;  %v227_v10 = vmul.f32 %v462_v0, %v189_v56  ;;  %v228_v11 = vmul.f32 %v462_v0, %v190_v57 }
  0x1c   : > { %323 = vst [vmem:[%s495_s24 + $0x50] sm:$0xff] %v291_v61  ;;  %v295_v9 = vmax.f32 %v263_v62, 0.0  ;;  %v229_v12 = vmul.f32 %v462_v0, %v191_v58  ;;  %324 = vst [vmem:[%s495_s24 + $0x58] sm:$0xff] %v292_v4  ;;  %v230_v15 = vmul.f32 %v462_v0, %v192_v63  ;;  %v231_v16 = vmul.f32 %v462_v0, %v193_v2 }
  0x1d   : > { %325 = vst [vmem:[%s495_s24 + $0x60] sm:$0xff] %v293_v5  ;;  %326 = vst [vmem:[%s495_s24 + $0x68] sm:$0xff] %v294_v6  ;;  %v296_v14 = vmax.f32 %v264_v7, 0.0  ;;  %v232_v17 = vmul.f32 %v462_v0, %v194_v3  ;;  %v265_v18 = vadd.f32 %v472_v1, %v227_v10  ;;  %v266_v19 = vadd.f32 %v472_v1, %v228_v11 }
  0x1e   : > { %327 = vst [vmem:[%s495_s24 + $0x70] sm:$0xff] %v295_v9  ;;  %v267_v20 = vadd.f32 %v472_v1, %v229_v12  ;;  %v233_v21 = vmul.f32 %v462_v0, %v195_v8  ;;  %v268_v22 = vadd.f32 %v472_v1, %v230_v15  ;;  %v269_v23 = vadd.f32 %v472_v1, %v231_v16 }
  0x1f   : > { %328 = vst [vmem:[%s495_s24 + $0x78] sm:$0xff] %v296_v14  ;;  %v270_v24 = vadd.f32 %v472_v1, %v232_v17  ;;  %v234_v25 = vmul.f32 %v462_v0, %v196_v13  ;;  %v297_v29 = vmax.f32 %v265_v18, 0.0  ;;  %v298_v30 = vmax.f32 %v266_v19, 0.0 }
  0x20   : > { %v299_v31 = vmax.f32 %v267_v20, 0.0  ;;  %v271_v32 = vadd.f32 %v472_v1, %v233_v21  ;;  %v300_v36 = vmax.f32 %v268_v22, 0.0  ;;  %v301_v37 = vmax.f32 %v269_v23, 0.0 }
  0x21   : > { %v302_v38 = vmax.f32 %v270_v24, 0.0  ;;  %v272_v39 = vadd.f32 %v472_v1, %v234_v25  ;;  %329 = vst [vmem:[%s495_s24 + $0x80] sm:$0xff] %v297_v29  ;;  %330 = vst [vmem:[%s495_s24 + $0x88] sm:$0xff] %v298_v30  ;;  %v235_v42 = vmul.f32 %v462_v0, %v197_v26  ;;  %v236_v43 = vmul.f32 %v462_v0, %v198_v27 }
  0x22   : > { %331 = vst [vmem:[%s495_s24 + $0x90] sm:$0xff] %v299_v31  ;;  %v303_v41 = vmax.f32 %v271_v32, 0.0  ;;  %v237_v44 = vmul.f32 %v462_v0, %v199_v28  ;;  %332 = vst [vmem:[%s495_s24 + $0x98] sm:$0xff] %v300_v36  ;;  %v238_v47 = vmul.f32 %v462_v0, %v200_v33  ;;  %v239_v48 = vmul.f32 %v462_v0, %v201_v34 }
  0x23   : > { %333 = vst [vmem:[%s495_s24 + $0xa0] sm:$0xff] %v301_v37  ;;  %334 = vst [vmem:[%s495_s24 + $0xa8] sm:$0xff] %v302_v38  ;;  %v304_v46 = vmax.f32 %v272_v39, 0.0  ;;  %v240_v49 = vmul.f32 %v462_v0, %v202_v35  ;;  %v273_v50 = vadd.f32 %v472_v1, %v235_v42  ;;  %v274_v51 = vadd.f32 %v472_v1, %v236_v43 }
  0x24   : > { %335 = vst [vmem:[%s495_s24 + $0xb0] sm:$0xff] %v303_v41  ;;  %v275_v52 = vadd.f32 %v472_v1, %v237_v44  ;;  %v241_v53 = vmul.f32 %v462_v0, %v203_v40  ;;  %v276_v54 = vadd.f32 %v472_v1, %v238_v47  ;;  %v277_v55 = vadd.f32 %v472_v1, %v239_v48 }
  0x25   : > { %336 = vst [vmem:[%s495_s24 + $0xb8] sm:$0xff] %v304_v46  ;;  %v278_v56 = vadd.f32 %v472_v1, %v240_v49  ;;  %v242_v57 = vmul.f32 %v462_v0, %v204_v45  ;;  %v305_v58 = vmax.f32 %v273_v50, 0.0  ;;  %v306_v59 = vmax.f32 %v274_v51, 0.0 }
  0x26   : > { %v307_v60 = vmax.f32 %v275_v52, 0.0  ;;  %v279_v61 = vadd.f32 %v472_v1, %v241_v53  ;;  %v308_v62 = vmax.f32 %v276_v54, 0.0  ;;  %v309_v63 = vmax.f32 %v277_v55, 0.0 }
  0x27   : > { %v310_v2 = vmax.f32 %v278_v56, 0.0  ;;  %v280_v3 = vadd.f32 %v472_v1, %v242_v57  ;;  %337 = vst [vmem:[%s495_s24 + $0xc0] sm:$0xff] %v305_v58  ;;  %338 = vst [vmem:[%s495_s24 + $0xc8] sm:$0xff] %v306_v59 }
  0x28   : > { %339 = vst [vmem:[%s495_s24 + $0xd0] sm:$0xff] %v307_v60  ;;  %v311_v4 = vmax.f32 %v279_v61, 0.0  ;;  %340 = vst [vmem:[%s495_s24 + $0xd8] sm:$0xff] %v308_v62 }
  0x29   : > { %341 = vst [vmem:[%s495_s24 + $0xe0] sm:$0xff] %v309_v63  ;;  %342 = vst [vmem:[%s495_s24 + $0xe8] sm:$0xff] %v310_v2  ;;  %v312_v0 = vmax.f32 %v280_v3, 0.0 }
  0x2a   : > { %343 = vst [vmem:[%s495_s24 + $0xf0] sm:$0xff] %v311_v4 }
  0x2b   : > { %344 = vst [vmem:[%s495_s24 + $0xf8] sm:$0xff] %v312_v0 }
  0x2c PF: > { %s13_s12 = sadd.s32 1, %s429_s12  }
  0x2d   : > { %p10_p4 = scmp.ge.s32.totalorder %s13_s12, 4  }
  0x2f   :  { %12 = sbr.rel (!%p10_p4) target bundleno = 1 (0x1), region = 62 }

// kernel: double_conv.3
= control target key start
LH: loop header
LB: loop body
LE: loop exit
PB: predicated region body
PF: predicated region fallthrough
CT: control target
= control target key end

     0   :  { %s3577_s15 = smov 0   ;;  %s4958_s0 = inlined_call_operand.vmem [shape: f32[2,16,16,128], index: 0, kind: input, shape index: {}]   ;;  %s4959_s1 = inlined_call_operand.vmem [shape: bf16[3,384,128], index: 1, kind: input, shape index: {}]   ;;  %s4960_s2 = inlined_call_operand.vmem [shape: f32[1,128], index: 2, kind: input, shape index: {}]   ;;  %s4961_s3 = inlined_call_operand.vmem [shape: f32[2,16,16,128], index: 3, kind: output, shape index: {0}]   ;;  %s4962_s4 = inlined_call_operand.vmem [shape: f32[2,2,128], index: 4, kind: output, shape index: {1}]  }
   0x1 LB: > { %s2371_s16 = sadd.s32 4294967295, %s3547_s15   ;;  %p2375_p0 = scmp.ge.s32.totalorder %s3547_s15, 1  ;;  %s3547_s15 = sphi %s3577_s15, %s15_s15  }
   0x2   : > { %p165_p1 = scmp.lt.s32.totalorder %s3547_s15, 3 }
   0x4   : > { %p166_p2 = pnand %p2375_p0, %p165_p1 }
   0x6   : > { %169 = sbr.rel (%p166_p2) target bundleno = 551 (0x227), region = 32 }
   0xb   : > { %v3469_v0 = vld [vmem:[%s4959_s1 + $0x138] sm:$0xff]   ;;  %v3471_v2 = vld [vmem:[%s4959_s1 + $0x130] sm:$0xff]   ;;  %p195_p3 = scmp.lt.s32.totalorder %s2371_s16, 1  ;;  %v3473_v4 = vld [vmem:[%s4959_s1 + $0x128] sm:$0xff]   ;;  %vm377_vm0 = vcmask 1046528   ;;  %vm275_vm1 = vcmask 1040384  }
   0xc   : > { %v3470_v1 = vld [vmem:[%s4959_s1 + $0xf8] sm:$0xff]   ;;  %2890 = vmatprep.subr.bf16.mxu0 %v3469_v0  ;;  %3442 = vmatprep.subr.bf16.mxu1 %v3469_v0  ;;  %v3472_v3 = vld [vmem:[%s4959_s1 + $0xf0] sm:$0xff]   ;;  %v3474_v5 = vld [vmem:[%s4959_s1 + $0xe8] sm:$0xff]   ;;  %vm3549_vm3 = vmmov 1  }
   0xd   : > { %2891 = vmatpush3.bf16.msra.mxu0 %v3470_v1  ;;  %3450 = vmatpush3.bf16.msra.mxu1 %v3470_v1  ;;  %s5001_s16 = smov (!%p195_p3, %s2371_s16), 1  ;;  %v3475_v6 = vld [vmem:[%s4959_s1 + $0x120] sm:$0xff]   ;;  %v3477_v8 = vld [vmem:[%s4959_s1 + $0x118] sm:$0xff]   ;;  %v3479_v10 = vld [vmem:[%s4959_s1 + $0x110] sm:$0xff]  }
   0xe   : > { %2892 = vmatprep.subr.bf16.mxu0 %v3471_v2  ;;  %3443 = vmatprep.subr.bf16.mxu1 %v3471_v2  ;;  %v3476_v7 = vld [vmem:[%s4959_s1 + $0xe0] sm:$0xff]   ;;  %s2888_s7 = sshll.u32 %s5001_s16, 8  ;;  %v3478_v9 = vld [vmem:[%s4959_s1 + $0xd8] sm:$0xff]   ;;  %v3480_v14 = vld [vmem:[%s4959_s1 + $0xd0] sm:$0xff]  }
   0xf   : > { %s3620_s12 = scalar_lea.vmem %s4958_s0, %s2888_s7  ;;  %v3481_v18 = vld [vmem:[%s4959_s1 + $0x108] sm:$0xff]   ;;  %v3483_v30 = vld [vmem:[%s4959_s1 + $0x100] sm:$0xff]   ;;  %vm3672_vm2 = vmneg %vm275_vm1  ;;  %s4776_s6 = scalar_lea.vmem %s4961_s3, %s2888_s7 }
  0x10   : > { %v3629_v11 = vld [vmem:[%s3620_s12] sm:$0xff]  ;;  %v3632_v12 = vld [vmem:[%s3620_s12 + $0x8] sm:$0xff]  ;;  %v3657_v25 = vld [vmem:[%s3620_s12 + $0xd0] sm:$0xff]  ;;  %s2380_s7 = sshll.u32 %s5001_s16, 1 }
  0x11   : > { %2893 = vmatpush3.bf16.msra.mxu0 %v3472_v3  ;;  %3451 = vmatpush3.bf16.msra.mxu1 %v3472_v3  ;;  %v234_v13 = vld [vmem:[%s3620_s12 + $0xc0] sm:$0xff]  ;;  %v3640_v15 = vpack.c.bf16 %v3632_v12, %v3629_v11  ;;  %v235_v16 = vld [vmem:[%s3620_s12 + $0xc8] sm:$0xff]  ;;  %v278_v23 = vrot.slane %v3629_v11, 7  ;;  %v279_v24 = vrot.slane %v3632_v12, 7  ;;  %v237_v28 = vld [vmem:[%s3620_s12 + $0xd8] sm:$0xff]  ;;  %v419_v29 = vrot.slane %v3657_v25, 1  ;;  %s208_s10 = scalar_lea.vmem %s4962_s4, %s2380_s7 }
  0x12   : > { %2894 = vmatprep.subr.bf16.mxu0 %v3473_v4  ;;  %3444 = vmatprep.subr.bf16.mxu1 %v3473_v4  ;;  %v416_v17 = vrot.slane %v234_v13, 1  ;;  %v417_v19 = vrot.slane %v235_v16, 1  ;;  %v3646_v20 = vpack.c.bf16 %v235_v16, %v234_v13  ;;  %v3482_v22 = vld [vmem:[%s4959_s1 + $0xc8] sm:$0xff]   ;;  %v314_v26 = vrot.slane %v234_v13, 7  ;;  %v3484_v33 = vld [vmem:[%s4959_s1 + $0xc0] sm:$0xff]   ;;  %v3678_v38 = vld [vmem:[%s3620_s12 + $0x10] sm:$0xff] }
  0x13   : > { %803 = vmatprep.mubr.bf16.mxu0 %v3640_v15  ;;  %v315_v27 = vrot.slane %v235_v16, 7  ;;  %v420_v31 = vrot.slane %v237_v28, 1  ;;  %v280_v34 = vsel %vm275_vm1, %v278_v23, %v279_v24  ;;  %v3681_v39 = vld [vmem:[%s3620_s12 + $0x18] sm:$0xff]  ;;  %v281_v44 = vrot.slane %v3678_v38, 7  ;;  %v3696_v46 = vld [vmem:[%s3620_s12 + $0xe0] sm:$0xff]  ;;  %v239_v47 = vld [vmem:[%s3620_s12 + $0xe8] sm:$0xff] }
  0x14   : > { %899 = vmatprep.mubr.bf16.mxu1 %v3646_v20  ;;  %v418_v21 = vsel %vm377_vm0, %v416_v17, %v417_v19  ;;  %v3485_v40 = vld [vmem:[%s4959_s1 + $0x178] sm:$0xff]   ;;  %v3689_v42 = vpack.c.bf16 %v280_v34, %v278_v23  ;;  %v282_v45 = vrot.slane %v3681_v39, 7  ;;  %vm3704_vm4 = vmpackc.low %vm3549_vm3, %vm3672_vm2  ;;  %v3487_v50 = vld [vmem:[%s4959_s1 + $0x170] sm:$0xff]   ;;  %v317_v51 = vrot.slane %v3657_v25, 7 }
  0x15   : > { %2895 = vmatpush3.bf16.msra.mxu0 %v3474_v5  ;;  %3452 = vmatpush3.bf16.msra.mxu1 %v3474_v5  ;;  %v3664_v32 = vpack.c.bf16 %v417_v19, %v418_v21  ;;  %v421_v35 = vsel %vm377_vm0, %v419_v29, %v420_v31  ;;  %v316_v37 = vsel %vm275_vm1, %v314_v26, %v315_v27  ;;  %v3486_v41 = vld [vmem:[%s4959_s1 + $0xb8] sm:$0xff]   ;;  %v318_v52 = vrot.slane %v237_v28, 7  ;;  %v3490_v53 = vld [vmem:[%s4959_s1 + $0xb0] sm:$0xff]   ;;  %v3488_v0 = vld [vmem:[%s4959_s1 + $0x168] sm:$0xff]  }
  0x16   : > { %2896 = vmatprep.subr.bf16.mxu0 %v3475_v6  ;;  %3445 = vmatprep.subr.bf16.mxu1 %v3475_v6  ;;  %v3691_v43 = vpack.c.bf16 %v316_v37, %v314_v26  ;;  %v3699_v48 = vpack.c.bf16 %v420_v31, %v421_v35  ;;  %v422_v54 = vrot.slane %v3696_v46, 1  ;;  %v423_v55 = vrot.slane %v239_v47, 1  ;;  %v3721_v57 = vld [vmem:[%s3620_s12 + $0xf0] sm:$0xff]  ;;  %v3724_v58 = vld [vmem:[%s3620_s12 + $0xf8] sm:$0xff]  ;;  %v3743_v1 = vld [vmem:[%s3620_s12 + $0x20] sm:$0xff] }
  0x17   : > { %v3718_v56 = vpack.c.bf16 %v3681_v39, %v3678_v38  ;;  %v3727_v59 = vpack.c.bf16 %v237_v28, %v3657_v25  ;;  %v425_v60 = vrot.slane %v3721_v57, 1  ;;  %v426_v61 = vrot.slane %v3724_v58, 1  ;;  %v3748_v3 = vld [vmem:[%s3620_s12 + $0x28] sm:$0xff]  ;;  %v3498_v21 = vld [vmem:[%s4959_s1 + $0xa0] sm:$0xff]   ;;  %v3789_v24 = vld [vmem:[%s3620_s12 + $0x30] sm:$0xff] }
  0x18   : > { %v283_v62 = vsel %vm275_vm1, %v281_v44, %v282_v45  ;;  %v319_v63 = vsel %vm275_vm1, %v317_v51, %v318_v52  ;;  %v424_v2 = vsel %vm377_vm0, %v422_v54, %v423_v55  ;;  %v3494_v4 = vld [vmem:[%s4959_s1 + $0xa8] sm:$0xff]   ;;  %v285_v13 = vrot.slane %v3748_v3, 7  ;;  %v3792_v25 = vld [vmem:[%s3620_s12 + $0x38] sm:$0xff]  ;;  %v3492_v36 = vld [vmem:[%s4959_s1 + $0x150] sm:$0xff]  }
  0x19   : > { %2897 = vmatpush3.bf16.msra.mxu0 %v3476_v7  ;;  %3453 = vmatpush3.bf16.msra.mxu1 %v3476_v7  ;;  %v3754_v5 = vpack.c.bf16 %v423_v55, %v424_v2  ;;  %v427_v6 = vsel %vm377_vm0, %v425_v60, %v426_v61  ;;  %v3757_v7 = vpack.c.bf16 %v283_v62, %v281_v44  ;;  %v320_v16 = vrot.slane %v3696_v46, 7  ;;  %v3491_v26 = vld [vmem:[%s4959_s1 + $0x158] sm:$0xff]   ;;  %v3833_v44 = vld [vmem:[%s3620_s12 + $0x80] sm:$0xff]  ;;  %v3854_v55 = vld [vmem:[%s3620_s12 + $0x90] sm:$0xff] }
  0x1a   : > { %2898 = vmatprep.subr.bf16.mxu0 %v3477_v8  ;;  %3446 = vmatprep.subr.bf16.mxu1 %v3477_v8  ;;  %v3759_v8 = vpack.c.bf16 %v319_v63, %v317_v51  ;;  %v321_v17 = vrot.slane %v239_v47, 7  ;;  %v3774_v19 = vpack.c.bf16 %v239_v47, %v3696_v46  ;;  %v287_v29 = vrot.slane %v3789_v24, 7  ;;  %v3838_v46 = vld [vmem:[%s3620_s12 + $0x40] sm:$0xff]  ;;  %v3506_v47 = vld [vmem:[%s4959_s1 + $0x90] sm:$0xff]   ;;  %vm3865_vm5 = vmpackc.low %vm377_vm0, %vm3549_vm3 }
  0x1b   : > { %v3806_v31 = vpack.c.bf16 %v3792_v25, %v3789_v24  ;;  %v324_v34 = vrot.slane %v3724_v58, 7  ;;  %v380_v35 = vrot.slane %v3629_v11, 1  ;;  %v3816_v37 = vpack.c.bf16 %v3724_v58, %v3721_v57  ;;  %v3495_v2 = vld [vmem:[%s4959_s1 + $0x140] sm:$0xff]  }
  0x1c   : > { %v322_v23 = vsel %vm275_vm1, %v320_v16, %v321_v17  ;;  %v302_v51 = vrot.slane %v3833_v44, 7  ;;  %v383_v52 = vrot.slane %v3678_v38, 1  ;;  %v305_v63 = vrot.slane %v3854_v55, 7 }
  0x1d   : > { %2899 = vmatpush3.bf16.msra.mxu0 %v3478_v9  ;;  %3454 = vmatpush3.bf16.msra.mxu1 %v3478_v9  ;;  %v284_v9 = vrot.slane %v3743_v1, 7  ;;  %v3800_v28 = vpack.c.bf16 %v322_v23, %v320_v16  ;;  %v3886_v16 = vld [vmem:[%s3620_s12 + $0xa0] sm:$0xff]  ;;  %v386_v17 = vrot.slane %v3743_v1, 1  ;;  %v3896_v23 = vld [vmem:[%s3620_s12 + $0xb0] sm:$0xff] }
  0x1e   : > { %2900 = vmatprep.subr.bf16.mxu0 %v3479_v10  ;;  %3447 = vmatprep.subr.bf16.mxu1 %v3479_v10  ;;  %v3762_v10 = vpack.c.bf16 %v426_v61, %v427_v6  ;;  %v3861_v61 = vld [vmem:[%s3620_s12 + $0x98] sm:$0xff] }
  0x21   : > { %2901 = vmatpush3.bf16.msra.mxu0 %v3480_v14  ;;  %3455 = vmatpush3.bf16.msra.mxu1 %v3480_v14  ;;  %v3767_v14 = vpack.c.bf16 %v3748_v3, %v3743_v1  ;;  %v3496_v1 = vld [vmem:[%s4959_s1 + $0x78] sm:$0xff]  }
  0x22   : > { %2902 = vmatprep.subr.bf16.mxu0 %v3481_v18  ;;  %3448 = vmatprep.subr.bf16.mxu1 %v3481_v18  ;;  %v3489_v18 = vld [vmem:[%s4959_s1 + $0x160] sm:$0xff]  }
  0x25   : > { %2903 = vmatpush3.bf16.msra.mxu0 %v3482_v22  ;;  %3456 = vmatpush3.bf16.msra.mxu1 %v3482_v22  ;;  %v286_v22 = vsel %vm275_vm1, %v284_v9, %v285_v13 }
  0x26   : > { %2904 = vmatprep.subr.bf16.mxu0 %v3483_v30  ;;  %3449 = vmatprep.subr.bf16.mxu1 %v3483_v30  ;;  %v3798_v27 = vpack.c.bf16 %v286_v22, %v284_v9  ;;  %v288_v30 = vrot.slane %v3792_v25, 7 }
  0x28   : > { %v289_v11 = vsel %vm275_vm1, %v287_v29, %v288_v30  ;;  %v3511_v30 = vld [vmem:[%s4959_s1 + $0x88] sm:$0xff]  }
  0x29   : > { %2905 = vmatpush3.bf16.msra.mxu0 %v3484_v33  ;;  %3457 = vmatpush3.bf16.msra.mxu1 %v3484_v33  ;;  %v323_v33 = vrot.slane %v3721_v57, 7  ;;  %v384_v57 = vrot.slane %v3681_v39, 1  ;;  %v3857_v58 = vpack.c.bf16 %v289_v11, %v287_v29  ;;  %v3929_v11 = vld [vmem:[%s3620_s12 + $0x58] sm:$0xff] }
  0x2a   : > { %3298 = vmatprep.subr.bf16.mxu1 %v3485_v40  ;;  %3346 = vmatprep.subr.bf16.mxu0 %v3486_v41 }
  0x2b   : > { %v325_v45 = vsel %vm275_vm1, %v323_v33, %v324_v34 }
  0x2c   : > { %2456 = vmatmul.mubr.msk.bf16.vlgmr.msra.gmra.mxu0 %vm3704_vm4, %v3689_v42  ;;  %2504 = vmatmul.mubr.msk.bf16.vlgmr.msra.gmra.mxu1 %vm3704_vm4, %v3691_v43  ;;  %v3869_v62 = vpack.c.bf16 %v325_v45, %v323_v33  ;;  %v308_v33 = vrot.slane %v3886_v16, 7 }
  0x2d   : > { %3299 = vmatpush3.bf16.msra.mxu1 %v3485_v40  ;;  %3347 = vmatpush3.bf16.msra.mxu0 %v3486_v41  ;;  %v381_v40 = vrot.slane %v3632_v12, 1  ;;  %v3503_v41 = vld [vmem:[%s4959_s1 + $0x98] sm:$0xff]   ;;  %v3493_v12 = vld [vmem:[%s4959_s1 + $0x148] sm:$0xff]  }
  0x2e   : > { %3300 = vmatprep.subr.bf16.mxu1 %v3487_v50  ;;  %811 = vmatprep.mubr.bf16.mxu0 %v3718_v56  ;;  %4970 = vst [vmem:[#allocation2_spill] sm:$0xff] %v3869_v62 }
  0x2f   : > { %907 = vmatprep.mubr.bf16.mxu1 %v3727_v59  ;;  %3348 = vmatprep.subr.bf16.mxu0 %v3490_v53  ;;  %v382_v60 = vsel %vm377_vm0, %v380_v35, %v381_v40  ;;  %v385_v35 = vsel %vm377_vm0, %v383_v52, %v384_v57  ;;  %v390_v52 = vrot.slane %v3792_v25, 1 }
  0x31   : > { %3301 = vmatpush3.bf16.msra.mxu1 %v3487_v50  ;;  %3349 = vmatpush3.bf16.msra.mxu0 %v3490_v53  ;;  %v3844_v50 = vld [vmem:[%s3620_s12 + $0x88] sm:$0xff] }
  0x32   : > { %3302 = vmatprep.subr.bf16.mxu1 %v3488_v0  ;;  %3350 = vmatprep.subr.bf16.mxu0 %v3494_v4  ;;  %v3850_v53 = vld [vmem:[%s3620_s12 + $0x48] sm:$0xff]  ;;  %v303_v54 = vrot.slane %v3844_v50, 7 }
  0x33   : > { %v291_v6 = vrot.slane %v3850_v53, 7  ;;  %v3881_v9 = vpack.c.bf16 %v3850_v53, %v3838_v46 }
  0x34   : > { %2460 = vmatmul.mubr.msk.bf16.gmra.mxu0 %vm3704_vm4, %v3757_v7  ;;  %2508 = vmatmul.mubr.msk.bf16.gmra.mxu1 %vm3704_vm4, %v3759_v8  ;;  %v304_v39 = vsel %vm275_vm1, %v302_v51, %v303_v54 }
  0x35   : > { %3303 = vmatpush3.bf16.msra.mxu1 %v3488_v0  ;;  %819 = vmatprep.mubr.bf16.mxu0 %v3767_v14  ;;  %v306_v0 = vrot.slane %v3861_v61, 7  ;;  %v3883_v13 = vpack.c.bf16 %v304_v39, %v302_v51  ;;  %v3938_v39 = vpack.c.bf16 %v384_v57, %v385_v35 }
  0x36   : > { %3304 = vmatprep.subr.bf16.mxu1 %v3489_v18  ;;  %915 = vmatprep.mubr.bf16.mxu1 %v3774_v19 }
  0x37   : > { %3351 = vmatpush3.bf16.msra.mxu0 %v3494_v4  ;;  %v290_v4 = vrot.slane %v3838_v46, 7  ;;  %v307_v22 = vsel %vm275_vm1, %v305_v63, %v306_v0 }
  0x38   : > { %3352 = vmatprep.subr.bf16.mxu0 %v3498_v21  ;;  %v3899_v29 = vpack.c.bf16 %v307_v22, %v305_v63  ;;  %v392_v63 = vrot.slane %v3838_v46, 1  ;;  %v3499_v22 = vld [vmem:[%s4959_s1 + $0x70] sm:$0xff]  }
  0x39   : > { %3305 = vmatpush3.bf16.msra.mxu1 %v3489_v18  ;;  %v3889_v18 = vpack.c.bf16 %v381_v40, %v382_v60  ;;  %v3922_v40 = vld [vmem:[%s3620_s12 + $0xb8] sm:$0xff] }
  0x3a   : > { %3306 = vmatprep.subr.bf16.mxu1 %v3491_v26  ;;  %v312_v51 = vrot.slane %v3922_v40, 7 }
  0x3b   : > { %3353 = vmatpush3.bf16.msra.mxu0 %v3498_v21  ;;  %v3892_v21 = vld [vmem:[%s3620_s12 + $0xa8] sm:$0xff] }
  0x3c   : > { %2464 = vmatmul.mubr.msk.bf16.gmra.mxu0 %vm3704_vm4, %v3798_v27  ;;  %2512 = vmatmul.mubr.msk.bf16.gmra.mxu1 %vm3704_vm4, %v3800_v28  ;;  %v309_v34 = vrot.slane %v3892_v21, 7 }
  0x3d   : > { %3307 = vmatpush3.bf16.msra.mxu1 %v3491_v26  ;;  %827 = vmatprep.mubr.bf16.mxu0 %v3806_v31  ;;  %v387_v26 = vrot.slane %v3748_v3, 1  ;;  %v3914_v3 = vld [vmem:[%s3620_s12 + $0x50] sm:$0xff] }
  0x3e   : > { %3308 = vmatprep.subr.bf16.mxu1 %v3492_v36  ;;  %923 = vmatprep.mubr.bf16.mxu1 %v3816_v37  ;;  %v310_v45 = vsel %vm275_vm1, %v308_v33, %v309_v34  ;;  %v293_v25 = vrot.slane %v3914_v3, 7  ;;  %v3951_v57 = vpack.c.bf16 %v3929_v11, %v3914_v3  ;;  %v3514_v34 = vld [vmem:[%s4959_s1 + $0x80] sm:$0xff]  }
  0x3f   : > { %3354 = vmatprep.subr.bf16.mxu0 %v3503_v41  ;;  %v388_v54 = vsel %vm377_vm0, %v386_v17, %v387_v26  ;;  %v3936_v60 = vpack.c.bf16 %v310_v45, %v308_v33  ;;  %v222_v33 = vld [vmem:[%s3620_s12 + $0x60] sm:$0xff]  ;;  %v396_v45 = vrot.slane %v3929_v11, 1 }
  0x40   : > { %3355 = vmatpush3.bf16.msra.mxu0 %v3503_v41  ;;  %v311_v41 = vrot.slane %v3896_v23, 7  ;;  %v3956_v17 = vpack.c.bf16 %v387_v26, %v388_v54  ;;  %v296_v54 = vrot.slane %v222_v33, 7 }
  0x41   : > { %3309 = vmatpush3.bf16.msra.mxu1 %v3492_v36  ;;  %3356 = vmatprep.subr.bf16.mxu0 %v3506_v47  ;;  %v292_v36 = vsel %vm275_vm1, %v290_v4, %v291_v6  ;;  %v3497_v6 = vld [vmem:[%s4959_s1 + $0x38] sm:$0xff]  }
  0x42   : > { %3310 = vmatprep.subr.bf16.mxu1 %v3493_v12  ;;  %v3941_v0 = vpack.c.bf16 %v292_v36, %v290_v4  ;;  %v393_v4 = vrot.slane %v3850_v53, 1  ;;  %v223_v53 = vld [vmem:[%s3620_s12 + $0x68] sm:$0xff] }
  0x43   : > { %v3501_v36 = vld [vmem:[%s4959_s1 + $0x68] sm:$0xff]  }
  0x44   : > { %2468 = vmatmul.mubr.msk.bf16.gmra.mxu0 %vm3704_vm4, %v3857_v58  ;;  %2516 = vmatmul.mubr.msk.bf16.gmra.mxu1 %vm3704_vm4, %v3869_v62  ;;  %v394_v35 = vsel %vm377_vm0, %v392_v63, %v393_v4  ;;  %v398_v63 = vrot.slane %v222_v33, 1  ;;  %v3508_v62 = vld [vmem:[%s4959_s1 + $0x18] sm:$0xff]  }
  0x45   : > { %3311 = vmatpush3.bf16.msra.mxu1 %v3493_v12  ;;  %835 = vmatprep.mubr.bf16.mxu0 %v3881_v9  ;;  %v389_v12 = vrot.slane %v3789_v24, 1  ;;  %v313_v24 = vsel %vm275_vm1, %v311_v41, %v312_v51 }
  0x46   : > { %3312 = vmatprep.subr.bf16.mxu1 %v3495_v2  ;;  %3314 = vmatprep.mubr.msk.bf16.mxu1 %vm3865_vm5, %v3889_v18  ;;  %v3953_v46 = vpack.c.bf16 %v313_v24, %v311_v41  ;;  %v395_v41 = vrot.slane %v3914_v3, 1  ;;  %v3994_v24 = vpack.c.bf16 %v223_v53, %v222_v33  ;;  %v399_v3 = vrot.slane %v223_v53, 1 }
  0x47   : > { %3357 = vmatpush3.bf16.msra.mxu0 %v3506_v47  ;;  %v294_v47 = vrot.slane %v3929_v11, 7  ;;  %v3502_v11 = vld [vmem:[%s4959_s1 + $0x28] sm:$0xff]  }
  0x48   : > { %3358 = vmatprep.subr.bf16.mxu0 %v3511_v30  ;;  %v400_v33 = vsel %vm377_vm0, %v398_v63, %v399_v3 }
  0x49   : > { %3313 = vmatpush3.bf16.msra.mxu1 %v3495_v2  ;;  %v3500_v2 = vld [vmem:[%s4959_s1 + $0x30] sm:$0xff]   ;;  %v295_v26 = vsel %vm275_vm1, %v293_v25, %v294_v47  ;;  %v3996_v47 = vpack.c.bf16 %v393_v4, %v394_v35  ;;  %v4031_v63 = vpack.c.bf16 %v399_v3, %v400_v33 }
  0x4a   : > { %3026 = vmatprep.subr.bf16.mxu1 %v3496_v1  ;;  %v3518_v1 = vld [vmem:[%s4959_s1 + $0x1f8] sm:$0xff]   ;;  %v3990_v51 = vpack.c.bf16 %v295_v26, %v293_v25  ;;  %v224_v25 = vld [vmem:[%s3620_s12 + $0x70] sm:$0xff] }
  0x4b   : > { %3359 = vmatpush3.bf16.msra.mxu0 %v3511_v30  ;;  %v391_v30 = vsel %vm377_vm0, %v389_v12, %v390_v52  ;;  %v3507_v26 = vld [vmem:[%s4959_s1 + $0x58] sm:$0xff]  }
  0x4c   : > { %2472 = vmatmul.mubr.msk.bf16.gmra.mxu0 %vm3704_vm4, %v3941_v0  ;;  %3315 = vmatmul.mubr.msk.bf16.vlgmr.msra.gmra.mxu1 %vm3865_vm5, %v3938_v39  ;;  %v3992_v12 = vpack.c.bf16 %v390_v52, %v391_v30  ;;  %v3504_v52 = vld [vmem:[%s4959_s1 + $0x60] sm:$0xff]  }
  0x4d   : > { %3027 = vmatpush3.bf16.msra.mxu1 %v3497_v6  ;;  %843 = vmatprep.mubr.bf16.mxu0 %v3951_v57  ;;  %v297_v6 = vrot.slane %v223_v53, 7  ;;  %v299_v53 = vrot.slane %v224_v25, 7 }
  0x4e   : > { %3318 = vmatprep.mubr.msk.bf16.mxu1 %vm3865_vm5, %v3956_v17  ;;  %3028 = vmatprep.subr.bf16.mxu1 %v3499_v22  ;;  %v397_v22 = vsel %vm377_vm0, %v395_v41, %v396_v45 }
  0x4f   : > { %3360 = vmatprep.subr.bf16.mxu0 %v3514_v34  ;;  %v298_v4 = vsel %vm275_vm1, %v296_v54, %v297_v6 }
  0x50   : > { %3361 = vmatpush3.bf16.msra.mxu0 %v3514_v34  ;;  %v3505_v34 = vld [vmem:[%s4959_s1 + $0x20] sm:$0xff]   ;;  %v4025_v30 = vpack.c.bf16 %v298_v4, %v296_v54  ;;  %v3510_v4 = vld [vmem:[%s4959_s1 + $0x10] sm:$0xff]  }
  0x51   : > { %3029 = vmatpush3.bf16.msra.mxu1 %v3500_v2  ;;  %3162 = vmatprep.subr.bf16.mxu0 %v3518_v1  ;;  %v225_v2 = vld [vmem:[%s3620_s12 + $0x78] sm:$0xff]  ;;  %v4027_v1 = vpack.c.bf16 %v396_v45, %v397_v22  ;;  %v3509_v45 = vld [vmem:[%s4959_s1 + $0x50] sm:$0xff]   ;;  %v3512_v22 = vld [vmem:[%s4959_s1 + $0x48] sm:$0xff]  }
  0x52   : > { %3030 = vmatprep.subr.bf16.mxu1 %v3501_v36  ;;  %v300_v35 = vrot.slane %v225_v2, 7  ;;  %v401_v36 = vrot.slane %v224_v25, 1  ;;  %v402_v41 = vrot.slane %v225_v2, 1  ;;  %v4029_v6 = vpack.c.bf16 %v225_v2, %v224_v25 }
  0x54   : > { %2476 = vmatmul.mubr.msk.bf16.gmra.mxu0 %vm3704_vm4, %v3990_v51  ;;  %3319 = vmatmul.mubr.msk.bf16.gmra.mxu1 %vm3865_vm5, %v3992_v12  ;;  %v301_v54 = vsel %vm275_vm1, %v299_v53, %v300_v35  ;;  %v403_v3 = vsel %vm377_vm0, %v401_v36, %v402_v41  ;;  %v408_v35 = vrot.slane %v3861_v61, 1  ;;  %v410_v36 = vrot.slane %v3886_v16, 1 }
  0x55   : > { %851 = vmatprep.mubr.bf16.mxu0 %v3994_v24  ;;  %3322 = vmatprep.mubr.msk.bf16.mxu1 %vm3865_vm5, %v3996_v47  ;;  %v4060_v2 = vpack.c.bf16 %v301_v54, %v299_v53  ;;  %v4062_v33 = vpack.c.bf16 %v402_v41, %v403_v3  ;;  %v3513_v53 = vld [vmem:[%s4959_s1 + $0x8] sm:$0xff]   ;;  %v4102_v3 = vpack.c.bf16 %v3861_v61, %v3854_v55 }
  0x56   : > { %3031 = vmatpush3.bf16.msra.mxu1 %v3502_v11  ;;  %v404_v11 = vrot.slane %v3833_v44, 1 }
  0x57   : > { %3032 = vmatprep.subr.bf16.mxu1 %v3504_v52  ;;  %v405_v52 = vrot.slane %v3844_v50, 1 }
  0x59   : > { %v406_v25 = vsel %vm377_vm0, %v404_v11, %v405_v52  ;;  %v411_v11 = vrot.slane %v3892_v21, 1 }
  0x5a   : > { %3033 = vmatpush3.bf16.msra.mxu1 %v3505_v34  ;;  %v4066_v34 = vpack.c.bf16 %v3844_v50, %v3833_v44  ;;  %v3515_v44 = vld [vmem:[%s4959_s1 + $0x40] sm:$0xff]  }
  0x5b   : > { %3034 = vmatprep.subr.bf16.mxu1 %v3507_v26  ;;  %v4068_v26 = vpack.c.bf16 %v405_v52, %v406_v25  ;;  %v412_v41 = vsel %vm377_vm0, %v410_v36, %v411_v11  ;;  %v3516_v52 = vld [vmem:[%s4959_s1] sm:$0xff]  }
  0x5c   : > { %2480 = vmatmul.mubr.msk.bf16.gmra.mxu0 %vm3704_vm4, %v4025_v30  ;;  %3323 = vmatmul.mubr.msk.bf16.gmra.mxu1 %vm3865_vm5, %v4027_v1  ;;  %v4104_v25 = vpack.c.bf16 %v411_v11, %v412_v41  ;;  %v3521_v41 = vld [vmem:[%s4959_s1 + $0x1b0] sm:$0xff]  }
  0x5d   : > { %859 = vmatprep.mubr.bf16.mxu0 %v4029_v6  ;;  %3326 = vmatprep.mubr.msk.bf16.mxu1 %vm3865_vm5, %v4031_v63 }
  0x5e   : > { %3035 = vmatpush3.bf16.msra.mxu1 %v3508_v62  ;;  %v407_v62 = vrot.slane %v3854_v55, 1 }
  0x5f   : > { %3036 = vmatprep.subr.bf16.mxu1 %v3509_v45  ;;  %v3517_v45 = vld [vmem:[%s4959_s1 + $0x238] sm:$0xff]  }
  0x60   : > { %v409_v50 = vsel %vm377_vm0, %v407_v62, %v408_v35  ;;  %v4123_v62 = vpack.c.bf16 %v3892_v21, %v3886_v16  ;;  %v3550_v16 = vmov 0.0  }
  0x61   : > { %v4098_v54 = vpack.c.bf16 %v408_v35, %v409_v50  ;;  %v4137_v35 = vpack.c.bf16 %v3922_v40, %v3896_v23  ;;  %v378_v21 = vrot.slane %v3550_v16, 1  ;;  %v3522_v50 = vld [vmem:[%s4959_s1 + $0x230] sm:$0xff]  }
  0x62   : > { %3037 = vmatpush3.bf16.msra.mxu1 %v3510_v4  ;;  %v413_v4 = vrot.slane %v3896_v23, 1  ;;  %v276_v23 = vrot.slane %v3550_v16, 7  ;;  %v3529_v16 = vld [vmem:[%s4959_s1 + $0x198] sm:$0xff]  }
  0x63   : > { %3038 = vmatprep.subr.bf16.mxu1 %v3512_v22  ;;  %v414_v22 = vrot.slane %v3922_v40, 1  ;;  %v4149_v36 = vpack.c.bf16 %v378_v21, %v378_v21  ;;  %v3551_v40 = vmov 0.0|0.0   ;;  %v3530_v21 = vld [vmem:[%s4959_s1 + $0x1d0] sm:$0xff]  }
  0x64   : > { %2484 = vmatmul.mubr.msk.bf16.gmra.mxu0 %vm3704_vm4, %v4060_v2  ;;  %3327 = vmatmul.mubr.msk.bf16.gmra.mxu1 %vm3865_vm5, %v4062_v33  ;;  %v4161_v11 = vpack.c.bf16 %v276_v23, %v276_v23  ;;  %v3538_v23 = vld [vmem:[%s4959_s1 + $0x210] sm:$0xff]  }
  0x65   : > { %867 = vmatprep.mubr.bf16.mxu0 %v4066_v34  ;;  %3330 = vmatprep.mubr.msk.bf16.mxu1 %vm3865_vm5, %v4068_v26  ;;  %v415_v55 = vsel %vm377_vm0, %v413_v4, %v414_v22  ;;  %v3532_v4 = vld [vmem:[%s4959_s1 + $0x220] sm:$0xff]  }
  0x66   : > { %3039 = vmatpush3.bf16.msra.mxu1 %v3513_v53  ;;  %v4119_v61 = vpack.c.bf16 %v414_v22, %v415_v55  ;;  %v3519_v53 = vld [vmem:[%s4959_s1 + $0x1b8] sm:$0xff]   ;;  %v3526_v22 = vld [vmem:[%s4959_s1 + $0x1a0] sm:$0xff]  }
  0x67   : > { %3040 = vmatprep.subr.bf16.mxu1 %v3515_v44  ;;  %v3520_v44 = vld [vmem:[%s4959_s1 + $0x1f0] sm:$0xff]   ;;  %v3537_v55 = vld [vmem:[%s4959_s1 + $0x218] sm:$0xff]  }
  0x6a   : > { %3041 = vmatpush3.bf16.msra.mxu1 %v3516_v52  ;;  %v3523_v52 = vld [vmem:[%s4959_s1 + $0x1e8] sm:$0xff]  }
  0x6b   : > { %3394 = vmatprep.subr.bf16.mxu1 %v3517_v45 }
  0x6c   : > { %2488 = vmatmul.mubr.msk.bf16.gmra.mxu0 %vm3704_vm4, %v3883_v13  ;;  %3331 = vmatmul.mubr.msk.bf16.gmra.mxu1 %vm3865_vm5, %v4098_v54 }
  0x6d   : > { %875 = vmatprep.mubr.bf16.mxu0 %v4102_v3  ;;  %3334 = vmatprep.mubr.msk.bf16.mxu1 %vm3865_vm5, %v4104_v25 }
  0x74   : > { %2492 = vmatmul.mubr.msk.bf16.gmra.mxu0 %vm3704_vm4, %v3899_v29  ;;  %3335 = vmatmul.mubr.msk.bf16.gmra.mxu1 %vm3865_vm5, %v4119_v61 }
  0x75   : > { %883 = vmatprep.mubr.bf16.mxu0 %v4123_v62  ;;  %3338 = vmatprep.mubr.msk.bf16.mxu1 %vm3865_vm5, %v3664_v32 }
  0x7c   : > { %2496 = vmatmul.mubr.msk.bf16.gmra.mxu0 %vm3704_vm4, %v3936_v60  ;;  %3339 = vmatmul.mubr.msk.bf16.gmra.mxu1 %vm3865_vm5, %v3699_v48 }
  0x7d   : > { %891 = vmatprep.mubr.bf16.mxu0 %v4137_v35  ;;  %3342 = vmatprep.mubr.msk.bf16.mxu1 %vm3865_vm5, %v3754_v5 }
  0x84   : > { %2500 = vmatmul.mubr.msk.bf16.gmra.mxu0 %vm3704_vm4, %v3953_v46  ;;  %3343 = vmatmul.mubr.msk.bf16.gmra.mxu1 %vm3865_vm5, %v3762_v10 }
  0x85   : > { %1269 = vmatprep.mubr.bf16.mxu1 %v3551_v40  ;;  %3362 = vmatprep.mubr.msk.bf16.mxu0 %vm3865_vm5, %v4149_v36 }
  0x8c   : > { %2592 = vmatmul.mubr.msk.bf16.vlgmr.msra.gmra.mxu1 %vm3704_vm4, %v4161_v11  ;;  %3363 = vmatmul.mubr.msk.bf16.vlgmr.msra.gmra.mxu0 %vm3865_vm5, %v3889_v18  ;;  %v3527_v18 = vld [vmem:[%s4959_s1 + $0x228] sm:$0xff]  }
  0x8d   : > { %3395 = vmatpush3.bf16.msra.mxu1 %v3517_v45  ;;  %3163 = vmatpush3.bf16.msra.mxu0 %v3519_v53  ;;  %v3525_v45 = vld [vmem:[%s4959_s1 + $0x1e0] sm:$0xff]   ;;  %v3531_v53 = vld [vmem:[%s4959_s1 + $0x190] sm:$0xff]  }
  0x8e   : > { %1277 = vmatprep.mubr.bf16.mxu1 %v3640_v15  ;;  %3366 = vmatprep.mubr.msk.bf16.mxu0 %vm3865_vm5, %v3938_v39  ;;  %v3524_v15 = vld [vmem:[%s4959_s1 + $0x1a8] sm:$0xff]  }
  0x8f   : > { %3164 = vmatprep.subr.bf16.mxu0 %v3520_v44  ;;  %3396 = vmatprep.subr.bf16.mxu1 %v3522_v50  ;;  %v3533_v44 = vld [vmem:[%s4959_s1 + $0x1c8] sm:$0xff]  }
  0x91   : > { %3165 = vmatpush3.bf16.msra.mxu0 %v3521_v41  ;;  %3397 = vmatpush3.bf16.msra.mxu1 %v3522_v50  ;;  %v3539_v50 = vld [vmem:[%s4959_s1 + $0x208] sm:$0xff]  }
  0x92   : > { %3166 = vmatprep.subr.bf16.mxu0 %v3523_v52  ;;  %3398 = vmatprep.subr.bf16.mxu1 %v3527_v18  ;;  %v3534_v41 = vld [vmem:[%s4959_s1 + $0x188] sm:$0xff]   ;;  %v3535_v52 = vld [vmem:[%s4959_s1 + $0x1c0] sm:$0xff]  }
  0x94   : > { %2596 = vmatmul.mubr.msk.bf16.gmra.mxu1 %vm3704_vm4, %v3689_v42  ;;  %3367 = vmatmul.mubr.msk.bf16.gmra.mxu0 %vm3865_vm5, %v3956_v17  ;;  %v3528_v42 = vld [vmem:[%s4959_s1 + $0x1d8] sm:$0xff]  }
  0x95   : > { %1285 = vmatprep.mubr.bf16.mxu1 %v3718_v56  ;;  %3370 = vmatprep.mubr.msk.bf16.mxu0 %vm3865_vm5, %v3992_v12 }
  0x96   : > { %3167 = vmatpush3.bf16.msra.mxu0 %v3524_v15  ;;  %3399 = vmatpush3.bf16.msra.mxu1 %v3527_v18  ;;  %v3540_v18 = vld [vmem:[%s4959_s1 + $0x200] sm:$0xff]  }
  0x97   : > { %3168 = vmatprep.subr.bf16.mxu0 %v3525_v45  ;;  %3400 = vmatprep.subr.bf16.mxu1 %v3532_v4  ;;  %v3536_v15 = vld [vmem:[%s4959_s1 + $0x180] sm:$0xff]  }
  0x9a   : > { %3169 = vmatpush3.bf16.msra.mxu0 %v3526_v22  ;;  %3401 = vmatpush3.bf16.msra.mxu1 %v3532_v4 }
  0x9b   : > { %3170 = vmatprep.subr.bf16.mxu0 %v3528_v42  ;;  %3402 = vmatprep.subr.bf16.mxu1 %v3537_v55 }
  0x9c   : > { %2600 = vmatmul.mubr.msk.bf16.gmra.mxu1 %vm3704_vm4, %v3757_v7  ;;  %3371 = vmatmul.mubr.msk.bf16.gmra.mxu0 %vm3865_vm5, %v3996_v47 }
  0x9d   : > { %1293 = vmatprep.mubr.bf16.mxu1 %v3767_v14  ;;  %3374 = vmatprep.mubr.msk.bf16.mxu0 %vm3865_vm5, %v4027_v1 }
  0x9e   : > { %3171 = vmatpush3.bf16.msra.mxu0 %v3529_v16  ;;  %3403 = vmatpush3.bf16.msra.mxu1 %v3537_v55 }
  0x9f   : > { %3172 = vmatprep.subr.bf16.mxu0 %v3530_v21  ;;  %3404 = vmatprep.subr.bf16.mxu1 %v3538_v23 }
  0xa2   : > { %3173 = vmatpush3.bf16.msra.mxu0 %v3531_v53  ;;  %3405 = vmatpush3.bf16.msra.mxu1 %v3538_v23 }
  0xa3   : > { %3174 = vmatprep.subr.bf16.mxu0 %v3533_v44  ;;  %3406 = vmatprep.subr.bf16.mxu1 %v3539_v50 }
  0xa4   : > { %2604 = vmatmul.mubr.msk.bf16.gmra.mxu1 %vm3704_vm4, %v3798_v27  ;;  %3375 = vmatmul.mubr.msk.bf16.gmra.mxu0 %vm3865_vm5, %v4031_v63 }
  0xa5   : > { %1301 = vmatprep.mubr.bf16.mxu1 %v3806_v31  ;;  %3378 = vmatprep.mubr.msk.bf16.mxu0 %vm3865_vm5, %v4062_v33 }
  0xa6   : > { %3175 = vmatpush3.bf16.msra.mxu0 %v3534_v41  ;;  %3407 = vmatpush3.bf16.msra.mxu1 %v3539_v50 }
  0xa7   : > { %3176 = vmatprep.subr.bf16.mxu0 %v3535_v52  ;;  %3408 = vmatprep.subr.bf16.mxu1 %v3540_v18 }
  0xaa   : > { %3177 = vmatpush3.bf16.msra.mxu0 %v3536_v15  ;;  %3409 = vmatpush3.bf16.msra.mxu1 %v3540_v18 }
  0xac   : > { %2608 = vmatmul.mubr.msk.bf16.gmra.mxu1 %vm3704_vm4, %v3857_v58  ;;  %3379 = vmatmul.mubr.msk.bf16.gmra.mxu0 %vm3865_vm5, %v4068_v26 }
  0xad   : > { %1309 = vmatprep.mubr.bf16.mxu1 %v3881_v9  ;;  %3382 = vmatprep.mubr.msk.bf16.mxu0 %vm3865_vm5, %v4098_v54 }
  0xb4   : > { %2612 = vmatmul.mubr.msk.bf16.gmra.mxu1 %vm3704_vm4, %v3941_v0  ;;  %3383 = vmatmul.mubr.msk.bf16.gmra.mxu0 %vm3865_vm5, %v4104_v25 }
  0xb5   : > { %1317 = vmatprep.mubr.bf16.mxu1 %v3951_v57  ;;  %3386 = vmatprep.mubr.msk.bf16.mxu0 %vm3865_vm5, %v4119_v61 }
  0xbc   : > { %2616 = vmatmul.mubr.msk.bf16.gmra.mxu1 %vm3704_vm4, %v3990_v51  ;;  %3387 = vmatmul.mubr.msk.bf16.gmra.mxu0 %vm3865_vm5, %v3664_v32 }
  0xbd   : > { %1325 = vmatprep.mubr.bf16.mxu1 %v3994_v24  ;;  %3390 = vmatprep.mubr.msk.bf16.mxu0 %vm3865_vm5, %v3699_v48 }
  0xc4   : > { %2620 = vmatmul.mubr.msk.bf16.gmra.mxu1 %vm3704_vm4, %v4025_v30  ;;  %3391 = vmatmul.mubr.msk.bf16.gmra.mxu0 %vm3865_vm5, %v3754_v5 }
  0xc5   : > { %1333 = vmatprep.mubr.bf16.mxu1 %v4029_v6  ;;  %1784 = vmatprep.mubr.bf16.mxu0 %v3718_v56 }
  0xcc   : > { %2624 = vmatmul.mubr.msk.bf16.gmra.mxu1 %vm3704_vm4, %v4060_v2  ;;  %2776 = vmatmul.mubr.msk.bf16.vlgmr.msra.gmra.mxu0 %vm3704_vm4, %v3757_v7 }
  0xcd   : > { %1341 = vmatprep.mubr.bf16.mxu1 %v4066_v34  ;;  %1792 = vmatprep.mubr.bf16.mxu0 %v3767_v14 }
  0xd4   : > { %2628 = vmatmul.mubr.msk.bf16.gmra.mxu1 %vm3704_vm4, %v3883_v13  ;;  %2780 = vmatmul.mubr.msk.bf16.gmra.mxu0 %vm3704_vm4, %v3798_v27 }
  0xd5   : > { %1349 = vmatprep.mubr.bf16.mxu1 %v4102_v3  ;;  %1800 = vmatprep.mubr.bf16.mxu0 %v3806_v31 }
  0xdc   : > { %2632 = vmatmul.mubr.msk.bf16.gmra.mxu1 %vm3704_vm4, %v3899_v29  ;;  %2784 = vmatmul.mubr.msk.bf16.gmra.mxu0 %vm3704_vm4, %v3857_v58 }
  0xdd   : > { %1357 = vmatprep.mubr.bf16.mxu1 %v4123_v62  ;;  %1808 = vmatprep.mubr.bf16.mxu0 %v3881_v9 }
  0xe4   : > { %2636 = vmatmul.mubr.msk.bf16.gmra.mxu1 %vm3704_vm4, %v3936_v60  ;;  %2788 = vmatmul.mubr.msk.bf16.gmra.mxu0 %vm3704_vm4, %v3941_v0 }
  0xe5   : > { %1365 = vmatprep.mubr.bf16.mxu1 %v4137_v35  ;;  %1816 = vmatprep.mubr.bf16.mxu0 %v3951_v57 }
  0xec   : > { %v2906_v56 = vpop.f32.mrf.mxu0  ;;  %v2978_v7 = vpop.f32.mrf.mxu1  ;;  %2640 = vmatmul.mubr.msk.bf16.gmra.mxu1 %vm3704_vm4, %v3953_v46  ;;  %2792 = vmatmul.mubr.msk.bf16.gmra.mxu0 %vm3704_vm4, %v3990_v51 }
  0xed   : > { %1373 = vmatprep.mubr.bf16.mxu1 %v3646_v20  ;;  %1824 = vmatprep.mubr.bf16.mxu0 %v3994_v24 }
  0xee   : > { %v2907_v14 = vpop.f32.mrf.mxu0  ;;  %v2979_v27 = vpop.f32.mrf.mxu1 }
  0xef   : > { %v4347_v31 = vadd.f32 %v2907_v14, %v2906_v56  ;;  %v4349_v58 = vadd.f32 %v2979_v27, %v2978_v7 }
  0xf0   : > { %v2909_v9 = vpop.f32.mrf.mxu0  ;;  %v2981_v0 = vpop.f32.mrf.mxu1 }
  0xf2   : > { %v2910_v57 = vpop.f32.mrf.mxu0  ;;  %v2982_v45 = vpop.f32.mrf.mxu1 }
  0xf3   : > { %v4351_v4 = vadd.f32 %v2910_v57, %v2909_v9  ;;  %v4353_v22 = vadd.f32 %v2982_v45, %v2981_v0 }
  0xf4   : > { %v2912_v42 = vpop.f32.mrf.mxu0  ;;  %v2984_v51 = vpop.f32.mrf.mxu1  ;;  %2644 = vmatmul.mubr.msk.bf16.gmra.mxu1 %vm3704_vm4, %v3691_v43  ;;  %2796 = vmatmul.mubr.msk.bf16.gmra.mxu0 %vm3704_vm4, %v4025_v30 }
  0xf5   : > { %1381 = vmatprep.mubr.bf16.mxu1 %v3727_v59  ;;  %1832 = vmatprep.mubr.bf16.mxu0 %v4029_v6 }
  0xf6   : > { %v2913_v24 = vpop.f32.mrf.mxu0  ;;  %v2985_v55 = vpop.f32.mrf.mxu1 }
  0xf7   : > { %v2914_v16 = vadd.f32 %v2913_v24, %v2912_v42  ;;  %v4363_v21 = vadd.f32 %v2985_v55, %v2984_v51 }
  0xf8   : > { %v2915_v23 = vpop.f32.mrf.mxu0  ;;  %v2987_v53 = vpop.f32.mrf.mxu1 }
  0xfa   : > { %v2916_v44 = vpop.f32.mrf.mxu0  ;;  %v2988_v50 = vpop.f32.mrf.mxu1 }
  0xfb   : > { %v2917_v41 = vadd.f32 %v2916_v44, %v2915_v23  ;;  %v4365_v52 = vadd.f32 %v2988_v50, %v2987_v53 }
  0xfc   : > { %v2918_v18 = vpop.f32.mrf.mxu0  ;;  %v2990_v15 = vpop.f32.mrf.mxu1  ;;  %2648 = vmatmul.mubr.msk.bf16.gmra.mxu1 %vm3704_vm4, %v3759_v8  ;;  %2800 = vmatmul.mubr.msk.bf16.gmra.mxu0 %vm3704_vm4, %v4060_v2 }
  0xfd   : > { %1389 = vmatprep.mubr.bf16.mxu1 %v3774_v19  ;;  %1840 = vmatprep.mubr.bf16.mxu0 %v4066_v34 }
  0xfe   : > { %v2919_v30 = vpop.f32.mrf.mxu0  ;;  %v2991_v6 = vpop.f32.mrf.mxu1 }
  0xff   : > { %v2920_v56 = vadd.f32 %v2919_v30, %v2918_v18  ;;  %v4375_v7 = vadd.f32 %v2991_v6, %v2990_v15 }
 0x100   : > { %v2921_v14 = vpop.f32.mrf.mxu0  ;;  %v2993_v27 = vpop.f32.mrf.mxu1 }
 0x102   : > { %v2922_v9 = vpop.f32.mrf.mxu0  ;;  %v2994_v0 = vpop.f32.mrf.mxu1 }
 0x103   : > { %v2923_v57 = vadd.f32 %v2922_v9, %v2921_v14  ;;  %v4377_v45 = vadd.f32 %v2994_v0, %v2993_v27 }
 0x104   : > { %v2924_v42 = vpop.f32.mrf.mxu0  ;;  %v2996_v51 = vpop.f32.mrf.mxu1  ;;  %2652 = vmatmul.mubr.msk.bf16.gmra.mxu1 %vm3704_vm4, %v3800_v28  ;;  %2804 = vmatmul.mubr.msk.bf16.gmra.mxu0 %vm3704_vm4, %v3883_v13 }
 0x105   : > { %1848 = vmatprep.mubr.bf16.mxu0 %v4102_v3  ;;  %3410 = vmatprep.mubr.msk.bf16.mxu1 %vm3865_vm5, %v3938_v39 }
 0x106   : > { %v2925_v2 = vpop.f32.mrf.mxu0  ;;  %v2997_v34 = vpop.f32.mrf.mxu1 }
 0x107   : > { %v2926_v24 = vadd.f32 %v2925_v2, %v2924_v42  ;;  %v4389_v55 = vadd.f32 %v2997_v34, %v2996_v51 }
 0x108   : > { %v2927_v23 = vpop.f32.mrf.mxu0  ;;  %v2999_v53 = vpop.f32.mrf.mxu1 }
 0x10a   : > { %v2928_v44 = vpop.f32.mrf.mxu0  ;;  %v3000_v50 = vpop.f32.mrf.mxu1 }
 0x10b   : > { %v2929_v18 = vadd.f32 %v2928_v44, %v2927_v23  ;;  %v4391_v15 = vadd.f32 %v3000_v50, %v2999_v53 }
 0x10c   : > { %v2930_v30 = vpop.f32.mrf.mxu0  ;;  %v3316_v13 = vpop.f32.mrf.mxu1  ;;  %2808 = vmatmul.mubr.msk.bf16.gmra.mxu0 %vm3704_vm4, %v3899_v29  ;;  %3411 = vmatmul.mubr.msk.bf16.vlgmr.msra.gmra.mxu1 %vm3865_vm5, %v3956_v17 }
 0x10d   : > { %v4399_v39 = vadd.f32 %v3316_v13, %v2914_v16  ;;  %1856 = vmatprep.mubr.bf16.mxu0 %v4123_v62  ;;  %3414 = vmatprep.mubr.msk.bf16.mxu1 %vm3865_vm5, %v3992_v12 }
 0x10e   : > { %v2931_v3 = vpop.f32.mrf.mxu0  ;;  %v966_v6 = vpop.f32.mrf.mxu1 }
 0x10f   : > { %v2932_v14 = vadd.f32 %v2931_v3, %v2930_v30  ;;  %v4406_v27 = vadd.f32 %v4347_v31, %v966_v6 }
 0x110   : > { %v2933_v9 = vpop.f32.mrf.mxu0  ;;  %v3317_v29 = vpop.f32.mrf.mxu1 }
 0x111   : > { %v4408_v0 = vadd.f32 %v3317_v29, %v2917_v41 }
 0x112   : > { %v2934_v42 = vpop.f32.mrf.mxu0  ;;  %v969_v17 = vpop.f32.mrf.mxu1 }
 0x113   : > { %v2935_v16 = vadd.f32 %v2934_v42, %v2933_v9  ;;  %v4411_v51 = vadd.f32 %v4351_v4, %v969_v17 }
 0x114   : > { %v2936_v62 = vpop.f32.mrf.mxu0  ;;  %v3320_v2 = vpop.f32.mrf.mxu1  ;;  %2812 = vmatmul.mubr.msk.bf16.gmra.mxu0 %vm3704_vm4, %v3936_v60  ;;  %3415 = vmatmul.mubr.msk.bf16.gmra.mxu1 %vm3865_vm5, %v3996_v47 }
 0x115   : > { %v4419_v12 = vadd.f32 %v3320_v2, %v2926_v24  ;;  %1864 = vmatprep.mubr.bf16.mxu0 %v4137_v35  ;;  %3418 = vmatprep.mubr.msk.bf16.mxu1 %vm3865_vm5, %v4027_v1 }
 0x116   : > { %v2937_v31 = vpop.f32.mrf.mxu0  ;;  %v982_v4 = vpop.f32.mrf.mxu1 }
 0x117   : > { %v2938_v41 = vadd.f32 %v2937_v31, %v2936_v62  ;;  %v4425_v34 = vadd.f32 %v2920_v56, %v982_v4 }
 0x118   : > { %v2939_v23 = vpop.f32.mrf.mxu0  ;;  %v3321_v53 = vpop.f32.mrf.mxu1 }
 0x119   : > { %v4427_v60 = vadd.f32 %v3321_v53, %v2929_v18 }
 0x11a   : > { %v2940_v44 = vpop.f32.mrf.mxu0  ;;  %v985_v50 = vpop.f32.mrf.mxu1 }
 0x11b   : > { %v2941_v47 = vadd.f32 %v2940_v44, %v2939_v23  ;;  %v4429_v24 = vadd.f32 %v2923_v57, %v985_v50 }
 0x11c   : > { %v2942_v30 = vpop.f32.mrf.mxu0  ;;  %v3324_v35 = vpop.f32.mrf.mxu1  ;;  %2816 = vmatmul.mubr.msk.bf16.gmra.mxu0 %vm3704_vm4, %v3953_v46  ;;  %3419 = vmatmul.mubr.msk.bf16.gmra.mxu1 %vm3865_vm5, %v4031_v63 }
 0x11d   : > { %v4437_v1 = vadd.f32 %v3324_v35, %v2938_v41  ;;  %1872 = vmatprep.mubr.bf16.mxu0 %v3646_v20  ;;  %3422 = vmatprep.mubr.msk.bf16.mxu1 %vm3865_vm5, %v4062_v33 }
 0x11e   : > { %v2943_v56 = vpop.f32.mrf.mxu0  ;;  %v998_v57 = vpop.f32.mrf.mxu1 }
 0x11f   : > { %v2944_v18 = vadd.f32 %v2943_v56, %v2942_v30  ;;  %v4443_v13 = vadd.f32 %v2932_v14, %v998_v57 }
 0x120   : > { %v2945_v3 = vpop.f32.mrf.mxu0  ;;  %v3325_v6 = vpop.f32.mrf.mxu1 }
 0x121   : > { %v4445_v46 = vadd.f32 %v3325_v6, %v2941_v47 }
 0x122   : > { %v2946_v9 = vpop.f32.mrf.mxu0  ;;  %v1001_v29 = vpop.f32.mrf.mxu1 }
 0x123   : > { %v2947_v63 = vadd.f32 %v2946_v9, %v2945_v3  ;;  %v4447_v42 = vadd.f32 %v2935_v16, %v1001_v29 }
 0x124   : > { %v2948_v17 = vpop.f32.mrf.mxu0  ;;  %v3328_v20 = vpop.f32.mrf.mxu1  ;;  %2820 = vmatmul.mubr.msk.bf16.gmra.mxu0 %vm3704_vm4, %v3691_v43  ;;  %3423 = vmatmul.mubr.msk.bf16.gmra.mxu1 %vm3865_vm5, %v4068_v26 }
 0x125   : > { %1880 = vmatprep.mubr.bf16.mxu0 %v3727_v59  ;;  %3426 = vmatprep.mubr.msk.bf16.mxu1 %vm3865_vm5, %v4098_v54 }
 0x126   : > { %v2949_v33 = vpop.f32.mrf.mxu0  ;;  %v1014_v14 = vpop.f32.mrf.mxu1 }
 0x127   : > { %v2950_v16 = vadd.f32 %v2949_v33, %v2948_v17  ;;  %v4459_v62 = vadd.f32 %v2944_v18, %v1014_v14 }
 0x128   : > { %v2951_v2 = vpop.f32.mrf.mxu0  ;;  %v3329_v31 = vpop.f32.mrf.mxu1 }
 0x129   : > { %v4461_v4 = vadd.f32 %v3328_v20, %v2950_v16  ;;  %v4971_v16 = vld [vmem:[#allocation2_spill] sm:$0xff] }
 0x12a   : > { %v2952_v43 = vpop.f32.mrf.mxu0  ;;  %v1017_v41 = vpop.f32.mrf.mxu1 }
 0x12b   : > { %v2953_v23 = vadd.f32 %v2952_v43, %v2951_v2  ;;  %v4463_v53 = vadd.f32 %v2947_v63, %v1017_v41 }
 0x12c   : > { %v2954_v26 = vpop.f32.mrf.mxu0  ;;  %v3332_v59 = vpop.f32.mrf.mxu1  ;;  %2824 = vmatmul.mubr.msk.bf16.gmra.mxu0 %vm3704_vm4, %v3759_v8  ;;  %3427 = vmatmul.mubr.msk.bf16.gmra.mxu1 %vm3865_vm5, %v4104_v25 }
 0x12d   : > { %v4471_v54 = vadd.f32 %v3329_v31, %v2953_v23  ;;  %1888 = vmatprep.mubr.bf16.mxu0 %v3774_v19  ;;  %3430 = vmatprep.mubr.msk.bf16.mxu1 %vm3865_vm5, %v4119_v61 }
 0x12e   : > { %v2955_v44 = vpop.f32.mrf.mxu0  ;;  %v1030_v50 = vpop.f32.mrf.mxu1 }
 0x12f   : > { %v2956_v47 = vadd.f32 %v2955_v44, %v2954_v26 }
 0x130   : > { %v2957_v30 = vpop.f32.mrf.mxu0  ;;  %v3333_v35 = vpop.f32.mrf.mxu1 }
 0x131   : > { %v4477_v56 = vadd.f32 %v2956_v47, %v1030_v50 }
 0x132   : > { %v2958_v8 = vpop.f32.mrf.mxu0  ;;  %v1033_v57 = vpop.f32.mrf.mxu1 }
 0x133   : > { %v2959_v18 = vadd.f32 %v2958_v8, %v2957_v30 }
 0x134   : > { %v2960_v3 = vpop.f32.mrf.mxu0  ;;  %v3336_v25 = vpop.f32.mrf.mxu1  ;;  %2828 = vmatmul.mubr.msk.bf16.gmra.mxu0 %vm3704_vm4, %v3800_v28  ;;  %3431 = vmatmul.mubr.msk.bf16.gmra.mxu1 %vm3865_vm5, %v3664_v32 }
 0x135   : > { %v4485_v19 = vadd.f32 %v2959_v18, %v1033_v57  ;;  %1896 = vmatprep.mubr.bf16.mxu0 %v3816_v37  ;;  %3434 = vmatprep.mubr.msk.bf16.mxu1 %vm3865_vm5, %v3699_v48 }
 0x136   : > { %v2961_v61 = vpop.f32.mrf.mxu0  ;;  %v1046_v6 = vpop.f32.mrf.mxu1 }
 0x137   : > { %v2962_v9 = vadd.f32 %v2961_v61, %v2960_v3 }
 0x138   : > { %v2963_v29 = vpop.f32.mrf.mxu0  ;;  %v3337_v63 = vpop.f32.mrf.mxu1 }
 0x139   : > { %v4491_v17 = vadd.f32 %v3332_v59, %v2962_v9 }
 0x13a   : > { %v2964_v28 = vpop.f32.mrf.mxu0  ;;  %v1049_v20 = vpop.f32.mrf.mxu1 }
 0x13b   : > { %v2965_v33 = vadd.f32 %v2964_v28, %v2963_v29 }
 0x13c   : > { %v2966_v14 = vpop.f32.mrf.mxu0  ;;  %v3340_v32 = vpop.f32.mrf.mxu1  ;;  %2832 = vmatmul.mubr.msk.bf16.gmra.mxu0 %vm3704_vm4, %v4971_v16  ;;  %3435 = vmatmul.mubr.msk.bf16.gmra.mxu1 %vm3865_vm5, %v3754_v5 }
 0x13d   : > { %v4499_v48 = vadd.f32 %v3333_v35, %v2965_v33  ;;  %v4502_v37 = vadd.f32 %v3340_v32, %v4363_v21  ;;  %1904 = vmatprep.mubr.bf16.mxu0 %v3551_v40  ;;  %3438 = vmatprep.mubr.msk.bf16.mxu1 %vm3865_vm5, %v3762_v10 }
 0x13e   : > { %v2967_v2 = vpop.f32.mrf.mxu0  ;;  %v1062_v31 = vpop.f32.mrf.mxu1 }
 0x13f   : > { %v2968_v43 = vadd.f32 %v2967_v2, %v2966_v14  ;;  %v4509_v41 = vadd.f32 %v4349_v58, %v1062_v31 }
 0x140   : > { %v2969_v23 = vpop.f32.mrf.mxu0  ;;  %v3341_v26 = vpop.f32.mrf.mxu1 }
 0x141   : > { %v4511_v5 = vadd.f32 %v2968_v43, %v1046_v6  ;;  %v4514_v59 = vadd.f32 %v3341_v26, %v4365_v52 }
 0x142   : > { %v2970_v21 = vpop.f32.mrf.mxu0  ;;  %v1065_v44 = vpop.f32.mrf.mxu1 }
 0x143   : > { %v2971_v40 = vadd.f32 %v2970_v21, %v2969_v23  ;;  %v4517_v50 = vadd.f32 %v4353_v22, %v1065_v44 }
 0x144   : > { %v2972_v10 = vpop.f32.mrf.mxu0  ;;  %v3344_v47 = vpop.f32.mrf.mxu1  ;;  %2836 = vmatmul.mubr.msk.bf16.gmra.mxu0 %vm3704_vm4, %v4161_v11  ;;  %3439 = vmatmul.mubr.msk.bf16.gmra.mxu1 %vm3865_vm5, %v4149_v36 }
 0x145   : > { %v4525_v58 = vadd.f32 %v2971_v40, %v1049_v20  ;;  %v4528_v52 = vadd.f32 %v3344_v47, %v4389_v55 }
 0x146   : > { %v2973_v30 = vpop.f32.mrf.mxu0  ;;  %v1078_v35 = vpop.f32.mrf.mxu1 }
 0x147   : > { %v2974_v8 = vadd.f32 %v2973_v30, %v2972_v10  ;;  %v4531_v22 = vadd.f32 %v4375_v7, %v1078_v35 }
 0x148   : > { %v2975_v57 = vpop.f32.mrf.mxu0  ;;  %v3345_v18 = vpop.f32.mrf.mxu1 }
 0x149   : > { %v4533_v3 = vadd.f32 %v3336_v25, %v2974_v8  ;;  %v4536_v49 = vadd.f32 %v3345_v18, %v4391_v15 }
 0x14a   : > { %v2976_v38 = vpop.f32.mrf.mxu0  ;;  %v1081_v36 = vpop.f32.mrf.mxu1 }
 0x14b   : > { %v2977_v11 = vadd.f32 %v2976_v38, %v2975_v57  ;;  %v4539_v61 = vadd.f32 %v4377_v45, %v1081_v36 }
 0x14c   : > { %v3042_v55 = vpop.f32.mrf.mxu1  ;;  %v3364_v6 = vpop.f32.mrf.mxu0 }
 0x14d   : > { %v4541_v9 = vadd.f32 %v3337_v63, %v2977_v11 }
 0x14e   : > { %v3043_v29 = vpop.f32.mrf.mxu1  ;;  %v1432_v7 = vpop.f32.mrf.mxu0 }
 0x14f   : > { %v3044_v28 = vadd.f32 %v3043_v29, %v3042_v55 }
 0x150   : > { %v3045_v20 = vpop.f32.mrf.mxu1  ;;  %v3365_v33 = vpop.f32.mrf.mxu0 }
 0x151   : > { %v1272_v25 = vadd.f32 %v3044_v28, %v4406_v27 }
 0x152   : > { %v3046_v14 = vpop.f32.mrf.mxu1  ;;  %v1435_v15 = vpop.f32.mrf.mxu0 }
 0x153   : > { %v4544_v32 = vadd.f32 %v1432_v7, %v1272_v25  ;;  %v3047_v16 = vadd.f32 %v3046_v14, %v3045_v20 }
 0x154   : > { %v3048_v2 = vpop.f32.mrf.mxu1  ;;  %v3368_v31 = vpop.f32.mrf.mxu0 }
 0x155   : > { %v1275_v45 = vadd.f32 %v3047_v16, %v4411_v51 }
 0x156   : > { %v3049_v43 = vpop.f32.mrf.mxu1  ;;  %v1448_v23 = vpop.f32.mrf.mxu0 }
 0x157   : > { %v4547_v63 = vadd.f32 %v1435_v15, %v1275_v45  ;;  %v3050_v26 = vadd.f32 %v3049_v43, %v3048_v2 }
 0x158   : > { %v3051_v21 = vpop.f32.mrf.mxu1  ;;  %v3369_v44 = vpop.f32.mrf.mxu0 }
 0x159   : > { %v1280_v40 = vadd.f32 %v3050_v26, %v4399_v39 }
 0x15a   : > { %v3052_v10 = vpop.f32.mrf.mxu1  ;;  %v1451_v27 = vpop.f32.mrf.mxu0 }
 0x15b   : > { %v3053_v47 = vadd.f32 %v3052_v10, %v3051_v21  ;;  %v4550_v30 = vadd.f32 %v3364_v6, %v1280_v40 }
 0x15c   : > { %v3054_v35 = vpop.f32.mrf.mxu1  ;;  %v3372_v8 = vpop.f32.mrf.mxu0 }
 0x15d   : > { %v1283_v57 = vadd.f32 %v3053_v47, %v4408_v0 }
 0x15e   : > { %v3055_v18 = vpop.f32.mrf.mxu1  ;;  %v1464_v51 = vpop.f32.mrf.mxu0 }
 0x15f   : > { %v3056_v38 = vadd.f32 %v3055_v18, %v3054_v35  ;;  %v4553_v36 = vadd.f32 %v3365_v33, %v1283_v57 }
 0x160   : > { %v3057_v11 = vpop.f32.mrf.mxu1  ;;  %v3373_v55 = vpop.f32.mrf.mxu0 }
 0x161   : > { %v1288_v29 = vadd.f32 %v3056_v38, %v4425_v34 }
 0x162   : > { %v3058_v7 = vpop.f32.mrf.mxu1  ;;  %v1467_v39 = vpop.f32.mrf.mxu0 }
 0x163   : > { %v3059_v28 = vadd.f32 %v3058_v7, %v3057_v11  ;;  %v4556_v20 = vadd.f32 %v1448_v23, %v1288_v29 }
 0x164   : > { %v3060_v6 = vpop.f32.mrf.mxu1  ;;  %v4558_v25 = vpop.f32.mrf.mxu0 }
 0x165   : > { %v1291_v14 = vadd.f32 %v3059_v28, %v4429_v24 }
 0x166   : > { %v3061_v0 = vpop.f32.mrf.mxu1  ;;  %v1480_v15 = vpop.f32.mrf.mxu0 }
 0x167   : > { %v3062_v16 = vadd.f32 %v3061_v0, %v3060_v6  ;;  %v4561_v2 = vadd.f32 %v1451_v27, %v1291_v14 }
 0x168   : > { %v3063_v33 = vpop.f32.mrf.mxu1  ;;  %v4563_v45 = vpop.f32.mrf.mxu0 }
 0x169   : > { %v1296_v34 = vadd.f32 %v3062_v16, %v4419_v12 }
 0x16a   : > { %v3064_v43 = vpop.f32.mrf.mxu1  ;;  %v1483_v26 = vpop.f32.mrf.mxu0 }
 0x16b   : > { %v3065_v21 = vadd.f32 %v3064_v43, %v3063_v33  ;;  %v4566_v23 = vadd.f32 %v3368_v31, %v1296_v34 }
 0x16c   : > { %v3066_v40 = vpop.f32.mrf.mxu1  ;;  %v4568_v10 = vpop.f32.mrf.mxu0 }
 0x16d   : > { %v1299_v24 = vadd.f32 %v3065_v21, %v4427_v60 }
 0x16e   : > { %v3067_v47 = vpop.f32.mrf.mxu1  ;;  %v4571_v35 = vpop.f32.mrf.mxu0 }
 0x16f   : > { %v3068_v27 = vadd.f32 %v3067_v47, %v3066_v40  ;;  %v4573_v57 = vadd.f32 %v3369_v44, %v1299_v24 }
 0x170   : > { %v3069_v18 = vpop.f32.mrf.mxu1  ;;  %v4575_v38 = vpop.f32.mrf.mxu0 }
 0x171   : > { %v1304_v12 = vadd.f32 %v3068_v27, %v4443_v13 }
 0x172   : > { %v3070_v11 = vpop.f32.mrf.mxu1  ;;  %v4578_v29 = vpop.f32.mrf.mxu0 }
 0x173   : > { %v3071_v31 = vadd.f32 %v3070_v11, %v3069_v18  ;;  %v4580_v7 = vadd.f32 %v1464_v51, %v1304_v12 }
 0x174   : > { %v3072_v28 = vpop.f32.mrf.mxu1  ;;  %v4582_v6 = vpop.f32.mrf.mxu0 }
 0x175   : > { %v1307_v60 = vadd.f32 %v3071_v31, %v4447_v42 }
 0x176   : > { %v3073_v14 = vpop.f32.mrf.mxu1  ;;  %v4585_v0 = vpop.f32.mrf.mxu0 }
 0x177   : > { %v3074_v44 = vadd.f32 %v3073_v14, %v3072_v28  ;;  %v4587_v16 = vadd.f32 %v1467_v39, %v1307_v60 }
 0x178   : > { %v3075_v33 = vpop.f32.mrf.mxu1  ;;  %v4589_v34 = vpop.f32.mrf.mxu0 }
 0x179   : > { %v1312_v13 = vadd.f32 %v3074_v44, %v4437_v1 }
 0x17a   : > { %v3076_v43 = vpop.f32.mrf.mxu1  ;;  %v4592_v21 = vpop.f32.mrf.mxu0 }
 0x17b   : > { %v3077_v51 = vadd.f32 %v3076_v43, %v3075_v33  ;;  %v4594_v40 = vadd.f32 %v3372_v8, %v1312_v13 }
 0x17c   : > { %v3078_v24 = vpop.f32.mrf.mxu1  ;;  %v4596_v47 = vpop.f32.mrf.mxu0 }
 0x17d   : > { %v1315_v42 = vadd.f32 %v3077_v51, %v4445_v46 }
 0x17e   : > { %v3079_v27 = vpop.f32.mrf.mxu1  ;;  %v4599_v18 = vpop.f32.mrf.mxu0 }
 0x17f   : > { %v3080_v39 = vadd.f32 %v3079_v27, %v3078_v24  ;;  %v4601_v12 = vadd.f32 %v3373_v55, %v1315_v42 }
 0x180   : > { %v3081_v11 = vpop.f32.mrf.mxu1  ;;  %v4603_v31 = vpop.f32.mrf.mxu0 }
 0x181   : > { %v1320_v1 = vadd.f32 %v3080_v39, %v4459_v62 }
 0x182   : > { %v3082_v28 = vpop.f32.mrf.mxu1  ;;  %v4606_v60 = vpop.f32.mrf.mxu0 }
 0x183   : > { %v3083_v8 = vadd.f32 %v3082_v28, %v3081_v11  ;;  %v4608_v14 = vadd.f32 %v1480_v15, %v1320_v1 }
 0x184   : > { %v3084_v44 = vpop.f32.mrf.mxu1  ;;  %v4610_v33 = vpop.f32.mrf.mxu0 }
 0x185   : > { %4972 = vst [vmem:[#allocation2_spill] sm:$0xff] %v4610_v33  ;;  %v1323_v46 = vadd.f32 %v3083_v8, %v4463_v53 }
 0x186   : > { %v3085_v13 = vpop.f32.mrf.mxu1  ;;  %v4613_v43 = vpop.f32.mrf.mxu0 }
 0x187   : > { %v3086_v55 = vadd.f32 %v3085_v13, %v3084_v44  ;;  %v4615_v51 = vadd.f32 %v1483_v26, %v1323_v46 }
 0x188   : > { %v3087_v24 = vpop.f32.mrf.mxu1  ;;  %v4617_v42 = vpop.f32.mrf.mxu0 }
 0x189   : > { %4973 = vst [vmem:[#allocation3_spill] sm:$0xff] %v4617_v42  ;;  %v1328_v62 = vadd.f32 %v3086_v55, %v4461_v4 }
 0x18a   : > { %v3088_v27 = vpop.f32.mrf.mxu1  ;;  %v4620_v39 = vpop.f32.mrf.mxu0 }
 0x18b   : > { %v3089_v15 = vadd.f32 %v3088_v27, %v3087_v24  ;;  %v4623_v11 = vadd.f32 %v4558_v25, %v1328_v62 }
 0x18c   : > { %v3090_v1 = vpop.f32.mrf.mxu1  ;;  %v4625_v53 = vpop.f32.mrf.mxu0 }
 0x18d   : > { %v1331_v28 = vadd.f32 %v3089_v15, %v4471_v54 }
 0x18e   : > { %v3091_v8 = vpop.f32.mrf.mxu1  ;;  %v4628_v26 = vpop.f32.mrf.mxu0 }
 0x18f   : > { %v3092_v44 = vadd.f32 %v3091_v8, %v3090_v1  ;;  %v4631_v46 = vadd.f32 %v4563_v45, %v1331_v28 }
 0x190   : > { %v3093_v4 = vpop.f32.mrf.mxu1  ;;  %v4633_v13 = vpop.f32.mrf.mxu0 }
 0x191   : > { %v1336_v55 = vadd.f32 %v3092_v44, %v4477_v56 }
 0x192   : > { %v3094_v24 = vpop.f32.mrf.mxu1  ;;  %v4636_v25 = vpop.f32.mrf.mxu0 }
 0x193   : > { %v3095_v62 = vadd.f32 %v3094_v24, %v3093_v4  ;;  %v4639_v27 = vadd.f32 %v4571_v35, %v1336_v55 }
 0x194   : > { %v3096_v54 = vpop.f32.mrf.mxu1  ;;  %v4641_v15 = vpop.f32.mrf.mxu0 }
 0x195   : > { %4974 = vst [vmem:[#allocation4_spill] sm:$0xff] %v4639_v27  ;;  %v1339_v1 = vadd.f32 %v3095_v62, %v4485_v19 }
 0x196   : > { %v3097_v8 = vpop.f32.mrf.mxu1  ;;  %v4644_v45 = vpop.f32.mrf.mxu0 }
 0x197   : > { %v3098_v28 = vadd.f32 %v3097_v8, %v3096_v54  ;;  %v4647_v42 = vadd.f32 %v4578_v29, %v1339_v1 }
 0x198   : > { %v3099_v56 = vpop.f32.mrf.mxu1  ;;  %v4649_v44 = vpop.f32.mrf.mxu0 }
 0x199   : > { %4975 = vst [vmem:[#allocation5_spill] sm:$0xff] %v4647_v42  ;;  %v1344_v4 = vadd.f32 %v3098_v28, %v4491_v17 }
 0x19a   : > { %v3100_v24 = vpop.f32.mrf.mxu1  ;;  %v4652_v35 = vpop.f32.mrf.mxu0 }
 0x19b   : > { %v3101_v55 = vadd.f32 %v3100_v24, %v3099_v56  ;;  %v4655_v33 = vadd.f32 %v4568_v10, %v1344_v4 }
 0x19c   : > { %v3102_v19 = vpop.f32.mrf.mxu1  ;;  %v4657_v62 = vpop.f32.mrf.mxu0 }
 0x19d   : > { %v1347_v54 = vadd.f32 %v3101_v55, %v4499_v48 }
 0x19e   : > { %v3103_v8 = vpop.f32.mrf.mxu1  ;;  %v4660_v29 = vpop.f32.mrf.mxu0 }
 0x19f   : > { %v3104_v1 = vadd.f32 %v3103_v8, %v3102_v19  ;;  %v4663_v42 = vadd.f32 %v4575_v38, %v1347_v54 }
 0x1a0   : > { %v3105_v17 = vpop.f32.mrf.mxu1  ;;  %v4665_v28 = vpop.f32.mrf.mxu0 }
 0x1a1   : > { %4976 = vst [vmem:[#allocation6_spill] sm:$0xff] %v4663_v42  ;;  %v1352_v56 = vadd.f32 %v3104_v1, %v4511_v5 }
 0x1a2   : > { %v3106_v24 = vpop.f32.mrf.mxu1  ;;  %v4668_v10 = vpop.f32.mrf.mxu0 }
 0x1a3   : > { %v3107_v4 = vadd.f32 %v3106_v24, %v3105_v17  ;;  %v4671_v27 = vadd.f32 %v4585_v0, %v1352_v56 }
 0x1a4   : > { %v3108_v48 = vpop.f32.mrf.mxu1  ;;  %v4673_v55 = vpop.f32.mrf.mxu0 }
 0x1a5   : > { %4977 = vst [vmem:[#allocation7_spill] sm:$0xff] %v4671_v27  ;;  %v1355_v19 = vadd.f32 %v3107_v4, %v4525_v58 }
 0x1a6   : > { %v3109_v8 = vpop.f32.mrf.mxu1  ;;  %v4676_v38 = vpop.f32.mrf.mxu0 }
 0x1a7   : > { %v3110_v54 = vadd.f32 %v3109_v8, %v3108_v48  ;;  %v4679_v42 = vadd.f32 %v4592_v21, %v1355_v19 }
 0x1a8   : > { %v3111_v5 = vpop.f32.mrf.mxu1  ;;  %v4681_v1 = vpop.f32.mrf.mxu0 }
 0x1a9   : > { %4978 = vst [vmem:[#allocation8_spill] sm:$0xff] %v4679_v42  ;;  %v1360_v17 = vadd.f32 %v3110_v54, %v4533_v3 }
 0x1aa   : > { %v3112_v24 = vpop.f32.mrf.mxu1  ;;  %v4684_v0 = vpop.f32.mrf.mxu0 }
 0x1ab   : > { %v3113_v56 = vadd.f32 %v3112_v24, %v3111_v5  ;;  %v4687_v27 = vadd.f32 %v4582_v6, %v1360_v17 }
 0x1ac   : > { %v3114_v58 = vpop.f32.mrf.mxu1  ;;  %v4689_v4 = vpop.f32.mrf.mxu0 }
 0x1ad   : > { %4979 = vst [vmem:[#allocation9_spill] sm:$0xff] %v4687_v27  ;;  %v1363_v48 = vadd.f32 %v3113_v56, %v4541_v9 }
 0x1ae   : > { %v3115_v8 = vpop.f32.mrf.mxu1  ;;  %v4692_v21 = vpop.f32.mrf.mxu0 }
 0x1af   : > { %v3116_v19 = vadd.f32 %v3115_v8, %v3114_v58  ;;  %v4695_v42 = vadd.f32 %v4589_v34, %v1363_v48 }
 0x1b0   : > { %v3117_v3 = vpop.f32.mrf.mxu1  ;;  %v4697_v54 = vpop.f32.mrf.mxu0 }
 0x1b1   : > { %4980 = vst [vmem:[#allocation10_spill] sm:$0xff] %v4695_v42  ;;  %v1368_v5 = vadd.f32 %v3116_v19, %v4509_v41 }
 0x1b2   : > { %v3118_v24 = vpop.f32.mrf.mxu1  ;;  %v4700_v6 = vpop.f32.mrf.mxu0 }
 0x1b3   : > { %v3119_v17 = vadd.f32 %v3118_v24, %v3117_v3  ;;  %v4703_v27 = vadd.f32 %v4599_v18, %v1368_v5 }
 0x1b4   : > { %v3120_v9 = vpop.f32.mrf.mxu1  ;;  %v4705_v56 = vpop.f32.mrf.mxu0 }
 0x1b5   : > { %4981 = vst [vmem:[#allocation11_spill] sm:$0xff] %v4703_v27  ;;  %v1371_v58 = vadd.f32 %v3119_v17, %v4517_v50 }
 0x1b6   : > { %v3121_v8 = vpop.f32.mrf.mxu1  ;;  %v4708_v34 = vpop.f32.mrf.mxu0 }
 0x1b7   : > { %v3122_v48 = vadd.f32 %v3121_v8, %v3120_v9  ;;  %v4711_v42 = vadd.f32 %v4606_v60, %v1371_v58 }
 0x1b8   : > { %v3123_v41 = vpop.f32.mrf.mxu1  ;;  %v4713_v19 = vpop.f32.mrf.mxu0 }
 0x1b9   : > { %4982 = vst [vmem:[#allocation12_spill] sm:$0xff] %v4711_v42  ;;  %v1376_v3 = vadd.f32 %v3122_v48, %v4502_v37 }
 0x1ba   : > { %v3124_v24 = vpop.f32.mrf.mxu1  ;;  %v4716_v18 = vpop.f32.mrf.mxu0 }
 0x1bb   : > { %v3125_v5 = vadd.f32 %v3124_v24, %v3123_v41  ;;  %v4719_v27 = vadd.f32 %v4596_v47, %v1376_v3 }
 0x1bc   : > { %v3126_v50 = vpop.f32.mrf.mxu1  ;;  %v4721_v17 = vpop.f32.mrf.mxu0 }
 0x1bd   : > { %4983 = vst [vmem:[#allocation13_spill] sm:$0xff] %v4719_v27  ;;  %v1379_v9 = vadd.f32 %v3125_v5, %v4514_v59 }
 0x1be   : > { %v3127_v8 = vpop.f32.mrf.mxu1  ;;  %v4724_v60 = vpop.f32.mrf.mxu0 }
 0x1bf   : > { %v3128_v58 = vadd.f32 %v3127_v8, %v3126_v50  ;;  %v4727_v42 = vadd.f32 %v4603_v31, %v1379_v9 }
 0x1c0   : > { %v3129_v37 = vpop.f32.mrf.mxu1  ;;  %v4729_v48 = vpop.f32.mrf.mxu0 }
 0x1c1   : > { %4984 = vst [vmem:[#allocation14_spill] sm:$0xff] %v4727_v42  ;;  %v1384_v41 = vadd.f32 %v3128_v58, %v4531_v22 }
 0x1c2   : > { %v3130_v24 = vpop.f32.mrf.mxu1  ;;  %v4732_v47 = vpop.f32.mrf.mxu0 }
 0x1c3   : > { %v3131_v3 = vadd.f32 %v3130_v24, %v3129_v37  ;;  %v4735_v27 = vadd.f32 %v4613_v43, %v1384_v41 }
 0x1c4   : > { %v3132_v59 = vpop.f32.mrf.mxu1  ;;  %v4737_v5 = vpop.f32.mrf.mxu0 }
 0x1c5   : > { %v1387_v50 = vadd.f32 %v3131_v3, %v4539_v61  ;;  %v3186_v61 = vadd.f32 %v4644_v45, %v4641_v15  ;;  %v3189_v15 = vadd.f32 %v4652_v35, %v4649_v44  ;;  %v3198_v35 = vadd.f32 %v4676_v38, %v4673_v55 }
 0x1c6   : > { %v3133_v8 = vpop.f32.mrf.mxu1  ;;  %v4740_v31 = vpop.f32.mrf.mxu0 }
 0x1c7   : > { %v3134_v9 = vadd.f32 %v3133_v8, %v3132_v59  ;;  %v4743_v42 = vadd.f32 %v4620_v39, %v1387_v50  ;;  %v3180_v39 = vadd.f32 %v4628_v26, %v4625_v53 }
 0x1c8   : > { %v3135_v22 = vpop.f32.mrf.mxu1  ;;  %v4745_v58 = vpop.f32.mrf.mxu0 }
 0x1c9   : > { %4985 = vst [vmem:[#allocation15_spill] sm:$0xff] %v4743_v42  ;;  %v4748_v37 = vadd.f32 %v3134_v9, %v4528_v52  ;;  %v4764_v52 = vld [vmem:[%s4960_s2] ss:$0 sm:$0xff] }
 0x1ca   : > { %v3136_v43 = vpop.f32.mrf.mxu1  ;;  %v4750_v41 = vpop.f32.mrf.mxu0 }
 0x1cb   : > { %v3137_v24 = vadd.f32 %v3136_v43, %v3135_v22 }
 0x1cc   : > { %v4754_v3 = vpop.f32.mrf.mxu0  ;;  %v3412_v59 = vpop.f32.mrf.mxu1 }
 0x1cd   : > { %v4759_v50 = vadd.f32 %v3137_v24, %v4536_v49  ;;  %v1956_v8 = vadd.f32 %v3412_v59, %v3186_v61 }
 0x1ce   : > { %v4766_v9 = vpop.f32.mrf.mxu0  ;;  %v1947_v42 = vpop.f32.mrf.mxu1 }
 0x1cf   : > { %v2076_v45 = vadd.f32 %v1956_v8, %v4550_v30  ;;  %v1948_v22 = vadd.f32 %v3180_v39, %v1947_v42  ;;  %v3183_v30 = vadd.f32 %v4636_v25, %v4633_v13 }
 0x1d0   : > { %v4778_v49 = vpop.f32.mrf.mxu0  ;;  %v3413_v53 = vpop.f32.mrf.mxu1 }
 0x1d1   : > { %v2115_v26 = vadd.f32 %v4764_v52, %v2076_v45  ;;  %v2074_v43 = vadd.f32 %v1948_v22, %v4544_v32  ;;  %v1959_v61 = vadd.f32 %v3413_v53, %v3189_v15  ;;  %v3192_v15 = vadd.f32 %v4660_v29, %v4657_v62 }
 0x1d2   : > { %v4784_v42 = vpop.f32.mrf.mxu0  ;;  %v1950_v44 = vpop.f32.mrf.mxu1 }
 0x1d3   : > { %2147 = vst [vmem:[%s4776_s6 + $0x10] sm:$0xff] %v2115_v26  ;;  %v2113_v24 = vadd.f32 %v4764_v52, %v2074_v43  ;;  %v2077_v59 = vadd.f32 %v1959_v61, %v4553_v36  ;;  %v1951_v39 = vadd.f32 %v3183_v30, %v1950_v44  ;;  %v3201_v36 = vadd.f32 %v4684_v0, %v4681_v1 }
 0x1d4   : > { %v4791_v8 = vpop.f32.mrf.mxu0  ;;  %v3416_v32 = vpop.f32.mrf.mxu1  ;;  %v3195_v44 = vadd.f32 %v4668_v10, %v4665_v28 }
 0x1d5   : > { %2145 = vst [vmem:[%s4776_s6] sm:$0xff] %v2113_v24  ;;  %v2116_v13 = vadd.f32 %v4764_v52, %v2077_v59  ;;  %v1972_v25 = vadd.f32 %v3416_v32, %v3198_v35  ;;  %v2075_v45 = vadd.f32 %v1951_v39, %v4547_v63  ;;  %v2215_v35 = vmul.f32 %v2113_v24, %v2113_v24 }
 0x1d6   : > { %v4798_v55 = vpop.f32.mrf.mxu0  ;;  %v1963_v38 = vpop.f32.mrf.mxu1  ;;  %v3210_v39 = vadd.f32 %v4708_v34, %v4705_v56 }
 0x1d7   : > { %2148 = vst [vmem:[%s4776_s6 + $0x18] sm:$0xff] %v2116_v13  ;;  %v2080_v22 = vadd.f32 %v1972_v25, %v4566_v23  ;;  %v1964_v53 = vadd.f32 %v3192_v15, %v1963_v38  ;;  %v2114_v62 = vadd.f32 %v4764_v52, %v2075_v45  ;;  %v2217_v15 = vmul.f32 %v2115_v26, %v2115_v26 }
 0x1d8   : > { %v4805_v29 = vpop.f32.mrf.mxu0  ;;  %v3417_v43 = vpop.f32.mrf.mxu1  ;;  %v3204_v38 = vadd.f32 %v4692_v21, %v4689_v4  ;;  %v2218_v34 = vmul.f32 %v2116_v13, %v2116_v13 }
 0x1d9   : > { %v2119_v61 = vadd.f32 %v4764_v52, %v2080_v22  ;;  %v2078_v63 = vadd.f32 %v1964_v53, %v4556_v20  ;;  %v1975_v30 = vadd.f32 %v3417_v43, %v3201_v36  ;;  %2146 = vst [vmem:[%s4776_s6 + $0x8] sm:$0xff] %v2114_v62  ;;  %v2177_v1 = vadd.f32 %v2114_v62, %v2113_v24 }
 0x1da   : > { %v2216_v23 = vmul.f32 %v2114_v62, %v2114_v62  ;;  %v4812_v0 = vpop.f32.mrf.mxu0  ;;  %v1966_v59 = vpop.f32.mrf.mxu1  ;;  %v3213_v43 = vadd.f32 %v4716_v18, %v4713_v19  ;;  %v3207_v19 = vadd.f32 %v4700_v6, %v4697_v54 }
 0x1db   : > { %2151 = vst [vmem:[%s4776_s6 + $0x30] sm:$0xff] %v2119_v61  ;;  %v2117_v32 = vadd.f32 %v4764_v52, %v2078_v63  ;;  %v2081_v20 = vadd.f32 %v1975_v30, %v4573_v57  ;;  %v2178_v25 = vadd.f32 %v2177_v1, %v2115_v26  ;;  %v1967_v10 = vadd.f32 %v3195_v44, %v1966_v59 }
 0x1dc   : > { %v2247_v28 = vadd.f32 %v2216_v23, %v2215_v35  ;;  %v4819_v45 = vpop.f32.mrf.mxu0  ;;  %v3420_v24 = vpop.f32.mrf.mxu1 }
 0x1dd   : > { %2149 = vst [vmem:[%s4776_s6 + $0x20] sm:$0xff] %v2117_v32  ;;  %v2120_v36 = vadd.f32 %v4764_v52, %v2081_v20  ;;  %v1988_v56 = vadd.f32 %v3420_v24, %v3210_v39  ;;  %v2179_v53 = vadd.f32 %v2178_v25, %v2116_v13  ;;  %v2079_v57 = vadd.f32 %v1967_v10, %v4561_v2 }
 0x1de   : > { %v2248_v22 = vadd.f32 %v2247_v28, %v2217_v15  ;;  %v4826_v62 = vpop.f32.mrf.mxu0  ;;  %v1979_v26 = vpop.f32.mrf.mxu1  ;;  %v2219_v30 = vmul.f32 %v2117_v32, %v2117_v32  ;;  %v3222_v15 = vadd.f32 %v4740_v31, %v4737_v5  ;;  %v2221_v28 = vmul.f32 %v2119_v61, %v2119_v61 }
 0x1df   : > { %2152 = vst [vmem:[%s4776_s6 + $0x38] sm:$0xff] %v2120_v36  ;;  %v2084_v63 = vadd.f32 %v1988_v56, %v4594_v40  ;;  %v1980_v4 = vadd.f32 %v3204_v38, %v1979_v26  ;;  %v2180_v21 = vadd.f32 %v2179_v53, %v2117_v32  ;;  %v2118_v35 = vadd.f32 %v4764_v52, %v2079_v57 }
 0x1e0   : > { %v2249_v44 = vadd.f32 %v2248_v22, %v2218_v34  ;;  %v4833_v13 = vpop.f32.mrf.mxu0  ;;  %v3421_v2 = vpop.f32.mrf.mxu1  ;;  %v3216_v56 = vadd.f32 %v4724_v60, %v4721_v17  ;;  %v2222_v31 = vmul.f32 %v2120_v36, %v2120_v36  ;;  %v3225_v26 = vadd.f32 %v4750_v41, %v4745_v58 }
 0x1e1   : > { %v2123_v1 = vadd.f32 %v4764_v52, %v2084_v63  ;;  %v2082_v23 = vadd.f32 %v1980_v4, %v4580_v7  ;;  %v1991_v59 = vadd.f32 %v3421_v2, %v3213_v43  ;;  %2150 = vst [vmem:[%s4776_s6 + $0x28] sm:$0xff] %v2118_v35  ;;  %v2181_v40 = vadd.f32 %v2180_v21, %v2118_v35 }
 0x1e2   : > { %v2250_v18 = vadd.f32 %v2249_v44, %v2219_v30  ;;  %v2220_v39 = vmul.f32 %v2118_v35, %v2118_v35  ;;  %v4840_v32 = vpop.f32.mrf.mxu0  ;;  %v1982_v20 = vpop.f32.mrf.mxu1  ;;  %v3219_v58 = vadd.f32 %v4732_v47, %v4729_v48 }
 0x1e3   : > { %2155 = vst [vmem:[%s4776_s6 + $0x50] sm:$0xff] %v2123_v1  ;;  %v2121_v25 = vadd.f32 %v4764_v52, %v2082_v23  ;;  %v2085_v7 = vadd.f32 %v1991_v59, %v4601_v12  ;;  %v2182_v10 = vadd.f32 %v2181_v40, %v2119_v61  ;;  %v1983_v6 = vadd.f32 %v3207_v19, %v1982_v20 }
 0x1e4   : > { %v2251_v54 = vadd.f32 %v2250_v18, %v2220_v39  ;;  %v4847_v24 = vpop.f32.mrf.mxu0  ;;  %v3424_v38 = vpop.f32.mrf.mxu1  ;;  %v3234_v19 = vadd.f32 %v4798_v55, %v4791_v8 }
 0x1e5   : > { %2153 = vst [vmem:[%s4776_s6 + $0x40] sm:$0xff] %v2121_v25  ;;  %v2124_v34 = vadd.f32 %v4764_v52, %v2085_v7  ;;  %v2004_v5 = vadd.f32 %v3424_v38, %v3222_v15  ;;  %v2183_v53 = vadd.f32 %v2182_v10, %v2120_v36  ;;  %v2083_v12 = vadd.f32 %v1983_v6, %v4587_v16 }
 0x1e6   : > { %v2252_v22 = vadd.f32 %v2251_v54, %v2221_v28  ;;  %v3245_v57 = vpop.f32.mrf.mxu0  ;;  %v1995_v61 = vpop.f32.mrf.mxu1  ;;  %v2223_v60 = vmul.f32 %v2121_v25, %v2121_v25  ;;  %v3237_v6 = vadd.f32 %v4812_v0, %v4805_v29  ;;  %v3231_v29 = vadd.f32 %v4784_v42, %v4778_v49 }
 0x1e7   : > { %2156 = vst [vmem:[%s4776_s6 + $0x58] sm:$0xff] %v2124_v34  ;;  %v2088_v43 = vadd.f32 %v2004_v5, %v4623_v11  ;;  %v1996_v63 = vadd.f32 %v3216_v56, %v1995_v61  ;;  %v2184_v17 = vadd.f32 %v2183_v53, %v2121_v25  ;;  %v2122_v21 = vadd.f32 %v4764_v52, %v2083_v12  ;;  %v4986_v53 = vld [vmem:[#allocation4_spill] sm:$0xff] }
 0x1e8   : > { %v2253_v4 = vadd.f32 %v2252_v22, %v2222_v31  ;;  %v4859_v30 = vpop.f32.mrf.mxu0  ;;  %v3425_v36 = vpop.f32.mrf.mxu1  ;;  %v3228_v25 = vadd.f32 %v4766_v9, %v4754_v3  ;;  %v2226_v55 = vmul.f32 %v2124_v34, %v2124_v34 }
 0x1e9   : > { %v2127_v16 = vadd.f32 %v4764_v52, %v2088_v43  ;;  %v2086_v44 = vadd.f32 %v1996_v63, %v4608_v14  ;;  %v2007_v35 = vadd.f32 %v3425_v36, %v3225_v26  ;;  %2154 = vst [vmem:[%s4776_s6 + $0x48] sm:$0xff] %v2122_v21  ;;  %v2185_v11 = vadd.f32 %v2184_v17, %v2122_v21 }
 0x1ea   : > { %v2254_v41 = vadd.f32 %v2253_v4, %v2223_v60  ;;  %v2224_v2 = vmul.f32 %v2122_v21, %v2122_v21  ;;  %v3248_v23 = vpop.f32.mrf.mxu0  ;;  %v1998_v59 = vpop.f32.mrf.mxu1  ;;  %v2225_v14 = vmul.f32 %v2123_v1, %v2123_v1  ;;  %v3246_v17 = vadd.f32 %v3245_v57, %v4847_v24  ;;  %v4987_v4 = vld [vmem:[#allocation6_spill] sm:$0xff] }
 0x1eb   : > { %2159 = vst [vmem:[%s4776_s6 + $0x70] sm:$0xff] %v2127_v16  ;;  %v2125_v18 = vadd.f32 %v4764_v52, %v2086_v44  ;;  %v2089_v40 = vadd.f32 %v2007_v35, %v4631_v46  ;;  %v2186_v39 = vadd.f32 %v2185_v11, %v2123_v1  ;;  %v1999_v48 = vadd.f32 %v3219_v58, %v1998_v59 }
 0x1ec   : > { %v2255_v20 = vadd.f32 %v2254_v41, %v2224_v2  ;;  %v4871_v47 = vpop.f32.mrf.mxu0  ;;  %v3428_v15 = vpop.f32.mrf.mxu1  ;;  %v2229_v36 = vmul.f32 %v2127_v16, %v2127_v16  ;;  %v3240_v41 = vadd.f32 %v4826_v62, %v4819_v45 }
 0x1ed   : > { %2157 = vst [vmem:[%s4776_s6 + $0x60] sm:$0xff] %v2125_v18  ;;  %v2128_v7 = vadd.f32 %v4764_v52, %v2089_v40  ;;  %v2020_v8 = vadd.f32 %v3428_v15, %v3234_v19  ;;  %v2187_v10 = vadd.f32 %v2186_v39, %v2124_v34  ;;  %v2087_v46 = vadd.f32 %v1999_v48, %v4615_v51  ;;  %v4988_v19 = vld [vmem:[#allocation5_spill] sm:$0xff] }
 0x1ee   : > { %v2256_v28 = vadd.f32 %v2255_v20, %v2225_v14  ;;  %v4878_v54 = vpop.f32.mrf.mxu0  ;;  %v2011_v1 = vpop.f32.mrf.mxu1  ;;  %v2227_v56 = vmul.f32 %v2125_v18, %v2125_v18  ;;  %v4989_v39 = vld [vmem:[#allocation9_spill] sm:$0xff] }
 0x1ef   : > { %2160 = vst [vmem:[%s4776_s6 + $0x78] sm:$0xff] %v2128_v7  ;;  %v2092_v38 = vadd.f32 %v2020_v8, %v4655_v33  ;;  %v2012_v3 = vadd.f32 %v3228_v25, %v2011_v1  ;;  %v2188_v9 = vadd.f32 %v2187_v10, %v2125_v18  ;;  %v2126_v31 = vadd.f32 %v4764_v52, %v2087_v46 }
 0x1f0   : > { %v2257_v5 = vadd.f32 %v2256_v28, %v2226_v55  ;;  %v4885_v34 = vpop.f32.mrf.mxu0  ;;  %v3429_v51 = vpop.f32.mrf.mxu1  ;;  %v2230_v24 = vmul.f32 %v2128_v7, %v2128_v7  ;;  %v4990_v28 = vld [vmem:[#allocation7_spill] sm:$0xff] }
 0x1f1   : > { %v2131_v22 = vadd.f32 %v4764_v52, %v2092_v38  ;;  %v2090_v12 = vadd.f32 %v2012_v3, %v4986_v53  ;;  %v2023_v61 = vadd.f32 %v3429_v51, %v3237_v6  ;;  %2158 = vst [vmem:[%s4776_s6 + $0x68] sm:$0xff] %v2126_v31  ;;  %v2189_v33 = vadd.f32 %v2188_v9, %v2126_v31 }
 0x1f2   : > { %v2258_v0 = vadd.f32 %v2257_v5, %v2227_v56  ;;  %v2228_v26 = vmul.f32 %v2126_v31, %v2126_v31  ;;  %v4892_v43 = vpop.f32.mrf.mxu0  ;;  %v2014_v63 = vpop.f32.mrf.mxu1  ;;  %v4991_v5 = vld [vmem:[#allocation10_spill] sm:$0xff] }
 0x1f3   : > { %2163 = vst [vmem:[%s4776_s6 + $0x90] sm:$0xff] %v2131_v22  ;;  %v2129_v60 = vadd.f32 %v4764_v52, %v2090_v12  ;;  %v2093_v21 = vadd.f32 %v2023_v61, %v4987_v4  ;;  %v2190_v44 = vadd.f32 %v2189_v33, %v2127_v16  ;;  %v2015_v49 = vadd.f32 %v3231_v29, %v2014_v63 }
 0x1f4   : > { %v2259_v35 = vadd.f32 %v2258_v0, %v2228_v26  ;;  %v3256_v42 = vpop.f32.mrf.mxu0  ;;  %v3432_v58 = vpop.f32.mrf.mxu1  ;;  %v3249_v16 = vadd.f32 %v3248_v23, %v4859_v30  ;;  %v3243_v30 = vadd.f32 %v4840_v32, %v4833_v13  ;;  %v2233_v51 = vmul.f32 %v2131_v22, %v2131_v22 }
 0x1f5   : > { %2161 = vst [vmem:[%s4776_s6 + $0x80] sm:$0xff] %v2129_v60  ;;  %v2132_v11 = vadd.f32 %v4764_v52, %v2093_v21  ;;  %v2036_v2 = vadd.f32 %v3432_v58, %v3246_v17  ;;  %v2191_v59 = vadd.f32 %v2190_v44, %v2128_v7  ;;  %v2091_v18 = vadd.f32 %v2015_v49, %v4988_v19  ;;  %v4993_v44 = vld [vmem:[#allocation13_spill] sm:$0xff] }
 0x1f6   : > { %v2260_v57 = vadd.f32 %v2259_v35, %v2229_v36  ;;  %v3257_v40 = vpop.f32.mrf.mxu0  ;;  %v2027_v14 = vpop.f32.mrf.mxu1  ;;  %v2231_v45 = vmul.f32 %v2129_v60, %v2129_v60  ;;  %v3252_v32 = vadd.f32 %v4878_v54, %v4871_v47  ;;  %v3255_v19 = vadd.f32 %v4892_v43, %v4885_v34 }
 0x1f7   : > { %2164 = vst [vmem:[%s4776_s6 + $0x98] sm:$0xff] %v2132_v11  ;;  %v2096_v20 = vadd.f32 %v2036_v2, %v4989_v39  ;;  %v2028_v48 = vadd.f32 %v3240_v41, %v2027_v14  ;;  %v2192_v15 = vadd.f32 %v2191_v59, %v2129_v60  ;;  %v2130_v25 = vadd.f32 %v4764_v52, %v2091_v18  ;;  %v4992_v60 = vld [vmem:[#allocation8_spill] sm:$0xff] }
 0x1f8   : > { %v2261_v62 = vadd.f32 %v2260_v57, %v2230_v24  ;;  %v3259_v8 = vpop.f32.mrf.mxu0  ;;  %v3433_v55 = vpop.f32.mrf.mxu1  ;;  %v3258_v9 = vadd.f32 %v3257_v40, %v3256_v42  ;;  %v2234_v26 = vmul.f32 %v2132_v11, %v2132_v11  ;;  %v4994_v24 = vld [vmem:[#allocation11_spill] sm:$0xff] }
 0x1f9   : > { %v2135_v7 = vadd.f32 %v4764_v52, %v2096_v20  ;;  %v2094_v10 = vadd.f32 %v2028_v48, %v4990_v28  ;;  %v2039_v46 = vadd.f32 %v3433_v55, %v3249_v16  ;;  %2162 = vst [vmem:[%s4776_s6 + $0x88] sm:$0xff] %v2130_v25  ;;  %v2193_v1 = vadd.f32 %v2192_v15, %v2130_v25  ;;  %v4995_v48 = vld [vmem:[#allocation14_spill] sm:$0xff] }
 0x1fa   : > { %v2262_v23 = vadd.f32 %v2261_v62, %v2231_v45  ;;  %v2232_v6 = vmul.f32 %v2130_v25, %v2130_v25  ;;  %v3260_v38 = vpop.f32.mrf.mxu0  ;;  %v2030_v3 = vpop.f32.mrf.mxu1 }
 0x1fb   : > { %2167 = vst [vmem:[%s4776_s6 + $0xb0] sm:$0xff] %v2135_v7  ;;  %v2133_v56 = vadd.f32 %v4764_v52, %v2094_v10  ;;  %v2097_v31 = vadd.f32 %v2039_v46, %v4991_v5  ;;  %v2194_v53 = vadd.f32 %v2193_v1, %v2131_v22  ;;  %v2031_v61 = vadd.f32 %v3243_v30, %v2030_v3 }
 0x1fc   : > { %v2263_v12 = vadd.f32 %v2262_v23, %v2232_v6  ;;  %v3262_v29 = vpop.f32.mrf.mxu0  ;;  %v3436_v13 = vpop.f32.mrf.mxu1  ;;  %v3261_v22 = vadd.f32 %v3260_v38, %v3259_v8  ;;  %v2237_v45 = vmul.f32 %v2135_v7, %v2135_v7  ;;  %v4996_v23 = vld [vmem:[#allocation12_spill] sm:$0xff] }
 0x1fd   : > { %2165 = vst [vmem:[%s4776_s6 + $0xa0] sm:$0xff] %v2133_v56  ;;  %v2136_v0 = vadd.f32 %v4764_v52, %v2097_v31  ;;  %v2052_v33 = vadd.f32 %v3436_v13, %v3258_v9  ;;  %v2195_v17 = vadd.f32 %v2194_v53, %v2132_v11  ;;  %v2095_v4 = vadd.f32 %v2031_v61, %v4992_v60 }
 0x1fe   : > { %v2264_v63 = vadd.f32 %v2263_v12, %v2233_v51  ;;  %v3263_v21 = vpop.f32.mrf.mxu0  ;;  %v2043_v36 = vpop.f32.mrf.mxu1  ;;  %v2235_v47 = vmul.f32 %v2133_v56, %v2133_v56  ;;  %v4997_v12 = vld [vmem:[#allocation2_spill] sm:$0xff] }
 0x1ff   : > { %2168 = vst [vmem:[%s4776_s6 + $0xb8] sm:$0xff] %v2136_v0  ;;  %v2100_v35 = vadd.f32 %v2052_v33, %v4993_v44  ;;  %v2044_v49 = vadd.f32 %v3252_v32, %v2043_v36  ;;  %v2196_v42 = vadd.f32 %v2195_v17, %v2133_v56  ;;  %v2134_v58 = vadd.f32 %v4764_v52, %v2095_v4 }
 0x200   : > { %v2265_v54 = vadd.f32 %v2264_v63, %v2234_v26  ;;  %v3265_v41 = vpop.f32.mrf.mxu0  ;;  %v3437_v2 = vpop.f32.mrf.mxu1  ;;  %v3264_v34 = vadd.f32 %v3263_v21, %v3262_v29  ;;  %v2238_v10 = vmul.f32 %v2136_v0, %v2136_v0  ;;  %v1553_v61 = vadd.f32 %v4997_v12, %v4748_v37 }
 0x201   : > { %v2139_v11 = vadd.f32 %v4764_v52, %v2100_v35  ;;  %v2098_v57 = vadd.f32 %v2044_v49, %v4994_v24  ;;  %v2055_v59 = vadd.f32 %v3437_v2, %v3261_v22  ;;  %2166 = vst [vmem:[%s4776_s6 + $0xa8] sm:$0xff] %v2134_v58  ;;  %v2197_v40 = vadd.f32 %v2196_v42, %v2134_v58  ;;  %v4998_v35 = vld [vmem:[#allocation3_spill] sm:$0xff] }
 0x202   : > { %v2266_v18 = vadd.f32 %v2265_v54, %v2235_v47  ;;  %v2236_v14 = vmul.f32 %v2134_v58, %v2134_v58  ;;  %v3266_v16 = vpop.f32.mrf.mxu0  ;;  %v2046_v39 = vpop.f32.mrf.mxu1  ;;  %v4999_v47 = vld [vmem:[#allocation15_spill] sm:$0xff] }
 0x203   : > { %2171 = vst [vmem:[%s4776_s6 + $0xd0] sm:$0xff] %v2139_v11  ;;  %v2137_v20 = vadd.f32 %v4764_v52, %v2098_v57  ;;  %v2101_v15 = vadd.f32 %v2055_v59, %v4995_v48  ;;  %v2198_v62 = vadd.f32 %v2197_v40, %v2135_v7  ;;  %v2047_v8 = vadd.f32 %v3255_v19, %v2046_v39 }
 0x204   : > { %v2267_v25 = vadd.f32 %v2266_v18, %v2236_v14  ;;  %v3268_v55 = vpop.f32.mrf.mxu0  ;;  %v3440_v28 = vpop.f32.mrf.mxu1  ;;  %v3267_v29 = vadd.f32 %v3266_v16, %v3265_v41  ;;  %v2241_v22 = vmul.f32 %v2139_v11, %v2139_v11 }
 0x205   : > { %2169 = vst [vmem:[%s4776_s6 + $0xc0] sm:$0xff] %v2137_v20  ;;  %v2140_v43 = vadd.f32 %v4764_v52, %v2101_v15  ;;  %v2199_v30 = vadd.f32 %v2198_v62, %v2136_v0  ;;  %v2099_v1 = vadd.f32 %v2047_v8, %v4996_v23  ;;  %v2239_v56 = vmul.f32 %v2137_v20, %v2137_v20 }
 0x206   : > { %v2268_v46 = vadd.f32 %v2267_v25, %v2237_v45  ;;  %v3269_v6 = vpop.f32.mrf.mxu0  ;;  %v2059_v38 = vpop.f32.mrf.mxu1 }
 0x207   : > { %2172 = vst [vmem:[%s4776_s6 + $0xd8] sm:$0xff] %v2140_v43  ;;  %v3270_v3 = vadd.f32 %v3269_v6, %v3268_v55  ;;  %v2060_v9 = vadd.f32 %v3264_v34, %v2059_v38  ;;  %v2200_v7 = vadd.f32 %v2199_v30, %v2137_v20  ;;  %v2138_v31 = vadd.f32 %v4764_v52, %v2099_v1 }
 0x208   : > { %v2269_v5 = vadd.f32 %v2268_v46, %v2238_v10  ;;  %v3271_v51 = vpop.f32.mrf.mxu0  ;;  %v3441_v53 = vpop.f32.mrf.mxu1  ;;  %v2242_v58 = vmul.f32 %v2140_v43, %v2140_v43 }
 0x209   : > { %v2068_v13 = vadd.f32 %v3440_v28, %v3270_v3  ;;  %v2102_v32 = vadd.f32 %v2060_v9, %v4735_v27  ;;  %2170 = vst [vmem:[%s4776_s6 + $0xc8] sm:$0xff] %v2138_v31  ;;  %v2201_v33 = vadd.f32 %v2200_v7, %v2138_v31  ;;  %v2240_v26 = vmul.f32 %v2138_v31, %v2138_v31 }
 0x20a   : > { %v2270_v0 = vadd.f32 %v2269_v5, %v2239_v56  ;;  %v3272_v63 = vpop.f32.mrf.mxu0  ;;  %v2062_v17 = vpop.f32.mrf.mxu1  ;;  %v1556_v27 = vadd.f32 %v4998_v35, %v4759_v50 }
 0x20b   : > { %v2104_v60 = vadd.f32 %v2068_v13, %v1553_v61  ;;  %v2141_v4 = vadd.f32 %v4764_v52, %v2102_v32  ;;  %v3273_v21 = vadd.f32 %v3272_v63, %v3271_v51  ;;  %v2063_v36 = vadd.f32 %v3267_v29, %v2062_v17 }
 0x20c   : > { %v2202_v44 = vadd.f32 %v2201_v33, %v2139_v11  ;;  %v2271_v37 = vadd.f32 %v2270_v0, %v2240_v26 }
 0x20d   : > { %v2143_v49 = vadd.f32 %v4764_v52, %v2104_v60  ;;  %2173 = vst [vmem:[%s4776_s6 + $0xe0] sm:$0xff] %v2141_v4  ;;  %v2071_v42 = vadd.f32 %v3441_v53, %v3273_v21  ;;  %v2103_v54 = vadd.f32 %v2063_v36, %v4999_v47  ;;  %v2243_v59 = vmul.f32 %v2141_v4, %v2141_v4 }
 0x20e   : > { %v2272_v41 = vadd.f32 %v2271_v37, %v2241_v22  ;;  %v2203_v2 = vadd.f32 %v2202_v44, %v2140_v43 }
 0x20f   : > { %2175 = vst [vmem:[%s4776_s6 + $0xf0] sm:$0xff] %v2143_v49  ;;  %v2105_v24 = vadd.f32 %v2071_v42, %v1556_v27  ;;  %v2142_v57 = vadd.f32 %v4764_v52, %v2103_v54  ;;  %v2245_v16 = vmul.f32 %v2143_v49, %v2143_v49 }
 0x210   : > { %v2204_v11 = vadd.f32 %v2203_v2, %v2141_v4  ;;  %v2273_v19 = vadd.f32 %v2272_v41, %v2242_v58 }
 0x211   : > { %v2144_v18 = vadd.f32 %v4764_v52, %v2105_v24  ;;  %2174 = vst [vmem:[%s4776_s6 + $0xe8] sm:$0xff] %v2142_v57  ;;  %v2244_v50 = vmul.f32 %v2142_v57, %v2142_v57 }
 0x212   : > { %v2274_v40 = vadd.f32 %v2273_v19, %v2243_v59  ;;  %v2205_v14 = vadd.f32 %v2204_v11, %v2142_v57 }
 0x213   : > { %2176 = vst [vmem:[%s4776_s6 + $0xf8] sm:$0xff] %v2144_v18  ;;  %v2246_v48 = vmul.f32 %v2144_v18, %v2144_v18 }
 0x214   : > { %v2206_v39 = vadd.f32 %v2205_v14, %v2143_v49  ;;  %v2275_v20 = vadd.f32 %v2274_v40, %v2244_v50 }
 0x216   : > { %v2207_v15 = vadd.f32 %v2206_v39, %v2144_v18  ;;  %v2276_v45 = vadd.f32 %v2275_v20, %v2245_v16 }
 0x218   : > { %v2208_v62 = vrot.slane %v2207_v15, 4  ;;  %v2277_v25 = vadd.f32 %v2276_v45, %v2246_v48 }
 0x21a   : > { %v2209_v8 = vadd.f32 %v2208_v62, %v2207_v15  ;;  %v2278_v55 = vrot.slane %v2277_v25, 4 }
 0x21c   : > { %v2210_v28 = vrot.slane %v2209_v8, 2  ;;  %v2279_v34 = vadd.f32 %v2278_v55, %v2277_v25 }
 0x21e   : > { %v2211_v52 = vadd.f32 %v2210_v28, %v2209_v8  ;;  %v2280_v43 = vrot.slane %v2279_v34, 2 }
 0x220   : > { %v2212_v10 = vrot.slane %v2211_v52, 1  ;;  %v2281_v46 = vadd.f32 %v2280_v43, %v2279_v34 }
 0x222   : > { %v2213_v30 = vadd.f32 %v2212_v10, %v2211_v52  ;;  %v2282_v23 = vrot.slane %v2281_v46, 1 }
 0x224   : > { %2214 = vst [vmem:[%s208_s10] sm:$0x1] %v2213_v30  ;;  %v2283_v1 = vadd.f32 %v2282_v23, %v2281_v46 }
 0x226   : > { %2284 = vst [vmem:[%s208_s10 + $0x1] sm:$0x1] %v2283_v1 }
 0x227 PF: > { %s15_s15 = sadd.s32 1, %s3547_s15  }
 0x228   : > { %p12_p4 = scmp.ge.s32.totalorder %s15_s15, 4  }
 0x22a   :  { %14 = sbr.rel (!%p12_p4) target bundleno = 1 (0x1), region = 76 }

// kernel: double_conv.4
= control target key start
LH: loop header
LB: loop body
LE: loop exit
PB: predicated region body
PF: predicated region fallthrough
CT: control target
= control target key end

     0   :  { %s3753_s21 = smov 0   ;;  %s5256_s0 = inlined_call_operand.vmem [shape: f32[2,16,16,128], index: 0, kind: input, shape index: {}]   ;;  %s5257_s1 = inlined_call_operand.vmem [shape: f32[1,128], index: 1, kind: input, shape index: {}]   ;;  %s5258_s2 = inlined_call_operand.vmem [shape: f32[1,128], index: 2, kind: input, shape index: {}]   ;;  %s5259_s3 = inlined_call_operand.vmem [shape: bf16[3,384,128], index: 3, kind: input, shape index: {}]   ;;  %s5260_s4 = inlined_call_operand.vmem [shape: f32[1,128], index: 4, kind: input, shape index: {}]   ;;  %s5261_s5 = inlined_call_operand.vmem [shape: f32[2,16,16,128], index: 5, kind: output, shape index: {0}]   ;;  %s5262_s6 = inlined_call_operand.vmem [shape: f32[2,2,128], index: 6, kind: output, shape index: {1}]  }
   0x1 LB: > { %s2535_s22 = sadd.s32 4294967295, %s3713_s21   ;;  %p2539_p0 = scmp.ge.s32.totalorder %s3713_s21, 1  ;;  %s3713_s21 = sphi %s3753_s21, %s17_s21  }
   0x2   : > { %p215_p1 = scmp.lt.s32.totalorder %s3713_s21, 3 }
   0x4   : > { %p216_p2 = pnand %p2539_p0, %p215_p1 }
   0x6   : > { %219 = sbr.rel (%p216_p2) target bundleno = 551 (0x227), region = 40 }
   0xb   : > { %v3635_v0 = vld [vmem:[%s5259_s3 + $0x138] sm:$0xff]   ;;  %v3637_v2 = vld [vmem:[%s5259_s3 + $0x130] sm:$0xff]   ;;  %p249_p3 = scmp.lt.s32.totalorder %s2535_s22, 1  ;;  %v3639_v4 = vld [vmem:[%s5259_s3 + $0x128] sm:$0xff]   ;;  %vm439_vm0 = vcmask 1040384   ;;  %vm3715_vm2 = vmmov 1  }
   0xc   : > { %v3636_v1 = vld [vmem:[%s5259_s3 + $0xf8] sm:$0xff]   ;;  %3056 = vmatprep.subr.bf16.mxu0 %v3635_v0  ;;  %3608 = vmatprep.subr.bf16.mxu1 %v3635_v0  ;;  %v3638_v3 = vld [vmem:[%s5259_s3 + $0xf0] sm:$0xff]   ;;  %v3640_v5 = vld [vmem:[%s5259_s3 + $0xe8] sm:$0xff]   ;;  %vm541_vm4 = vcmask 1046528  }
   0xd   : > { %3057 = vmatpush3.bf16.msra.mxu0 %v3636_v1  ;;  %3616 = vmatpush3.bf16.msra.mxu1 %v3636_v1  ;;  %s5332_s22 = smov (!%p249_p3, %s2535_s22), 1  ;;  %v3641_v6 = vld [vmem:[%s5259_s3 + $0x120] sm:$0xff]   ;;  %v3643_v8 = vld [vmem:[%s5259_s3 + $0x118] sm:$0xff]   ;;  %v3645_v10 = vld [vmem:[%s5259_s3 + $0x110] sm:$0xff]  }
   0xe   : > { %3058 = vmatprep.subr.bf16.mxu0 %v3637_v2  ;;  %3609 = vmatprep.subr.bf16.mxu1 %v3637_v2  ;;  %s3054_s13 = sshll.u32 %s5332_s22, 8  ;;  %v3642_v7 = vld [vmem:[%s5259_s3 + $0xe0] sm:$0xff]   ;;  %v3644_v9 = vld [vmem:[%s5259_s3 + $0xd8] sm:$0xff]   ;;  %v3646_v21 = vld [vmem:[%s5259_s3 + $0xd0] sm:$0xff]  }
   0xf   : > { %s3796_s20 = scalar_lea.vmem %s5256_s0, %s3054_s13  ;;  %v3807_v11 = vld [vmem:[%s5257_s1] ss:$0 sm:$0xff]  ;;  %v3647_v23 = vld [vmem:[%s5259_s3 + $0x108] sm:$0xff]   ;;  %vm3875_vm1 = vmneg %vm439_vm0  ;;  %s5074_s9 = scalar_lea.vmem %s5261_s5, %s3054_s13 }
  0x10   : > { %v3812_v12 = vld [vmem:[%s5258_s2] ss:$0 sm:$0xff]  ;;  %v267_v14 = vld [vmem:[%s3796_s20 + $0x8] sm:$0xff]  ;;  %v268_v28 = vld [vmem:[%s3796_s20 + $0x10] sm:$0xff]  ;;  %s2544_s13 = sshll.u32 %s5332_s22, 1 }
  0x11   : > { %3059 = vmatpush3.bf16.msra.mxu0 %v3638_v3  ;;  %3617 = vmatpush3.bf16.msra.mxu1 %v3638_v3  ;;  %v266_v13 = vld [vmem:[%s3796_s20] sm:$0xff]  ;;  %v291_v17 = vld [vmem:[%s3796_s20 + $0xc8] sm:$0xff]  ;;  %v305_v18 = vmul.f32 %v3807_v11, %v267_v14  ;;  %v269_v33 = vld [vmem:[%s3796_s20 + $0x18] sm:$0xff]  ;;  %v306_v34 = vmul.f32 %v3807_v11, %v268_v28  ;;  %s262_s12 = scalar_lea.vmem %s5262_s6, %s2544_s13 }
  0x12   : > { %3060 = vmatprep.subr.bf16.mxu0 %v3639_v4  ;;  %3610 = vmatprep.subr.bf16.mxu1 %v3639_v4  ;;  %v304_v15 = vmul.f32 %v3807_v11, %v266_v13  ;;  %v290_v16 = vld [vmem:[%s3796_s20 + $0xc0] sm:$0xff]  ;;  %v329_v20 = vmul.f32 %v3807_v11, %v291_v17  ;;  %v3648_v29 = vld [vmem:[%s5259_s3 + $0xc8] sm:$0xff]   ;;  %v292_v35 = vld [vmem:[%s3796_s20 + $0xd0] sm:$0xff]  ;;  %v307_v38 = vmul.f32 %v3807_v11, %v269_v33 }
  0x13   : > { %v328_v19 = vmul.f32 %v3807_v11, %v290_v16  ;;  %v343_v24 = vadd.f32 %v3812_v12, %v305_v18  ;;  %v3649_v36 = vld [vmem:[%s5259_s3 + $0x100] sm:$0xff]   ;;  %v293_v39 = vld [vmem:[%s3796_s20 + $0xd8] sm:$0xff]  ;;  %v330_v40 = vmul.f32 %v3807_v11, %v292_v35  ;;  %v344_v47 = vadd.f32 %v3812_v12, %v306_v34  ;;  %v271_v59 = vld [vmem:[%s3796_s20 + $0x28] sm:$0xff] }
  0x14   : > { %v342_v22 = vadd.f32 %v3812_v12, %v304_v15  ;;  %v367_v26 = vadd.f32 %v3812_v12, %v329_v20  ;;  %v3650_v45 = vld [vmem:[%s5259_s3 + $0xc0] sm:$0xff]   ;;  %v345_v48 = vadd.f32 %v3812_v12, %v307_v38  ;;  %v331_v49 = vmul.f32 %v3807_v11, %v293_v39  ;;  %v3651_v55 = vld [vmem:[%s5259_s3 + $0x178] sm:$0xff]   ;;  %vm3906_vm3 = vmpackc.low %vm3715_vm2, %vm3875_vm1 }
  0x15   : > { %3061 = vmatpush3.bf16.msra.mxu0 %v3640_v5  ;;  %3618 = vmatpush3.bf16.msra.mxu1 %v3640_v5  ;;  %v366_v25 = vadd.f32 %v3812_v12, %v328_v19  ;;  %v3838_v30 = vmax.f32 %v343_v24, 0.0  ;;  %v368_v52 = vadd.f32 %v3812_v12, %v330_v40  ;;  %v270_v53 = vld [vmem:[%s3796_s20 + $0x20] sm:$0xff]  ;;  %v3652_v56 = vld [vmem:[%s5259_s3 + $0xb8] sm:$0xff]   ;;  %v3888_v57 = vmax.f32 %v344_v47, 0.0  ;;  %v272_v15 = vld [vmem:[%s3796_s20 + $0x30] sm:$0xff] }
  0x16   : > { %3062 = vmatprep.subr.bf16.mxu0 %v3641_v6  ;;  %3611 = vmatprep.subr.bf16.mxu1 %v3641_v6  ;;  %v3832_v27 = vmax.f32 %v342_v22, 0.0  ;;  %v3842_v32 = vmax.f32 %v367_v26, 0.0  ;;  %v3890_v58 = vmax.f32 %v345_v48, 0.0  ;;  %v369_v60 = vadd.f32 %v3812_v12, %v331_v49  ;;  %v294_v63 = vld [vmem:[%s3796_s20 + $0xe0] sm:$0xff]  ;;  %v273_v19 = vld [vmem:[%s3796_s20 + $0x38] sm:$0xff]  ;;  %v296_v24 = vld [vmem:[%s3796_s20 + $0xf0] sm:$0xff] }
  0x17   : > { %v3840_v31 = vmax.f32 %v366_v25, 0.0  ;;  %v443_v41 = vrot.slane %v3838_v30, 7  ;;  %v3894_v61 = vmax.f32 %v368_v52, 0.0  ;;  %v308_v62 = vmul.f32 %v3807_v11, %v270_v53  ;;  %v3654_v35 = vld [vmem:[%s5259_s3 + $0x168] sm:$0xff]   ;;  %v274_v49 = vld [vmem:[%s3796_s20 + $0x40] sm:$0xff]  ;;  %vm4123_vm5 = vmpackc.low %vm541_vm4, %vm3715_vm2 }
  0x18   : > { %v442_v37 = vrot.slane %v3832_v27, 7  ;;  %v3857_v42 = vpack.c.bf16 %v3838_v30, %v3832_v27  ;;  %v479_v46 = vrot.slane %v3842_v32, 7  ;;  %v445_v2 = vrot.slane %v3888_v57, 7 }
  0x19   : > { %3063 = vmatpush3.bf16.msra.mxu0 %v3642_v7  ;;  %3619 = vmatpush3.bf16.msra.mxu1 %v3642_v7  ;;  %v3861_v43 = vpack.c.bf16 %v3842_v32, %v3840_v31  ;;  %v478_v44 = vrot.slane %v3840_v31, 7  ;;  %v3910_v4 = vmax.f32 %v369_v60, 0.0  ;;  %v446_v5 = vrot.slane %v3890_v58, 7 }
  0x1a   : > { %3064 = vmatprep.subr.bf16.mxu0 %v3643_v8  ;;  %3612 = vmatprep.subr.bf16.mxu1 %v3643_v8  ;;  %v444_v50 = vsel %vm439_vm0, %v442_v37, %v443_v41  ;;  %v481_v6 = vrot.slane %v3894_v61, 7  ;;  %v309_v7 = vmul.f32 %v3807_v11, %v271_v59  ;;  %v295_v8 = vld [vmem:[%s3796_s20 + $0xe8] sm:$0xff]  ;;  %v346_v13 = vadd.f32 %v3812_v12, %v308_v62  ;;  %v3655_v62 = vld [vmem:[%s5259_s3 + $0x160] sm:$0xff]  }
  0x1b   : > { %967 = vmatprep.mubr.bf16.mxu0 %v3857_v42  ;;  %1063 = vmatprep.mubr.bf16.mxu1 %v3861_v43  ;;  %v480_v54 = vsel %vm439_vm0, %v478_v44, %v479_v46  ;;  %v3898_v0 = vpack.c.bf16 %v444_v50, %v442_v37  ;;  %v332_v14 = vmul.f32 %v3807_v11, %v294_v63  ;;  %v482_v18 = vrot.slane %v3910_v4, 7 }
  0x1c   : > { %v3900_v1 = vpack.c.bf16 %v480_v54, %v478_v44  ;;  %v3927_v16 = vpack.c.bf16 %v3890_v58, %v3888_v57  ;;  %v447_v17 = vsel %vm439_vm0, %v445_v2, %v446_v5  ;;  %v3934_v20 = vpack.c.bf16 %v3910_v4, %v3894_v61  ;;  %v3660_v44 = vld [vmem:[%s5259_s3 + $0xa8] sm:$0xff]  }
  0x1d   : > { %3065 = vmatpush3.bf16.msra.mxu0 %v3644_v9  ;;  %3620 = vmatpush3.bf16.msra.mxu1 %v3644_v9  ;;  %v3653_v9 = vld [vmem:[%s5259_s3 + $0x170] sm:$0xff]   ;;  %v3937_v22 = vmax.f32 %v346_v13, 0.0  ;;  %v483_v25 = vsel %vm439_vm0, %v481_v6, %v482_v18  ;;  %v370_v26 = vadd.f32 %v3812_v12, %v332_v14  ;;  %v310_v28 = vmul.f32 %v3807_v11, %v272_v15  ;;  %v275_v54 = vld [vmem:[%s3796_s20 + $0x48] sm:$0xff] }
  0x1e   : > { %3066 = vmatprep.subr.bf16.mxu0 %v3645_v10  ;;  %3613 = vmatprep.subr.bf16.mxu1 %v3645_v10  ;;  %v3656_v10 = vld [vmem:[%s5259_s3 + $0xb0] sm:$0xff]   ;;  %5278 = vst [vmem:[#allocation2_spill] sm:$0xff] %v3934_v20  ;;  %v544_v33 = vrot.slane %v3832_v27, 1  ;;  %v3952_v34 = vpack.c.bf16 %v447_v17, %v445_v2  ;;  %v311_v39 = vmul.f32 %v3807_v11, %v273_v19  ;;  %v547_v13 = vrot.slane %v3888_v57, 1  ;;  %v3657_v17 = vld [vmem:[%s5259_s3 + $0x158] sm:$0xff]   ;;  %v3664_v57 = vld [vmem:[%s5259_s3 + $0xa0] sm:$0xff]  }
  0x1f   : > { %v3961_v38 = vmax.f32 %v370_v26, 0.0  ;;  %v348_v40 = vadd.f32 %v3812_v12, %v310_v28  ;;  %v334_v41 = vmul.f32 %v3807_v11, %v296_v24  ;;  %v448_v47 = vrot.slane %v3937_v22, 7  ;;  %v277_v24 = vld [vmem:[%s3796_s20 + $0x58] sm:$0xff]  ;;  %v4096_v27 = vld [vmem:[%s5259_s3 + $0x90] sm:$0xff]  }
  0x20   : > { %v349_v52 = vadd.f32 %v3812_v12, %v311_v39  ;;  %v548_v14 = vrot.slane %v3890_v58, 1  ;;  %v278_v39 = vld [vmem:[%s3796_s20 + $0x60] sm:$0xff] }
  0x21   : > { %3067 = vmatpush3.bf16.msra.mxu0 %v3646_v21  ;;  %3621 = vmatpush3.bf16.msra.mxu1 %v3646_v21  ;;  %v347_v21 = vadd.f32 %v3812_v12, %v309_v7  ;;  %v372_v53 = vadd.f32 %v3812_v12, %v334_v41  ;;  %v3987_v59 = vmax.f32 %v348_v40, 0.0 }
  0x22   : > { %3068 = vmatprep.subr.bf16.mxu0 %v3647_v23  ;;  %3614 = vmatprep.subr.bf16.mxu1 %v3647_v23  ;;  %v333_v23 = vmul.f32 %v3807_v11, %v295_v8  ;;  %v3997_v2 = vmax.f32 %v349_v52, 0.0  ;;  %v312_v8 = vmul.f32 %v3807_v11, %v274_v49 }
  0x23   : > { %v3999_v5 = vmax.f32 %v372_v53, 0.0  ;;  %v451_v19 = vrot.slane %v3987_v59, 7 }
  0x24   : > { %v371_v37 = vadd.f32 %v3812_v12, %v333_v23 }
  0x25   : > { %3069 = vmatpush3.bf16.msra.mxu0 %v3648_v29  ;;  %3622 = vmatpush3.bf16.msra.mxu1 %v3648_v29  ;;  %v297_v29 = vld [vmem:[%s3796_s20 + $0xf8] sm:$0xff]  ;;  %v487_v26 = vrot.slane %v3999_v5, 7 }
  0x26   : > { %3070 = vmatprep.subr.bf16.mxu0 %v3649_v36  ;;  %3615 = vmatprep.subr.bf16.mxu1 %v3649_v36  ;;  %v3957_v36 = vmax.f32 %v347_v21, 0.0  ;;  %v3972_v46 = vmax.f32 %v371_v37, 0.0  ;;  %v335_v48 = vmul.f32 %v3807_v11, %v297_v29  ;;  %v350_v21 = vadd.f32 %v3812_v12, %v312_v8 }
  0x27   : > { %v316_v8 = vmul.f32 %v3807_v11, %v278_v39 }
  0x28   : > { %v3979_v50 = vpack.c.bf16 %v3957_v36, %v3937_v22  ;;  %v449_v51 = vrot.slane %v3957_v36, 7  ;;  %v373_v60 = vadd.f32 %v3812_v12, %v335_v48  ;;  %v3995_v63 = vpack.c.bf16 %v3972_v46, %v3961_v38 }
  0x29   : > { %3071 = vmatpush3.bf16.msra.mxu0 %v3650_v45  ;;  %3623 = vmatpush3.bf16.msra.mxu1 %v3650_v45  ;;  %v3970_v45 = vpack.c.bf16 %v483_v25, %v481_v6  ;;  %v545_v6 = vrot.slane %v3838_v30, 1  ;;  %v452_v25 = vrot.slane %v3997_v2, 7  ;;  %v315_v48 = vmul.f32 %v3807_v11, %v277_v24 }
  0x2a   : > { %3464 = vmatprep.subr.bf16.mxu1 %v3651_v55  ;;  %3512 = vmatprep.subr.bf16.mxu0 %v3652_v56  ;;  %5280 = vst [vmem:[#allocation4_spill] sm:$0xff] %v3995_v63  ;;  %v4002_v7 = vmax.f32 %v373_v60, 0.0  ;;  %v450_v15 = vsel %vm439_vm0, %v448_v47, %v449_v51  ;;  %v279_v51 = vld [vmem:[%s3796_s20 + $0x68] sm:$0xff] }
  0x2b   : > { %5279 = vst [vmem:[#allocation3_spill] sm:$0xff] %v3970_v45  ;;  %v4038_v40 = vpack.c.bf16 %v450_v15, %v448_v47  ;;  %v3658_v47 = vld [vmem:[%s5259_s3 + $0x150] sm:$0xff]   ;;  %v453_v53 = vsel %vm439_vm0, %v451_v19, %v452_v25  ;;  %v549_v15 = vsel %vm541_vm4, %v547_v13, %v548_v14  ;;  %v281_v13 = vld [vmem:[%s3796_s20 + $0x78] sm:$0xff]  ;;  %v551_v25 = vrot.slane %v3957_v36, 1 }
  0x2c   : > { %2622 = vmatmul.mubr.msk.bf16.vlgmr.msra.gmra.mxu0 %vm3906_vm3, %v3898_v0  ;;  %2670 = vmatmul.mubr.msk.bf16.vlgmr.msra.gmra.mxu1 %vm3906_vm3, %v3900_v1  ;;  %v488_v29 = vrot.slane %v4002_v7, 7  ;;  %v4051_v52 = vpack.c.bf16 %v4002_v7, %v3999_v5  ;;  %v4088_v24 = vpack.c.bf16 %v453_v53, %v451_v19  ;;  %v554_v19 = vrot.slane %v3997_v2, 1 }
  0x2d   : > { %3465 = vmatpush3.bf16.msra.mxu1 %v3651_v55  ;;  %3513 = vmatpush3.bf16.msra.mxu0 %v3652_v56  ;;  %v484_v55 = vrot.slane %v3961_v38, 7  ;;  %v485_v56 = vrot.slane %v3972_v46, 7 }
  0x2e   : > { %3466 = vmatprep.subr.bf16.mxu1 %v3653_v9  ;;  %975 = vmatprep.mubr.bf16.mxu0 %v3927_v16  ;;  %5282 = vst [vmem:[#allocation6_spill] sm:$0xff] %v4051_v52  ;;  %v489_v60 = vsel %vm439_vm0, %v487_v26, %v488_v29 }
  0x2f   : > { %1071 = vmatprep.mubr.bf16.mxu1 %v3934_v20  ;;  %3514 = vmatprep.subr.bf16.mxu0 %v3656_v10  ;;  %v486_v18 = vsel %vm439_vm0, %v484_v55, %v485_v56  ;;  %v353_v56 = vadd.f32 %v3812_v12, %v315_v48 }
  0x30   : > { %v4040_v41 = vpack.c.bf16 %v486_v18, %v484_v55 }
  0x31   : > { %3467 = vmatpush3.bf16.msra.mxu1 %v3653_v9  ;;  %3515 = vmatpush3.bf16.msra.mxu0 %v3656_v10  ;;  %v313_v9 = vmul.f32 %v3807_v11, %v275_v54  ;;  %v276_v10 = vld [vmem:[%s3796_s20 + $0x50] sm:$0xff]  ;;  %v4082_v18 = vmax.f32 %v353_v56, 0.0  ;;  %v282_v56 = vld [vmem:[%s3796_s20 + $0x80] sm:$0xff] }
  0x32   : > { %3468 = vmatprep.subr.bf16.mxu1 %v3654_v35  ;;  %3516 = vmatprep.subr.bf16.mxu0 %v3660_v44  ;;  %v314_v28 = vmul.f32 %v3807_v11, %v276_v10  ;;  %5281 = vst [vmem:[#allocation5_spill] sm:$0xff] %v4040_v41  ;;  %v3669_v10 = vld [vmem:[%s5259_s3 + $0x98] sm:$0xff]  }
  0x33   : > { %v351_v23 = vadd.f32 %v3812_v12, %v313_v9  ;;  %v317_v9 = vmul.f32 %v3807_v11, %v279_v51  ;;  %v458_v48 = vrot.slane %v4082_v18, 7  ;;  %v3661_v51 = vld [vmem:[%s5259_s3 + $0x140] sm:$0xff]  }
  0x34   : > { %2626 = vmatmul.mubr.msk.bf16.gmra.mxu0 %vm3906_vm3, %v3952_v34  ;;  %2674 = vmatmul.mubr.msk.bf16.gmra.mxu1 %vm3906_vm3, %v3970_v45  ;;  %v352_v49 = vadd.f32 %v3812_v12, %v314_v28  ;;  %v354_v28 = vadd.f32 %v3812_v12, %v316_v8 }
  0x35   : > { %3469 = vmatpush3.bf16.msra.mxu1 %v3654_v35  ;;  %983 = vmatprep.mubr.bf16.mxu0 %v3979_v50  ;;  %v4033_v35 = vmax.f32 %v350_v21, 0.0  ;;  %v4035_v37 = vmax.f32 %v351_v23, 0.0  ;;  %v550_v21 = vrot.slane %v3937_v22, 1  ;;  %v280_v23 = vld [vmem:[%s3796_s20 + $0x70] sm:$0xff]  ;;  %v355_v29 = vadd.f32 %v3812_v12, %v317_v9 }
  0x36   : > { %3470 = vmatprep.subr.bf16.mxu1 %v3655_v62  ;;  %1079 = vmatprep.mubr.bf16.mxu1 %v3995_v63  ;;  %v4099_v22 = vpack.c.bf16 %v489_v60, %v487_v26  ;;  %v4114_v53 = vmax.f32 %v354_v28, 0.0 }
  0x37   : > { %3517 = vmatpush3.bf16.msra.mxu0 %v3660_v44  ;;  %v4047_v44 = vpack.c.bf16 %v3997_v2, %v3987_v59  ;;  %v454_v54 = vrot.slane %v4033_v35, 7  ;;  %v455_v55 = vrot.slane %v4035_v37, 7  ;;  %v557_v26 = vrot.slane %v4035_v37, 1 }
  0x38   : > { %3518 = vmatprep.subr.bf16.mxu0 %v3664_v57  ;;  %5283 = vst [vmem:[#allocation7_spill] sm:$0xff] %v4099_v22  ;;  %v319_v2 = vmul.f32 %v3807_v11, %v281_v13  ;;  %v4129_v8 = vpack.c.bf16 %v4035_v37, %v4033_v35  ;;  %v552_v9 = vsel %vm541_vm4, %v550_v21, %v551_v25  ;;  %v283_v37 = vld [vmem:[%s3796_s20 + $0x88] sm:$0xff] }
  0x39   : > { %3471 = vmatpush3.bf16.msra.mxu1 %v3655_v62  ;;  %v4061_v62 = vmax.f32 %v352_v49, 0.0  ;;  %v456_v36 = vsel %vm439_vm0, %v454_v54, %v455_v55  ;;  %v556_v49 = vrot.slane %v4033_v35, 1  ;;  %v4116_v55 = vmax.f32 %v355_v29, 0.0 }
  0x3a   : > { %3472 = vmatprep.subr.bf16.mxu1 %v3657_v17  ;;  %v4137_v13 = vpack.c.bf16 %v548_v14, %v549_v15  ;;  %v4143_v35 = vpack.c.bf16 %v456_v36, %v454_v54  ;;  %v357_v58 = vadd.f32 %v3812_v12, %v319_v2  ;;  %v284_v14 = vld [vmem:[%s3796_s20 + $0x90] sm:$0xff]  ;;  %v285_v15 = vld [vmem:[%s3796_s20 + $0x98] sm:$0xff] }
  0x3b   : > { %3519 = vmatpush3.bf16.msra.mxu0 %v3664_v57  ;;  %v546_v57 = vsel %vm541_vm4, %v544_v33, %v545_v6  ;;  %v3659_v33 = vld [vmem:[%s5259_s3 + $0x148] sm:$0xff]   ;;  %v457_v39 = vrot.slane %v4061_v62, 7  ;;  %v4162_v30 = vpack.c.bf16 %v4082_v18, %v4061_v62  ;;  %v558_v54 = vsel %vm541_vm4, %v556_v49, %v557_v26 }
  0x3c   : > { %2630 = vmatmul.mubr.msk.bf16.gmra.mxu0 %vm3906_vm3, %v4038_v40  ;;  %2678 = vmatmul.mubr.msk.bf16.gmra.mxu1 %vm3906_vm3, %v4040_v41  ;;  %v286_v41 = vld [vmem:[%s3796_s20 + $0xa0] sm:$0xff]  ;;  %v323_v2 = vmul.f32 %v3807_v11, %v285_v15 }
  0x3d   : > { %3473 = vmatpush3.bf16.msra.mxu1 %v3657_v17  ;;  %991 = vmatprep.mubr.bf16.mxu0 %v4047_v44  ;;  %v553_v17 = vrot.slane %v3987_v59, 1  ;;  %v318_v59 = vmul.f32 %v3807_v11, %v280_v23  ;;  %v560_v23 = vrot.slane %v4082_v18, 1  ;;  %v459_v28 = vsel %vm439_vm0, %v457_v39, %v458_v48 }
  0x3e   : > { %3474 = vmatprep.subr.bf16.mxu1 %v3658_v47  ;;  %1087 = vmatprep.mubr.bf16.mxu1 %v4051_v52  ;;  %v461_v48 = vrot.slane %v4116_v55, 7  ;;  %v320_v18 = vmul.f32 %v3807_v11, %v282_v56  ;;  %v3663_v56 = vld [vmem:[%s5259_s3 + $0x38] sm:$0xff]   ;;  %v324_v36 = vmul.f32 %v3807_v11, %v286_v41 }
  0x3f   : > { %3520 = vmatprep.subr.bf16.mxu0 %v3669_v10  ;;  %v555_v29 = vsel %vm541_vm4, %v553_v17, %v554_v19  ;;  %v356_v52 = vadd.f32 %v3812_v12, %v318_v59  ;;  %v460_v17 = vrot.slane %v4114_v53, 7  ;;  %v321_v59 = vmul.f32 %v3807_v11, %v283_v37  ;;  %v288_v37 = vld [vmem:[%s3796_s20 + $0xb0] sm:$0xff] }
  0x40   : > { %3521 = vmatpush3.bf16.msra.mxu0 %v3669_v10  ;;  %v559_v10 = vrot.slane %v4061_v62, 1  ;;  %v4184_v49 = vpack.c.bf16 %v554_v19, %v555_v29  ;;  %v287_v19 = vld [vmem:[%s3796_s20 + $0xa8] sm:$0xff]  ;;  %v322_v29 = vmul.f32 %v3807_v11, %v284_v14 }
  0x41   : > { %3475 = vmatpush3.bf16.msra.mxu1 %v3658_v47  ;;  %3522 = vmatprep.subr.bf16.mxu0 %v4096_v27  ;;  %v4141_v47 = vpack.c.bf16 %v545_v6, %v546_v57  ;;  %v4164_v6 = vpack.c.bf16 %v551_v25, %v552_v9  ;;  %v3677_v57 = vld [vmem:[%s5259_s3 + $0x88] sm:$0xff]   ;;  %v3662_v25 = vld [vmem:[%s5259_s3 + $0x78] sm:$0xff]   ;;  %v4193_v9 = vpack.c.bf16 %v4116_v55, %v4114_v53  ;;  %v4197_v21 = vmax.f32 %v356_v52, 0.0 }
  0x42   : > { %3476 = vmatprep.subr.bf16.mxu1 %v3659_v33  ;;  %v561_v62 = vsel %vm541_vm4, %v559_v10, %v560_v23  ;;  %v4195_v10 = vpack.c.bf16 %v557_v26, %v558_v54  ;;  %v462_v52 = vsel %vm439_vm0, %v460_v17, %v461_v48  ;;  %v562_v26 = vrot.slane %v4114_v53, 1  ;;  %v3666_v53 = vld [vmem:[%s5259_s3 + $0x30] sm:$0xff]  }
  0x43   : > { %v359_v14 = vadd.f32 %v3812_v12, %v321_v59  ;;  %v360_v41 = vadd.f32 %v3812_v12, %v322_v29  ;;  %v3680_v59 = vld [vmem:[%s5259_s3 + $0x80] sm:$0xff]   ;;  %v4243_v54 = vpack.c.bf16 %v462_v52, %v460_v17 }
  0x44   : > { %2634 = vmatmul.mubr.msk.bf16.gmra.mxu0 %vm3906_vm3, %v4088_v24  ;;  %2682 = vmatmul.mubr.msk.bf16.gmra.mxu1 %vm3906_vm3, %v4099_v22 }
  0x45   : > { %3477 = vmatpush3.bf16.msra.mxu1 %v3659_v33  ;;  %999 = vmatprep.mubr.bf16.mxu0 %v4129_v8  ;;  %v4182_v33 = vpack.c.bf16 %v459_v28, %v457_v39  ;;  %v4199_v39 = vmax.f32 %v357_v58, 0.0  ;;  %v4204_v28 = vpack.c.bf16 %v560_v23, %v561_v62  ;;  %v5267_v58 = vrot.slane %v4116_v55, 1  ;;  %v3665_v23 = vld [vmem:[%s5259_s3 + $0x70] sm:$0xff]  }
  0x46   : > { %3478 = vmatprep.subr.bf16.mxu1 %v3661_v51  ;;  %3480 = vmatprep.mubr.msk.bf16.mxu1 %vm4123_vm5, %v4141_v47  ;;  %v392_v29 = vmax.f32 %v360_v41, 0.0  ;;  %v326_v62 = vmul.f32 %v3807_v11, %v288_v37  ;;  %v3684_v41 = vld [vmem:[%s5259_s3 + $0x1f8] sm:$0xff]   ;;  %v586_v37 = vrot.slane %v3961_v38, 1 }
  0x47   : > { %3523 = vmatpush3.bf16.msra.mxu0 %v4096_v27  ;;  %v358_v27 = vadd.f32 %v3812_v12, %v320_v18  ;;  %v325_v18 = vmul.f32 %v3807_v11, %v287_v19  ;;  %v564_v48 = vsel %vm541_vm4, %v562_v26, %v5267_v58 }
  0x48   : > { %3524 = vmatprep.subr.bf16.mxu0 %v3677_v57  ;;  %v571_v17 = vrot.slane %v392_v29, 1  ;;  %v364_v45 = vadd.f32 %v3812_v12, %v326_v62  ;;  %v5286_v62 = vrot.slane %v3842_v32, 1  ;;  %v3671_v32 = vld [vmem:[%s5259_s3 + $0x20] sm:$0xff]  }
  0x49   : > { %3479 = vmatpush3.bf16.msra.mxu1 %v3661_v51  ;;  %v361_v51 = vadd.f32 %v3812_v12, %v323_v2  ;;  %v3667_v2 = vld [vmem:[%s5259_s3 + $0x68] sm:$0xff]   ;;  %v4248_v15 = vmax.f32 %v358_v27, 0.0  ;;  %v363_v22 = vadd.f32 %v3812_v12, %v325_v18 }
  0x4a   : > { %3192 = vmatprep.subr.bf16.mxu1 %v3662_v25  ;;  %v289_v25 = vld [vmem:[%s3796_s20 + $0xb8] sm:$0xff] }
  0x4b   : > { %3525 = vmatpush3.bf16.msra.mxu0 %v3677_v57  ;;  %v393_v19 = vmax.f32 %v361_v51, 0.0  ;;  %v362_v57 = vadd.f32 %v3812_v12, %v324_v36  ;;  %v4257_v36 = vmax.f32 %v359_v14, 0.0  ;;  %v395_v27 = vmax.f32 %v363_v22, 0.0  ;;  %v3668_v22 = vld [vmem:[%s5259_s3 + $0x28] sm:$0xff]  }
  0x4c   : > { %2638 = vmatmul.mubr.msk.bf16.gmra.mxu0 %vm3906_vm3, %v4143_v35  ;;  %3481 = vmatmul.mubr.msk.bf16.vlgmr.msra.gmra.mxu1 %vm4123_vm5, %v4137_v13  ;;  %v469_v51 = vrot.slane %v392_v29, 7  ;;  %v327_v63 = vmul.f32 %v3807_v11, %v289_v25  ;;  %v396_v25 = vmax.f32 %v364_v45, 0.0 }
  0x4d   : > { %3193 = vmatpush3.bf16.msra.mxu1 %v3663_v56  ;;  %1007 = vmatprep.mubr.bf16.mxu0 %v4162_v30  ;;  %v572_v56 = vrot.slane %v393_v19, 1  ;;  %v4260_v52 = vpack.c.bf16 %v393_v19, %v392_v29  ;;  %v394_v26 = vmax.f32 %v362_v57, 0.0  ;;  %v470_v58 = vrot.slane %v393_v19, 7  ;;  %v3670_v19 = vld [vmem:[%s5259_s3 + $0x60] sm:$0xff]  }
  0x4e   : > { %3484 = vmatprep.mubr.msk.bf16.mxu1 %vm4123_vm5, %v4164_v6  ;;  %3194 = vmatprep.subr.bf16.mxu1 %v3665_v23  ;;  %v575_v20 = vrot.slane %v395_v27, 1  ;;  %v365_v11 = vadd.f32 %v3812_v12, %v327_v63  ;;  %v577_v63 = vrot.slane %v396_v25, 1 }
  0x4f   : > { %3526 = vmatprep.subr.bf16.mxu0 %v3680_v59  ;;  %v573_v18 = vsel %vm541_vm4, %v571_v17, %v572_v56  ;;  %v574_v14 = vrot.slane %v394_v26, 1  ;;  %v4267_v38 = vpack.c.bf16 %v395_v27, %v394_v26  ;;  %v471_v29 = vsel %vm439_vm0, %v469_v51, %v470_v58 }
  0x50   : > { %3527 = vmatpush3.bf16.msra.mxu0 %v3680_v59  ;;  %v4265_v23 = vpack.c.bf16 %v572_v56, %v573_v18  ;;  %v4283_v57 = vpack.c.bf16 %v471_v29, %v469_v51  ;;  %v472_v12 = vrot.slane %v394_v26, 7  ;;  %v397_v45 = vmax.f32 %v365_v11, 0.0 }
  0x51   : > { %3195 = vmatpush3.bf16.msra.mxu1 %v3666_v53  ;;  %3328 = vmatprep.subr.bf16.mxu0 %v3684_v41  ;;  %v5287_v53 = vrot.slane %v3840_v31, 1  ;;  %v5288_v41 = vmov %v5286_v62  ;;  %v473_v17 = vrot.slane %v395_v27, 7  ;;  %v5289_v56 = vrot.slane %v3910_v4, 1 }
  0x52   : > { %3196 = vmatprep.subr.bf16.mxu1 %v3667_v2  ;;  %v576_v2 = vsel %vm541_vm4, %v574_v14, %v575_v20  ;;  %v5290_v26 = vrot.slane %v3894_v61, 1  ;;  %v587_v51 = vrot.slane %v3972_v46, 1  ;;  %v475_v18 = vrot.slane %v396_v25, 7  ;;  %v3673_v14 = vld [vmem:[%s5259_s3 + $0x58] sm:$0xff]  }
  0x53   : > { %v582_v59 = vsel %vm541_vm4, %v5287_v53, %v5286_v62  ;;  %v4295_v31 = vpack.c.bf16 %v575_v20, %v576_v2  ;;  %v589_v27 = vrot.slane %v3999_v5, 1  ;;  %v578_v29 = vrot.slane %v397_v45, 1 }
  0x54   : > { %v4287_v58 = vpack.c.bf16 %v5288_v41, %v582_v59  ;;  %2642 = vmatmul.mubr.msk.bf16.gmra.mxu0 %vm3906_vm3, %v4182_v33  ;;  %3485 = vmatmul.mubr.msk.bf16.gmra.mxu1 %vm4123_vm5, %v4184_v49  ;;  %v585_v20 = vsel %vm541_vm4, %v5290_v26, %v5289_v56  ;;  %v474_v11 = vsel %vm439_vm0, %v472_v12, %v473_v17  ;;  %v476_v5 = vrot.slane %v397_v45, 7  ;;  %v3675_v26 = vld [vmem:[%s5259_s3 + $0x50] sm:$0xff]  }
  0x55   : > { %1015 = vmatprep.mubr.bf16.mxu0 %v4193_v9  ;;  %3488 = vmatprep.mubr.msk.bf16.mxu1 %vm4123_vm5, %v4195_v10  ;;  %v5291_v62 = vmov %v5289_v56  ;;  %v4319_v61 = vpack.c.bf16 %v397_v45, %v396_v25  ;;  %v4321_v59 = vpack.c.bf16 %v474_v11, %v472_v12  ;;  %v588_v46 = vsel %vm541_vm4, %v586_v37, %v587_v51  ;;  %v3674_v37 = vld [vmem:[%s5259_s3 + $0x18] sm:$0xff]  }
  0x56   : > { %3197 = vmatpush3.bf16.msra.mxu1 %v3668_v22  ;;  %v4317_v53 = vpack.c.bf16 %v5291_v62, %v585_v20  ;;  %v590_v22 = vrot.slane %v4002_v7, 1  ;;  %v4327_v2 = vpack.c.bf16 %v4199_v39, %v4197_v21  ;;  %v5292_v41 = vrot.slane %v4116_v55, 1 }
  0x57   : > { %3198 = vmatprep.subr.bf16.mxu1 %v3670_v19  ;;  %v579_v4 = vsel %vm541_vm4, %v577_v63, %v578_v29  ;;  %v4334_v25 = vpack.c.bf16 %v587_v51, %v588_v46  ;;  %v566_v19 = vrot.slane %v4199_v39, 1  ;;  %v477_v7 = vsel %vm439_vm0, %v475_v18, %v476_v5 }
  0x58   : > { %v4331_v17 = vpack.c.bf16 %v5292_v41, %v564_v48  ;;  %v4340_v12 = vpack.c.bf16 %v578_v29, %v579_v4  ;;  %v591_v45 = vsel %vm541_vm4, %v589_v27, %v590_v22  ;;  %v568_v55 = vrot.slane %v4248_v15, 1  ;;  %v3676_v29 = vld [vmem:[%s5259_s3 + $0x10] sm:$0xff]  }
  0x59   : > { %v569_v48 = vrot.slane %v4257_v36, 1  ;;  %v4346_v63 = vpack.c.bf16 %v477_v7, %v475_v18  ;;  %v4348_v56 = vpack.c.bf16 %v590_v22, %v591_v45  ;;  %v5294_v20 = vrot.slane %v4197_v21, 7 }
  0x5a   : > { %3199 = vmatpush3.bf16.msra.mxu1 %v3671_v32  ;;  %v5293_v32 = vrot.slane %v4199_v39, 7  ;;  %v5295_v18 = vrot.slane %v4197_v21, 1  ;;  %v3678_v39 = vld [vmem:[%s5259_s3 + $0x48] sm:$0xff]   ;;  %v4386_v5 = vpack.c.bf16 %v4257_v36, %v4248_v15  ;;  %v466_v41 = vrot.slane %v4248_v15, 7  ;;  %v3681_v21 = vld [vmem:[%s5259_s3 + $0x40] sm:$0xff]  }
  0x5b   : > { %3200 = vmatprep.subr.bf16.mxu1 %v3673_v14  ;;  %v570_v14 = vsel %vm541_vm4, %v568_v55, %v569_v48  ;;  %v5296_v11 = vmov %v5294_v20  ;;  %v467_v4 = vrot.slane %v4257_v36, 7  ;;  %v3682_v36 = vld [vmem:[%s5259_s3] sm:$0xff]   ;;  %v3716_v45 = vmov 0.0  }
  0x5c   : > { %2646 = vmatmul.mubr.msk.bf16.gmra.mxu0 %vm3906_vm3, %v4243_v54  ;;  %3489 = vmatmul.mubr.msk.bf16.gmra.mxu1 %vm4123_vm5, %v4204_v28  ;;  %v465_v51 = vsel %vm439_vm0, %v5294_v20, %v5293_v32  ;;  %v567_v27 = vsel %vm541_vm4, %v5295_v18, %v566_v19  ;;  %v4388_v22 = vpack.c.bf16 %v569_v48, %v570_v14  ;;  %v542_v55 = vrot.slane %v3716_v45, 1  ;;  %v3686_v18 = vld [vmem:[%s5259_s3 + $0x1f0] sm:$0xff]  }
  0x5d   : > { %1023 = vmatprep.mubr.bf16.mxu0 %v4327_v2  ;;  %3492 = vmatprep.mubr.msk.bf16.mxu1 %vm4123_vm5, %v4331_v17  ;;  %v4380_v62 = vpack.c.bf16 %v465_v51, %v5296_v11  ;;  %v4382_v46 = vpack.c.bf16 %v566_v19, %v567_v27  ;;  %v468_v15 = vsel %vm439_vm0, %v466_v41, %v467_v4  ;;  %v3683_v19 = vld [vmem:[%s5259_s3 + $0x238] sm:$0xff]   ;;  %v3717_v32 = vmov 0.0|0.0   ;;  %v3688_v27 = vld [vmem:[%s5259_s3 + $0x230] sm:$0xff]   ;;  %v3698_v11 = vld [vmem:[%s5259_s3 + $0x220] sm:$0xff]  }
  0x5e   : > { %3201 = vmatpush3.bf16.msra.mxu1 %v3674_v37  ;;  %v3679_v37 = vld [vmem:[%s5259_s3 + $0x8] sm:$0xff]   ;;  %v4415_v7 = vpack.c.bf16 %v468_v15, %v466_v41  ;;  %v4447_v48 = vpack.c.bf16 %v542_v55, %v542_v55  ;;  %v3685_v51 = vld [vmem:[%s5259_s3 + $0x1b8] sm:$0xff]   ;;  %v3687_v14 = vld [vmem:[%s5259_s3 + $0x1b0] sm:$0xff]  }
  0x5f   : > { %3202 = vmatprep.subr.bf16.mxu1 %v3675_v26  ;;  %v440_v26 = vrot.slane %v3716_v45, 7  ;;  %v3692_v41 = vld [vmem:[%s5259_s3 + $0x1a0] sm:$0xff]   ;;  %v3703_v4 = vld [vmem:[%s5259_s3 + $0x218] sm:$0xff]   ;;  %v3704_v15 = vld [vmem:[%s5259_s3 + $0x210] sm:$0xff]  }
  0x60   : > { %v3705_v45 = vld [vmem:[%s5259_s3 + $0x208] sm:$0xff]  }
  0x61   : > { %v4459_v20 = vpack.c.bf16 %v440_v26, %v440_v26  ;;  %v3700_v55 = vld [vmem:[%s5259_s3 + $0x188] sm:$0xff]   ;;  %v3701_v26 = vld [vmem:[%s5259_s3 + $0x1c0] sm:$0xff]  }
  0x62   : > { %3203 = vmatpush3.bf16.msra.mxu1 %v3676_v29  ;;  %v3689_v29 = vld [vmem:[%s5259_s3 + $0x1e8] sm:$0xff]  }
  0x63   : > { %3204 = vmatprep.subr.bf16.mxu1 %v3678_v39  ;;  %v3691_v39 = vld [vmem:[%s5259_s3 + $0x1e0] sm:$0xff]  }
  0x64   : > { %2650 = vmatmul.mubr.msk.bf16.gmra.mxu0 %vm3906_vm3, %v4380_v62  ;;  %3493 = vmatmul.mubr.msk.bf16.gmra.mxu1 %vm4123_vm5, %v4382_v46 }
  0x65   : > { %1031 = vmatprep.mubr.bf16.mxu0 %v4386_v5  ;;  %3496 = vmatprep.mubr.msk.bf16.mxu1 %vm4123_vm5, %v4388_v22 }
  0x66   : > { %3205 = vmatpush3.bf16.msra.mxu1 %v3679_v37  ;;  %v3695_v37 = vld [vmem:[%s5259_s3 + $0x198] sm:$0xff]  }
  0x67   : > { %3206 = vmatprep.subr.bf16.mxu1 %v3681_v21  ;;  %v3696_v21 = vld [vmem:[%s5259_s3 + $0x1d0] sm:$0xff]  }
  0x6a   : > { %3207 = vmatpush3.bf16.msra.mxu1 %v3682_v36  ;;  %v3697_v36 = vld [vmem:[%s5259_s3 + $0x190] sm:$0xff]  }
  0x6b   : > { %3560 = vmatprep.subr.bf16.mxu1 %v3683_v19 }
  0x6c   : > { %2654 = vmatmul.mubr.msk.bf16.gmra.mxu0 %vm3906_vm3, %v4415_v7  ;;  %3497 = vmatmul.mubr.msk.bf16.gmra.mxu1 %vm4123_vm5, %v4265_v23 }
  0x6d   : > { %1039 = vmatprep.mubr.bf16.mxu0 %v4260_v52  ;;  %3500 = vmatprep.mubr.msk.bf16.mxu1 %vm4123_vm5, %v4295_v31 }
  0x74   : > { %2658 = vmatmul.mubr.msk.bf16.gmra.mxu0 %vm3906_vm3, %v4283_v57  ;;  %3501 = vmatmul.mubr.msk.bf16.gmra.mxu1 %vm4123_vm5, %v4340_v12 }
  0x75   : > { %1047 = vmatprep.mubr.bf16.mxu0 %v4267_v38  ;;  %3504 = vmatprep.mubr.msk.bf16.mxu1 %vm4123_vm5, %v4287_v58 }
  0x7c   : > { %2662 = vmatmul.mubr.msk.bf16.gmra.mxu0 %vm3906_vm3, %v4321_v59  ;;  %3505 = vmatmul.mubr.msk.bf16.gmra.mxu1 %vm4123_vm5, %v4317_v53 }
  0x7d   : > { %1055 = vmatprep.mubr.bf16.mxu0 %v4319_v61  ;;  %3508 = vmatprep.mubr.msk.bf16.mxu1 %vm4123_vm5, %v4334_v25 }
  0x84   : > { %2666 = vmatmul.mubr.msk.bf16.gmra.mxu0 %vm3906_vm3, %v4346_v63  ;;  %3509 = vmatmul.mubr.msk.bf16.gmra.mxu1 %vm4123_vm5, %v4348_v56 }
  0x85   : > { %1433 = vmatprep.mubr.bf16.mxu1 %v3717_v32  ;;  %3528 = vmatprep.mubr.msk.bf16.mxu0 %vm4123_vm5, %v4447_v48 }
  0x8c   : > { %2758 = vmatmul.mubr.msk.bf16.vlgmr.msra.gmra.mxu1 %vm3906_vm3, %v4459_v20  ;;  %3529 = vmatmul.mubr.msk.bf16.vlgmr.msra.gmra.mxu0 %vm4123_vm5, %v4141_v47  ;;  %v3693_v47 = vld [vmem:[%s5259_s3 + $0x228] sm:$0xff]  }
  0x8d   : > { %3561 = vmatpush3.bf16.msra.mxu1 %v3683_v19  ;;  %3329 = vmatpush3.bf16.msra.mxu0 %v3685_v51  ;;  %v3699_v19 = vld [vmem:[%s5259_s3 + $0x1c8] sm:$0xff]   ;;  %v3706_v51 = vld [vmem:[%s5259_s3 + $0x200] sm:$0xff]  }
  0x8e   : > { %1441 = vmatprep.mubr.bf16.mxu1 %v3857_v42  ;;  %3532 = vmatprep.mubr.msk.bf16.mxu0 %vm4123_vm5, %v4137_v13  ;;  %v3690_v42 = vld [vmem:[%s5259_s3 + $0x1a8] sm:$0xff]  }
  0x8f   : > { %3330 = vmatprep.subr.bf16.mxu0 %v3686_v18  ;;  %3562 = vmatprep.subr.bf16.mxu1 %v3688_v27  ;;  %v3702_v18 = vld [vmem:[%s5259_s3 + $0x180] sm:$0xff]  }
  0x91   : > { %3331 = vmatpush3.bf16.msra.mxu0 %v3687_v14  ;;  %3563 = vmatpush3.bf16.msra.mxu1 %v3688_v27 }
  0x92   : > { %3332 = vmatprep.subr.bf16.mxu0 %v3689_v29  ;;  %3564 = vmatprep.subr.bf16.mxu1 %v3693_v47 }
  0x94   : > { %2762 = vmatmul.mubr.msk.bf16.gmra.mxu1 %vm3906_vm3, %v3898_v0  ;;  %3533 = vmatmul.mubr.msk.bf16.gmra.mxu0 %vm4123_vm5, %v4164_v6  ;;  %v3694_v0 = vld [vmem:[%s5259_s3 + $0x1d8] sm:$0xff]  }
  0x95   : > { %1449 = vmatprep.mubr.bf16.mxu1 %v3927_v16  ;;  %3536 = vmatprep.mubr.msk.bf16.mxu0 %vm4123_vm5, %v4184_v49 }
  0x96   : > { %3333 = vmatpush3.bf16.msra.mxu0 %v3690_v42  ;;  %3565 = vmatpush3.bf16.msra.mxu1 %v3693_v47 }
  0x97   : > { %3334 = vmatprep.subr.bf16.mxu0 %v3691_v39  ;;  %3566 = vmatprep.subr.bf16.mxu1 %v3698_v11 }
  0x9a   : > { %3335 = vmatpush3.bf16.msra.mxu0 %v3692_v41  ;;  %3567 = vmatpush3.bf16.msra.mxu1 %v3698_v11 }
  0x9b   : > { %3336 = vmatprep.subr.bf16.mxu0 %v3694_v0  ;;  %3568 = vmatprep.subr.bf16.mxu1 %v3703_v4 }
  0x9c   : > { %2766 = vmatmul.mubr.msk.bf16.gmra.mxu1 %vm3906_vm3, %v3952_v34  ;;  %3537 = vmatmul.mubr.msk.bf16.gmra.mxu0 %vm4123_vm5, %v4195_v10 }
  0x9d   : > { %1457 = vmatprep.mubr.bf16.mxu1 %v3979_v50  ;;  %3540 = vmatprep.mubr.msk.bf16.mxu0 %vm4123_vm5, %v4204_v28 }
  0x9e   : > { %3337 = vmatpush3.bf16.msra.mxu0 %v3695_v37  ;;  %3569 = vmatpush3.bf16.msra.mxu1 %v3703_v4 }
  0x9f   : > { %3338 = vmatprep.subr.bf16.mxu0 %v3696_v21  ;;  %3570 = vmatprep.subr.bf16.mxu1 %v3704_v15 }
  0xa2   : > { %3339 = vmatpush3.bf16.msra.mxu0 %v3697_v36  ;;  %3571 = vmatpush3.bf16.msra.mxu1 %v3704_v15 }
  0xa3   : > { %3340 = vmatprep.subr.bf16.mxu0 %v3699_v19  ;;  %3572 = vmatprep.subr.bf16.mxu1 %v3705_v45 }
  0xa4   : > { %2770 = vmatmul.mubr.msk.bf16.gmra.mxu1 %vm3906_vm3, %v4038_v40  ;;  %3541 = vmatmul.mubr.msk.bf16.gmra.mxu0 %vm4123_vm5, %v4331_v17 }
  0xa5   : > { %1465 = vmatprep.mubr.bf16.mxu1 %v4047_v44  ;;  %3544 = vmatprep.mubr.msk.bf16.mxu0 %vm4123_vm5, %v4382_v46 }
  0xa6   : > { %3341 = vmatpush3.bf16.msra.mxu0 %v3700_v55  ;;  %3573 = vmatpush3.bf16.msra.mxu1 %v3705_v45  ;;  %v5298_v55 = vld [vmem:[#allocation3_spill] sm:$0xff] }
  0xa7   : > { %3342 = vmatprep.subr.bf16.mxu0 %v3701_v26  ;;  %3574 = vmatprep.subr.bf16.mxu1 %v3706_v51 }
  0xaa   : > { %3343 = vmatpush3.bf16.msra.mxu0 %v3702_v18  ;;  %3575 = vmatpush3.bf16.msra.mxu1 %v3706_v51 }
  0xac   : > { %2774 = vmatmul.mubr.msk.bf16.gmra.mxu1 %vm3906_vm3, %v4088_v24  ;;  %3545 = vmatmul.mubr.msk.bf16.gmra.mxu0 %vm4123_vm5, %v4388_v22 }
  0xad   : > { %1473 = vmatprep.mubr.bf16.mxu1 %v4129_v8  ;;  %3548 = vmatprep.mubr.msk.bf16.mxu0 %vm4123_vm5, %v4265_v23 }
  0xb4   : > { %2778 = vmatmul.mubr.msk.bf16.gmra.mxu1 %vm3906_vm3, %v4143_v35  ;;  %3549 = vmatmul.mubr.msk.bf16.gmra.mxu0 %vm4123_vm5, %v4295_v31 }
  0xb5   : > { %1481 = vmatprep.mubr.bf16.mxu1 %v4162_v30  ;;  %3552 = vmatprep.mubr.msk.bf16.mxu0 %vm4123_vm5, %v4340_v12 }
  0xbc   : > { %2782 = vmatmul.mubr.msk.bf16.gmra.mxu1 %vm3906_vm3, %v4182_v33  ;;  %3553 = vmatmul.mubr.msk.bf16.gmra.mxu0 %vm4123_vm5, %v4287_v58 }
  0xbd   : > { %1489 = vmatprep.mubr.bf16.mxu1 %v4193_v9  ;;  %3556 = vmatprep.mubr.msk.bf16.mxu0 %vm4123_vm5, %v4317_v53 }
  0xc4   : > { %2786 = vmatmul.mubr.msk.bf16.gmra.mxu1 %vm3906_vm3, %v4243_v54  ;;  %3557 = vmatmul.mubr.msk.bf16.gmra.mxu0 %vm4123_vm5, %v4334_v25 }
  0xc5   : > { %1497 = vmatprep.mubr.bf16.mxu1 %v4327_v2  ;;  %1948 = vmatprep.mubr.bf16.mxu0 %v3927_v16 }
  0xcc   : > { %2790 = vmatmul.mubr.msk.bf16.gmra.mxu1 %vm3906_vm3, %v4380_v62  ;;  %2942 = vmatmul.mubr.msk.bf16.vlgmr.msra.gmra.mxu0 %vm3906_vm3, %v3952_v34 }
  0xcd   : > { %1505 = vmatprep.mubr.bf16.mxu1 %v4386_v5  ;;  %1956 = vmatprep.mubr.bf16.mxu0 %v3979_v50 }
  0xd4   : > { %2794 = vmatmul.mubr.msk.bf16.gmra.mxu1 %vm3906_vm3, %v4415_v7  ;;  %2946 = vmatmul.mubr.msk.bf16.gmra.mxu0 %vm3906_vm3, %v4038_v40 }
  0xd5   : > { %1513 = vmatprep.mubr.bf16.mxu1 %v4260_v52  ;;  %1964 = vmatprep.mubr.bf16.mxu0 %v4047_v44 }
  0xdc   : > { %2798 = vmatmul.mubr.msk.bf16.gmra.mxu1 %vm3906_vm3, %v4283_v57  ;;  %2950 = vmatmul.mubr.msk.bf16.gmra.mxu0 %vm3906_vm3, %v4088_v24 }
  0xdd   : > { %1521 = vmatprep.mubr.bf16.mxu1 %v4267_v38  ;;  %1972 = vmatprep.mubr.bf16.mxu0 %v4129_v8 }
  0xe4   : > { %2802 = vmatmul.mubr.msk.bf16.gmra.mxu1 %vm3906_vm3, %v4321_v59  ;;  %2954 = vmatmul.mubr.msk.bf16.gmra.mxu0 %vm3906_vm3, %v4143_v35 }
  0xe5   : > { %1529 = vmatprep.mubr.bf16.mxu1 %v4319_v61  ;;  %1980 = vmatprep.mubr.bf16.mxu0 %v4162_v30 }
  0xec   : > { %v3072_v16 = vpop.f32.mrf.mxu0  ;;  %v3144_v34 = vpop.f32.mrf.mxu1  ;;  %2806 = vmatmul.mubr.msk.bf16.gmra.mxu1 %vm3906_vm3, %v4346_v63  ;;  %2958 = vmatmul.mubr.msk.bf16.gmra.mxu0 %vm3906_vm3, %v4182_v33 }
  0xed   : > { %1537 = vmatprep.mubr.bf16.mxu1 %v3861_v43  ;;  %1988 = vmatprep.mubr.bf16.mxu0 %v4193_v9  ;;  %v5297_v9 = vld [vmem:[#allocation2_spill] sm:$0xff] }
  0xee   : > { %v3073_v50 = vpop.f32.mrf.mxu0  ;;  %v3145_v40 = vpop.f32.mrf.mxu1 }
  0xef   : > { %v4645_v44 = vadd.f32 %v3073_v50, %v3072_v16  ;;  %v4647_v24 = vadd.f32 %v3145_v40, %v3144_v34 }
  0xf0   : > { %v3075_v8 = vpop.f32.mrf.mxu0  ;;  %v3147_v35 = vpop.f32.mrf.mxu1 }
  0xf2   : > { %v3076_v30 = vpop.f32.mrf.mxu0  ;;  %v3148_v27 = vpop.f32.mrf.mxu1 }
  0xf3   : > { %v4649_v14 = vadd.f32 %v3076_v30, %v3075_v8  ;;  %v4651_v29 = vadd.f32 %v3148_v27, %v3147_v35 }
  0xf4   : > { %v3078_v47 = vpop.f32.mrf.mxu0  ;;  %v3150_v33 = vpop.f32.mrf.mxu1  ;;  %2810 = vmatmul.mubr.msk.bf16.gmra.mxu1 %vm3906_vm3, %v3900_v1  ;;  %2962 = vmatmul.mubr.msk.bf16.gmra.mxu0 %vm3906_vm3, %v4243_v54  ;;  %v5299_v54 = vld [vmem:[#allocation4_spill] sm:$0xff] }
  0xf5   : > { %1545 = vmatprep.mubr.bf16.mxu1 %v5297_v9  ;;  %1996 = vmatprep.mubr.bf16.mxu0 %v4327_v2 }
  0xf6   : > { %v3079_v42 = vpop.f32.mrf.mxu0  ;;  %v3151_v39 = vpop.f32.mrf.mxu1 }
  0xf7   : > { %v3080_v11 = vadd.f32 %v3079_v42, %v3078_v47  ;;  %v4661_v41 = vadd.f32 %v3151_v39, %v3150_v33  ;;  %v5300_v47 = vld [vmem:[#allocation5_spill] sm:$0xff] }
  0xf8   : > { %v3081_v0 = vpop.f32.mrf.mxu0  ;;  %v3153_v4 = vpop.f32.mrf.mxu1 }
  0xfa   : > { %v3082_v37 = vpop.f32.mrf.mxu0  ;;  %v3154_v21 = vpop.f32.mrf.mxu1 }
  0xfb   : > { %v3083_v15 = vadd.f32 %v3082_v37, %v3081_v0  ;;  %v4663_v36 = vadd.f32 %v3154_v21, %v3153_v4 }
  0xfc   : > { %v3084_v19 = vpop.f32.mrf.mxu0  ;;  %v3156_v45 = vpop.f32.mrf.mxu1  ;;  %2814 = vmatmul.mubr.msk.bf16.gmra.mxu1 %vm3906_vm3, %v5298_v55  ;;  %2966 = vmatmul.mubr.msk.bf16.gmra.mxu0 %vm3906_vm3, %v4380_v62 }
  0xfd   : > { %1553 = vmatprep.mubr.bf16.mxu1 %v5299_v54  ;;  %2004 = vmatprep.mubr.bf16.mxu0 %v4386_v5 }
  0xfe   : > { %v3085_v2 = vpop.f32.mrf.mxu0  ;;  %v3157_v26 = vpop.f32.mrf.mxu1 }
  0xff   : > { %v3086_v51 = vadd.f32 %v3085_v2, %v3084_v19  ;;  %v4673_v18 = vadd.f32 %v3157_v26, %v3156_v45 }
 0x100   : > { %v3087_v16 = vpop.f32.mrf.mxu0  ;;  %v3159_v34 = vpop.f32.mrf.mxu1 }
 0x102   : > { %v3088_v50 = vpop.f32.mrf.mxu0  ;;  %v3160_v40 = vpop.f32.mrf.mxu1 }
 0x103   : > { %v3089_v8 = vadd.f32 %v3088_v50, %v3087_v16  ;;  %v4675_v35 = vadd.f32 %v3160_v40, %v3159_v34 }
 0x104   : > { %v3090_v30 = vpop.f32.mrf.mxu0  ;;  %v3162_v27 = vpop.f32.mrf.mxu1  ;;  %2818 = vmatmul.mubr.msk.bf16.gmra.mxu1 %vm3906_vm3, %v5300_v47  ;;  %2970 = vmatmul.mubr.msk.bf16.gmra.mxu0 %vm3906_vm3, %v4415_v7 }
 0x105   : > { %2012 = vmatprep.mubr.bf16.mxu0 %v4260_v52  ;;  %3576 = vmatprep.mubr.msk.bf16.mxu1 %vm4123_vm5, %v4137_v13 }
 0x106   : > { %v3091_v62 = vpop.f32.mrf.mxu0  ;;  %v3163_v5 = vpop.f32.mrf.mxu1 }
 0x107   : > { %v3092_v33 = vadd.f32 %v3091_v62, %v3090_v30  ;;  %v4687_v42 = vadd.f32 %v3163_v5, %v3162_v27 }
 0x108   : > { %v3093_v39 = vpop.f32.mrf.mxu0  ;;  %v3165_v0 = vpop.f32.mrf.mxu1 }
 0x10a   : > { %v3094_v4 = vpop.f32.mrf.mxu0  ;;  %v3166_v37 = vpop.f32.mrf.mxu1 }
 0x10b   : > { %v3095_v21 = vadd.f32 %v3094_v4, %v3093_v39  ;;  %v4689_v19 = vadd.f32 %v3166_v37, %v3165_v0 }
 0x10c   : > { %v3096_v45 = vpop.f32.mrf.mxu0  ;;  %v3482_v7 = vpop.f32.mrf.mxu1  ;;  %2974 = vmatmul.mubr.msk.bf16.gmra.mxu0 %vm3906_vm3, %v4283_v57  ;;  %3577 = vmatmul.mubr.msk.bf16.vlgmr.msra.gmra.mxu1 %vm4123_vm5, %v4164_v6 }
 0x10d   : > { %v4697_v13 = vadd.f32 %v3482_v7, %v3080_v11  ;;  %2020 = vmatprep.mubr.bf16.mxu0 %v4267_v38  ;;  %3580 = vmatprep.mubr.msk.bf16.mxu1 %vm4123_vm5, %v4184_v49 }
 0x10e   : > { %v3097_v52 = vpop.f32.mrf.mxu0  ;;  %v1130_v2 = vpop.f32.mrf.mxu1 }
 0x10f   : > { %v3098_v26 = vadd.f32 %v3097_v52, %v3096_v45  ;;  %v4704_v16 = vadd.f32 %v4645_v44, %v1130_v2 }
 0x110   : > { %v3099_v34 = vpop.f32.mrf.mxu0  ;;  %v3483_v57 = vpop.f32.mrf.mxu1 }
 0x111   : > { %v4706_v50 = vadd.f32 %v3483_v57, %v3083_v15 }
 0x112   : > { %v3100_v40 = vpop.f32.mrf.mxu0  ;;  %v1133_v6 = vpop.f32.mrf.mxu1 }
 0x113   : > { %v3101_v11 = vadd.f32 %v3100_v40, %v3099_v34  ;;  %v4709_v30 = vadd.f32 %v4649_v14, %v1133_v6 }
 0x114   : > { %v3102_v38 = vpop.f32.mrf.mxu0  ;;  %v3486_v27 = vpop.f32.mrf.mxu1  ;;  %2978 = vmatmul.mubr.msk.bf16.gmra.mxu0 %vm3906_vm3, %v4321_v59  ;;  %3581 = vmatmul.mubr.msk.bf16.gmra.mxu1 %vm4123_vm5, %v4195_v10 }
 0x115   : > { %v4717_v49 = vadd.f32 %v3486_v27, %v3092_v33  ;;  %2028 = vmatprep.mubr.bf16.mxu0 %v4319_v61  ;;  %3584 = vmatprep.mubr.msk.bf16.mxu1 %vm4123_vm5, %v4204_v28 }
 0x116   : > { %v3103_v44 = vpop.f32.mrf.mxu0  ;;  %v1146_v14 = vpop.f32.mrf.mxu1 }
 0x117   : > { %v3104_v15 = vadd.f32 %v3103_v44, %v3102_v38  ;;  %v4723_v62 = vadd.f32 %v3086_v51, %v1146_v14 }
 0x118   : > { %v3105_v5 = vpop.f32.mrf.mxu0  ;;  %v3487_v39 = vpop.f32.mrf.mxu1 }
 0x119   : > { %v4725_v59 = vadd.f32 %v3487_v39, %v3095_v21 }
 0x11a   : > { %v3106_v0 = vpop.f32.mrf.mxu0  ;;  %v1149_v4 = vpop.f32.mrf.mxu1 }
 0x11b   : > { %v3107_v10 = vadd.f32 %v3106_v0, %v3105_v5  ;;  %v4727_v33 = vadd.f32 %v3089_v8, %v1149_v4 }
 0x11c   : > { %v3108_v37 = vpop.f32.mrf.mxu0  ;;  %v3490_v61 = vpop.f32.mrf.mxu1  ;;  %2982 = vmatmul.mubr.msk.bf16.gmra.mxu0 %vm3906_vm3, %v4346_v63  ;;  %3585 = vmatmul.mubr.msk.bf16.gmra.mxu1 %vm4123_vm5, %v4331_v17 }
 0x11d   : > { %v4735_v28 = vadd.f32 %v3490_v61, %v3104_v15  ;;  %2036 = vmatprep.mubr.bf16.mxu0 %v3861_v43  ;;  %3588 = vmatprep.mubr.msk.bf16.mxu1 %vm4123_vm5, %v4382_v46 }
 0x11e   : > { %v3109_v51 = vpop.f32.mrf.mxu0  ;;  %v1162_v8 = vpop.f32.mrf.mxu1 }
 0x11f   : > { %v3110_v21 = vadd.f32 %v3109_v51, %v3108_v37  ;;  %v4741_v45 = vadd.f32 %v3098_v26, %v1162_v8 }
 0x120   : > { %v3111_v7 = vpop.f32.mrf.mxu0  ;;  %v3491_v52 = vpop.f32.mrf.mxu1 }
 0x121   : > { %v4743_v63 = vadd.f32 %v3491_v52, %v3107_v10 }
 0x122   : > { %v3112_v2 = vpop.f32.mrf.mxu0  ;;  %v1165_v34 = vpop.f32.mrf.mxu1 }
 0x123   : > { %v3113_v17 = vadd.f32 %v3112_v2, %v3111_v7  ;;  %v4745_v57 = vadd.f32 %v3101_v11, %v1165_v34 }
 0x124   : > { %v3114_v40 = vpop.f32.mrf.mxu0  ;;  %v3494_v43 = vpop.f32.mrf.mxu1  ;;  %2986 = vmatmul.mubr.msk.bf16.gmra.mxu0 %vm3906_vm3, %v3900_v1  ;;  %3589 = vmatmul.mubr.msk.bf16.gmra.mxu1 %vm4123_vm5, %v4388_v22 }
 0x125   : > { %2044 = vmatprep.mubr.bf16.mxu0 %v5297_v9  ;;  %3592 = vmatprep.mubr.msk.bf16.mxu1 %vm4123_vm5, %v4265_v23 }
 0x126   : > { %v3115_v46 = vpop.f32.mrf.mxu0  ;;  %v1178_v26 = vpop.f32.mrf.mxu1 }
 0x127   : > { %v3116_v6 = vadd.f32 %v3115_v46, %v3114_v40  ;;  %v4757_v11 = vadd.f32 %v3110_v21, %v1178_v26 }
 0x128   : > { %v3117_v38 = vpop.f32.mrf.mxu0  ;;  %v3495_v27 = vpop.f32.mrf.mxu1 }
 0x129   : > { %v4759_v44 = vadd.f32 %v3494_v43, %v3116_v6  ;;  %v5302_v6 = vld [vmem:[#allocation7_spill] sm:$0xff] }
 0x12a   : > { %v3118_v1 = vpop.f32.mrf.mxu0  ;;  %v1181_v14 = vpop.f32.mrf.mxu1 }
 0x12b   : > { %v3119_v15 = vadd.f32 %v3118_v1, %v3117_v38  ;;  %v4761_v5 = vadd.f32 %v3113_v17, %v1181_v14 }
 0x12c   : > { %v3120_v22 = vpop.f32.mrf.mxu0  ;;  %v3498_v9 = vpop.f32.mrf.mxu1  ;;  %2990 = vmatmul.mubr.msk.bf16.gmra.mxu0 %vm3906_vm3, %v5298_v55  ;;  %3593 = vmatmul.mubr.msk.bf16.gmra.mxu1 %vm4123_vm5, %v4295_v31 }
 0x12d   : > { %v4769_v23 = vadd.f32 %v3495_v27, %v3119_v15  ;;  %2052 = vmatprep.mubr.bf16.mxu0 %v5299_v54  ;;  %3596 = vmatprep.mubr.msk.bf16.mxu1 %vm4123_vm5, %v4340_v12  ;;  %v5301_v54 = vld [vmem:[#allocation6_spill] sm:$0xff] }
 0x12e   : > { %v3121_v39 = vpop.f32.mrf.mxu0  ;;  %v1194_v0 = vpop.f32.mrf.mxu1 }
 0x12f   : > { %v3122_v4 = vadd.f32 %v3121_v39, %v3120_v22 }
 0x130   : > { %v3123_v10 = vpop.f32.mrf.mxu0  ;;  %v3499_v37 = vpop.f32.mrf.mxu1 }
 0x131   : > { %v4775_v61 = vadd.f32 %v3122_v4, %v1194_v0 }
 0x132   : > { %v3124_v55 = vpop.f32.mrf.mxu0  ;;  %v1197_v51 = vpop.f32.mrf.mxu1 }
 0x133   : > { %v3125_v8 = vadd.f32 %v3124_v55, %v3123_v10 }
 0x134   : > { %v3126_v21 = vpop.f32.mrf.mxu0  ;;  %v3502_v31 = vpop.f32.mrf.mxu1  ;;  %2994 = vmatmul.mubr.msk.bf16.gmra.mxu0 %vm3906_vm3, %v5300_v47  ;;  %3597 = vmatmul.mubr.msk.bf16.gmra.mxu1 %vm4123_vm5, %v4287_v58 }
 0x135   : > { %v4783_v12 = vadd.f32 %v3125_v8, %v1197_v51  ;;  %2060 = vmatprep.mubr.bf16.mxu0 %v5301_v54  ;;  %3600 = vmatprep.mubr.msk.bf16.mxu1 %vm4123_vm5, %v4317_v53 }
 0x136   : > { %v3127_v7 = vpop.f32.mrf.mxu0  ;;  %v1210_v52 = vpop.f32.mrf.mxu1 }
 0x137   : > { %v3128_v2 = vadd.f32 %v3127_v7, %v3126_v21 }
 0x138   : > { %v3129_v34 = vpop.f32.mrf.mxu0  ;;  %v3503_v17 = vpop.f32.mrf.mxu1 }
 0x139   : > { %v4789_v40 = vadd.f32 %v3498_v9, %v3128_v2 }
 0x13a   : > { %v3130_v47 = vpop.f32.mrf.mxu0  ;;  %v1213_v43 = vpop.f32.mrf.mxu1 }
 0x13b   : > { %v3131_v46 = vadd.f32 %v3130_v47, %v3129_v34 }
 0x13c   : > { %v3132_v26 = vpop.f32.mrf.mxu0  ;;  %v3506_v58 = vpop.f32.mrf.mxu1  ;;  %2998 = vmatmul.mubr.msk.bf16.gmra.mxu0 %vm3906_vm3, %v5302_v6  ;;  %3601 = vmatmul.mubr.msk.bf16.gmra.mxu1 %vm4123_vm5, %v4334_v25 }
 0x13d   : > { %v4797_v53 = vadd.f32 %v3499_v37, %v3131_v46  ;;  %v4800_v38 = vadd.f32 %v3506_v58, %v4661_v41  ;;  %2068 = vmatprep.mubr.bf16.mxu0 %v3717_v32  ;;  %3604 = vmatprep.mubr.msk.bf16.mxu1 %vm4123_vm5, %v4348_v56 }
 0x13e   : > { %v3133_v27 = vpop.f32.mrf.mxu0  ;;  %v1226_v1 = vpop.f32.mrf.mxu1 }
 0x13f   : > { %v3134_v14 = vadd.f32 %v3133_v27, %v3132_v26  ;;  %v4807_v15 = vadd.f32 %v4647_v24, %v1226_v1 }
 0x140   : > { %v3135_v22 = vpop.f32.mrf.mxu0  ;;  %v3507_v9 = vpop.f32.mrf.mxu1 }
 0x141   : > { %v4809_v25 = vadd.f32 %v3134_v14, %v1210_v52  ;;  %v4812_v39 = vadd.f32 %v3507_v9, %v4663_v36 }
 0x142   : > { %v3136_v41 = vpop.f32.mrf.mxu0  ;;  %v1229_v0 = vpop.f32.mrf.mxu1 }
 0x143   : > { %v3137_v32 = vadd.f32 %v3136_v41, %v3135_v22  ;;  %v4815_v4 = vadd.f32 %v4651_v29, %v1229_v0 }
 0x144   : > { %v3138_v56 = vpop.f32.mrf.mxu0  ;;  %v3510_v10 = vpop.f32.mrf.mxu1  ;;  %3002 = vmatmul.mubr.msk.bf16.gmra.mxu0 %vm3906_vm3, %v4459_v20  ;;  %3605 = vmatmul.mubr.msk.bf16.gmra.mxu1 %vm4123_vm5, %v4447_v48 }
 0x145   : > { %v4823_v24 = vadd.f32 %v3137_v32, %v1213_v43  ;;  %v4826_v36 = vadd.f32 %v3510_v10, %v4687_v42 }
 0x146   : > { %v3139_v37 = vpop.f32.mrf.mxu0  ;;  %v1242_v55 = vpop.f32.mrf.mxu1 }
 0x147   : > { %v3140_v51 = vadd.f32 %v3139_v37, %v3138_v56  ;;  %v4829_v29 = vadd.f32 %v4673_v18, %v1242_v55 }
 0x148   : > { %v3141_v8 = vpop.f32.mrf.mxu0  ;;  %v3511_v21 = vpop.f32.mrf.mxu1 }
 0x149   : > { %v4831_v54 = vadd.f32 %v3502_v31, %v3140_v51  ;;  %v4834_v3 = vadd.f32 %v3511_v21, %v4689_v19 }
 0x14a   : > { %v3142_v60 = vpop.f32.mrf.mxu0  ;;  %v1245_v48 = vpop.f32.mrf.mxu1 }
 0x14b   : > { %v3143_v20 = vadd.f32 %v3142_v60, %v3141_v8  ;;  %v4837_v7 = vadd.f32 %v4675_v35, %v1245_v48 }
 0x14c   : > { %v3208_v42 = vpop.f32.mrf.mxu1  ;;  %v3530_v52 = vpop.f32.mrf.mxu0 }
 0x14d   : > { %v4839_v2 = vadd.f32 %v3503_v17, %v3143_v20 }
 0x14e   : > { %v3209_v34 = vpop.f32.mrf.mxu1  ;;  %v1596_v18 = vpop.f32.mrf.mxu0 }
 0x14f   : > { %v3210_v47 = vadd.f32 %v3209_v34, %v3208_v42 }
 0x150   : > { %v3211_v43 = vpop.f32.mrf.mxu1  ;;  %v3531_v46 = vpop.f32.mrf.mxu0 }
 0x151   : > { %v1436_v31 = vadd.f32 %v3210_v47, %v4704_v16 }
 0x152   : > { %v3212_v26 = vpop.f32.mrf.mxu1  ;;  %v1599_v19 = vpop.f32.mrf.mxu0 }
 0x153   : > { %v4842_v58 = vadd.f32 %v1596_v18, %v1436_v31  ;;  %v3213_v6 = vadd.f32 %v3212_v26, %v3211_v43 }
 0x154   : > { %v3214_v27 = vpop.f32.mrf.mxu1  ;;  %v3534_v1 = vpop.f32.mrf.mxu0 }
 0x155   : > { %v1439_v35 = vadd.f32 %v3213_v6, %v4709_v30 }
 0x156   : > { %v3215_v14 = vpop.f32.mrf.mxu1  ;;  %v1612_v22 = vpop.f32.mrf.mxu0 }
 0x157   : > { %v4845_v17 = vadd.f32 %v1599_v19, %v1439_v35  ;;  %v3216_v9 = vadd.f32 %v3215_v14, %v3214_v27 }
 0x158   : > { %v3217_v41 = vpop.f32.mrf.mxu1  ;;  %v3535_v0 = vpop.f32.mrf.mxu0 }
 0x159   : > { %v1444_v32 = vadd.f32 %v3216_v9, %v4697_v13 }
 0x15a   : > { %v3218_v56 = vpop.f32.mrf.mxu1  ;;  %v1615_v16 = vpop.f32.mrf.mxu0 }
 0x15b   : > { %v3219_v10 = vadd.f32 %v3218_v56, %v3217_v41  ;;  %v4848_v37 = vadd.f32 %v3530_v52, %v1444_v32 }
 0x15c   : > { %v3220_v55 = vpop.f32.mrf.mxu1  ;;  %v3538_v51 = vpop.f32.mrf.mxu0 }
 0x15d   : > { %v1447_v8 = vadd.f32 %v3219_v10, %v4706_v50 }
 0x15e   : > { %v3221_v21 = vpop.f32.mrf.mxu1  ;;  %v1628_v30 = vpop.f32.mrf.mxu0 }
 0x15f   : > { %v3222_v60 = vadd.f32 %v3221_v21, %v3220_v55  ;;  %v4851_v48 = vadd.f32 %v3531_v46, %v1447_v8 }
 0x160   : > { %v3223_v20 = vpop.f32.mrf.mxu1  ;;  %v3539_v42 = vpop.f32.mrf.mxu0 }
 0x161   : > { %v1452_v34 = vadd.f32 %v3222_v60, %v4723_v62 }
 0x162   : > { %v3224_v18 = vpop.f32.mrf.mxu1  ;;  %v1631_v13 = vpop.f32.mrf.mxu0 }
 0x163   : > { %v3225_v47 = vadd.f32 %v3224_v18, %v3223_v20  ;;  %v4854_v43 = vadd.f32 %v1612_v22, %v1452_v34 }
 0x164   : > { %v3226_v52 = vpop.f32.mrf.mxu1  ;;  %v4856_v31 = vpop.f32.mrf.mxu0 }
 0x165   : > { %v1455_v26 = vadd.f32 %v3225_v47, %v4727_v33 }
 0x166   : > { %v3227_v50 = vpop.f32.mrf.mxu1  ;;  %v1644_v19 = vpop.f32.mrf.mxu0 }
 0x167   : > { %v3228_v6 = vadd.f32 %v3227_v50, %v3226_v52  ;;  %v4859_v27 = vadd.f32 %v1615_v16, %v1455_v26 }
 0x168   : > { %v3229_v46 = vpop.f32.mrf.mxu1  ;;  %v4861_v35 = vpop.f32.mrf.mxu0 }
 0x169   : > { %v1460_v62 = vadd.f32 %v3228_v6, %v4717_v49 }
 0x16a   : > { %v3230_v14 = vpop.f32.mrf.mxu1  ;;  %v1647_v9 = vpop.f32.mrf.mxu0 }
 0x16b   : > { %v3231_v41 = vadd.f32 %v3230_v14, %v3229_v46  ;;  %v4864_v22 = vadd.f32 %v3534_v1, %v1460_v62 }
 0x16c   : > { %v3232_v32 = vpop.f32.mrf.mxu1  ;;  %v4866_v56 = vpop.f32.mrf.mxu0 }
 0x16d   : > { %v1463_v33 = vadd.f32 %v3231_v41, %v4725_v59 }
 0x16e   : > { %v3233_v10 = vpop.f32.mrf.mxu1  ;;  %v4869_v55 = vpop.f32.mrf.mxu0 }
 0x16f   : > { %v3234_v16 = vadd.f32 %v3233_v10, %v3232_v32  ;;  %v4871_v8 = vadd.f32 %v3535_v0, %v1463_v33 }
 0x170   : > { %v3235_v21 = vpop.f32.mrf.mxu1  ;;  %v4873_v60 = vpop.f32.mrf.mxu0 }
 0x171   : > { %v1468_v49 = vadd.f32 %v3234_v16, %v4741_v45 }
 0x172   : > { %v3236_v20 = vpop.f32.mrf.mxu1  ;;  %v4876_v34 = vpop.f32.mrf.mxu0 }
 0x173   : > { %v3237_v1 = vadd.f32 %v3236_v20, %v3235_v21  ;;  %v4878_v18 = vadd.f32 %v1628_v30, %v1468_v49 }
 0x174   : > { %v3238_v47 = vpop.f32.mrf.mxu1  ;;  %v4880_v52 = vpop.f32.mrf.mxu0 }
 0x175   : > { %v1471_v59 = vadd.f32 %v3237_v1, %v4745_v57 }
 0x176   : > { %v3239_v26 = vpop.f32.mrf.mxu1  ;;  %v4883_v50 = vpop.f32.mrf.mxu0 }
 0x177   : > { %v3240_v0 = vadd.f32 %v3239_v26, %v3238_v47  ;;  %v4885_v6 = vadd.f32 %v1631_v13, %v1471_v59 }
 0x178   : > { %v3241_v46 = vpop.f32.mrf.mxu1  ;;  %v4887_v62 = vpop.f32.mrf.mxu0 }
 0x179   : > { %v1476_v45 = vadd.f32 %v3240_v0, %v4735_v28 }
 0x17a   : > { %v3242_v14 = vpop.f32.mrf.mxu1  ;;  %v4890_v41 = vpop.f32.mrf.mxu0 }
 0x17b   : > { %v3243_v30 = vadd.f32 %v3242_v14, %v3241_v46  ;;  %v4892_v32 = vadd.f32 %v3538_v51, %v1476_v45 }
 0x17c   : > { %v3244_v33 = vpop.f32.mrf.mxu1  ;;  %v4894_v10 = vpop.f32.mrf.mxu0 }
 0x17d   : > { %v1479_v57 = vadd.f32 %v3243_v30, %v4743_v63 }
 0x17e   : > { %v3245_v16 = vpop.f32.mrf.mxu1  ;;  %v4897_v21 = vpop.f32.mrf.mxu0 }
 0x17f   : > { %v3246_v13 = vadd.f32 %v3245_v16, %v3244_v33  ;;  %v4899_v49 = vadd.f32 %v3539_v42, %v1479_v57 }
 0x180   : > { %v3247_v20 = vpop.f32.mrf.mxu1  ;;  %v4901_v1 = vpop.f32.mrf.mxu0 }
 0x181   : > { %v1484_v28 = vadd.f32 %v3246_v13, %v4757_v11 }
 0x182   : > { %v3248_v47 = vpop.f32.mrf.mxu1  ;;  %v4904_v59 = vpop.f32.mrf.mxu0 }
 0x183   : > { %v3249_v51 = vadd.f32 %v3248_v47, %v3247_v20  ;;  %v4906_v26 = vadd.f32 %v1644_v19, %v1484_v28 }
 0x184   : > { %v3250_v0 = vpop.f32.mrf.mxu1  ;;  %v4908_v46 = vpop.f32.mrf.mxu0 }
 0x185   : > { %5303 = vst [vmem:[#allocation2_spill] sm:$0xff] %v4908_v46  ;;  %v1487_v63 = vadd.f32 %v3249_v51, %v4761_v5 }
 0x186   : > { %v3251_v45 = vpop.f32.mrf.mxu1  ;;  %v4911_v14 = vpop.f32.mrf.mxu0 }
 0x187   : > { %v3252_v42 = vadd.f32 %v3251_v45, %v3250_v0  ;;  %v4913_v30 = vadd.f32 %v1647_v9, %v1487_v63 }
 0x188   : > { %v3253_v33 = vpop.f32.mrf.mxu1  ;;  %v4915_v57 = vpop.f32.mrf.mxu0 }
 0x189   : > { %5304 = vst [vmem:[#allocation3_spill] sm:$0xff] %v4915_v57  ;;  %v1492_v11 = vadd.f32 %v3252_v42, %v4759_v44 }
 0x18a   : > { %v3254_v16 = vpop.f32.mrf.mxu1  ;;  %v4918_v13 = vpop.f32.mrf.mxu0 }
 0x18b   : > { %v3255_v19 = vadd.f32 %v3254_v16, %v3253_v33  ;;  %v4921_v20 = vadd.f32 %v4856_v31, %v1492_v11 }
 0x18c   : > { %v3256_v28 = vpop.f32.mrf.mxu1  ;;  %v4923_v5 = vpop.f32.mrf.mxu0 }
 0x18d   : > { %v1495_v47 = vadd.f32 %v3255_v19, %v4769_v23 }
 0x18e   : > { %v3257_v51 = vpop.f32.mrf.mxu1  ;;  %v4926_v9 = vpop.f32.mrf.mxu0 }
 0x18f   : > { %v3258_v0 = vadd.f32 %v3257_v51, %v3256_v28  ;;  %v4929_v63 = vadd.f32 %v4861_v35, %v1495_v47 }
 0x190   : > { %v3259_v44 = vpop.f32.mrf.mxu1  ;;  %v4931_v45 = vpop.f32.mrf.mxu0 }
 0x191   : > { %v1500_v42 = vadd.f32 %v3258_v0, %v4775_v61 }
 0x192   : > { %v3260_v33 = vpop.f32.mrf.mxu1  ;;  %v4934_v31 = vpop.f32.mrf.mxu0 }
 0x193   : > { %v3261_v11 = vadd.f32 %v3260_v33, %v3259_v44  ;;  %v4937_v16 = vadd.f32 %v4869_v55, %v1500_v42 }
 0x194   : > { %v3262_v23 = vpop.f32.mrf.mxu1  ;;  %v4939_v19 = vpop.f32.mrf.mxu0 }
 0x195   : > { %5305 = vst [vmem:[#allocation4_spill] sm:$0xff] %v4937_v16  ;;  %v1503_v28 = vadd.f32 %v3261_v11, %v4783_v12 }
 0x196   : > { %v3263_v51 = vpop.f32.mrf.mxu1  ;;  %v4942_v35 = vpop.f32.mrf.mxu0 }
 0x197   : > { %v3264_v47 = vadd.f32 %v3263_v51, %v3262_v23  ;;  %v4945_v57 = vadd.f32 %v4876_v34, %v1503_v28 }
 0x198   : > { %v3265_v61 = vpop.f32.mrf.mxu1  ;;  %v4947_v0 = vpop.f32.mrf.mxu0 }
 0x199   : > { %5306 = vst [vmem:[#allocation5_spill] sm:$0xff] %v4945_v57  ;;  %v1508_v44 = vadd.f32 %v3264_v47, %v4789_v40 }
 0x19a   : > { %v3266_v33 = vpop.f32.mrf.mxu1  ;;  %v4950_v55 = vpop.f32.mrf.mxu0 }
 0x19b   : > { %v3267_v42 = vadd.f32 %v3266_v33, %v3265_v61  ;;  %v4953_v46 = vadd.f32 %v4866_v56, %v1508_v44 }
 0x19c   : > { %v3268_v12 = vpop.f32.mrf.mxu1  ;;  %v4955_v11 = vpop.f32.mrf.mxu0 }
 0x19d   : > { %v1511_v23 = vadd.f32 %v3267_v42, %v4797_v53 }
 0x19e   : > { %v3269_v51 = vpop.f32.mrf.mxu1  ;;  %v4958_v34 = vpop.f32.mrf.mxu0 }
 0x19f   : > { %v3270_v28 = vadd.f32 %v3269_v51, %v3268_v12  ;;  %v4961_v57 = vadd.f32 %v4873_v60, %v1511_v23 }
 0x1a0   : > { %v3271_v40 = vpop.f32.mrf.mxu1  ;;  %v4963_v47 = vpop.f32.mrf.mxu0 }
 0x1a1   : > { %5307 = vst [vmem:[#allocation6_spill] sm:$0xff] %v4961_v57  ;;  %v1516_v61 = vadd.f32 %v3270_v28, %v4809_v25 }
 0x1a2   : > { %v3272_v33 = vpop.f32.mrf.mxu1  ;;  %v4966_v56 = vpop.f32.mrf.mxu0 }
 0x1a3   : > { %v3273_v44 = vadd.f32 %v3272_v33, %v3271_v40  ;;  %v4969_v16 = vadd.f32 %v4883_v50, %v1516_v61 }
 0x1a4   : > { %v3274_v53 = vpop.f32.mrf.mxu1  ;;  %v4971_v42 = vpop.f32.mrf.mxu0 }
 0x1a5   : > { %5308 = vst [vmem:[#allocation7_spill] sm:$0xff] %v4969_v16  ;;  %v1519_v12 = vadd.f32 %v3273_v44, %v4823_v24 }
 0x1a6   : > { %v3275_v51 = vpop.f32.mrf.mxu1  ;;  %v4974_v60 = vpop.f32.mrf.mxu0 }
 0x1a7   : > { %v3276_v23 = vadd.f32 %v3275_v51, %v3274_v53  ;;  %v4977_v57 = vadd.f32 %v4890_v41, %v1519_v12 }
 0x1a8   : > { %v3277_v25 = vpop.f32.mrf.mxu1  ;;  %v4979_v28 = vpop.f32.mrf.mxu0 }
 0x1a9   : > { %5309 = vst [vmem:[#allocation8_spill] sm:$0xff] %v4977_v57  ;;  %v1524_v40 = vadd.f32 %v3276_v23, %v4831_v54 }
 0x1aa   : > { %v3278_v33 = vpop.f32.mrf.mxu1  ;;  %v4982_v50 = vpop.f32.mrf.mxu0 }
 0x1ab   : > { %v3279_v61 = vadd.f32 %v3278_v33, %v3277_v25  ;;  %v4985_v16 = vadd.f32 %v4880_v52, %v1524_v40 }
 0x1ac   : > { %v3280_v24 = vpop.f32.mrf.mxu1  ;;  %v4987_v44 = vpop.f32.mrf.mxu0 }
 0x1ad   : > { %5310 = vst [vmem:[#allocation9_spill] sm:$0xff] %v4985_v16  ;;  %v1527_v53 = vadd.f32 %v3279_v61, %v4839_v2 }
 0x1ae   : > { %v3281_v51 = vpop.f32.mrf.mxu1  ;;  %v4990_v41 = vpop.f32.mrf.mxu0 }
 0x1af   : > { %v3282_v12 = vadd.f32 %v3281_v51, %v3280_v24  ;;  %v4993_v57 = vadd.f32 %v4887_v62, %v1527_v53 }
 0x1b0   : > { %v3283_v54 = vpop.f32.mrf.mxu1  ;;  %v4995_v23 = vpop.f32.mrf.mxu0 }
 0x1b1   : > { %5311 = vst [vmem:[#allocation10_spill] sm:$0xff] %v4993_v57  ;;  %v1532_v25 = vadd.f32 %v3282_v12, %v4807_v15 }
 0x1b2   : > { %v3284_v33 = vpop.f32.mrf.mxu1  ;;  %v4998_v52 = vpop.f32.mrf.mxu0 }
 0x1b3   : > { %v3285_v40 = vadd.f32 %v3284_v33, %v3283_v54  ;;  %v5001_v16 = vadd.f32 %v4897_v21, %v1532_v25 }
 0x1b4   : > { %v3286_v2 = vpop.f32.mrf.mxu1  ;;  %v5003_v61 = vpop.f32.mrf.mxu0 }
 0x1b5   : > { %5312 = vst [vmem:[#allocation11_spill] sm:$0xff] %v5001_v16  ;;  %v1535_v24 = vadd.f32 %v3285_v40, %v4815_v4 }
 0x1b6   : > { %v3287_v51 = vpop.f32.mrf.mxu1  ;;  %v5006_v62 = vpop.f32.mrf.mxu0 }
 0x1b7   : > { %v3288_v53 = vadd.f32 %v3287_v51, %v3286_v2  ;;  %v5009_v57 = vadd.f32 %v4904_v59, %v1535_v24 }
 0x1b8   : > { %v3289_v15 = vpop.f32.mrf.mxu1  ;;  %v5011_v12 = vpop.f32.mrf.mxu0 }
 0x1b9   : > { %5313 = vst [vmem:[#allocation12_spill] sm:$0xff] %v5009_v57  ;;  %v1540_v54 = vadd.f32 %v3288_v53, %v4800_v38 }
 0x1ba   : > { %v3290_v33 = vpop.f32.mrf.mxu1  ;;  %v5014_v21 = vpop.f32.mrf.mxu0 }
 0x1bb   : > { %v3291_v25 = vadd.f32 %v3290_v33, %v3289_v15  ;;  %v5017_v16 = vadd.f32 %v4894_v10, %v1540_v54 }
 0x1bc   : > { %v3292_v4 = vpop.f32.mrf.mxu1  ;;  %v5019_v40 = vpop.f32.mrf.mxu0 }
 0x1bd   : > { %5314 = vst [vmem:[#allocation13_spill] sm:$0xff] %v5017_v16  ;;  %v1543_v2 = vadd.f32 %v3291_v25, %v4812_v39 }
 0x1be   : > { %v3293_v51 = vpop.f32.mrf.mxu1  ;;  %v5022_v59 = vpop.f32.mrf.mxu0 }
 0x1bf   : > { %v3294_v24 = vadd.f32 %v3293_v51, %v3292_v4  ;;  %v5025_v57 = vadd.f32 %v4901_v1, %v1543_v2 }
 0x1c0   : > { %v3295_v38 = vpop.f32.mrf.mxu1  ;;  %v5027_v53 = vpop.f32.mrf.mxu0 }
 0x1c1   : > { %5315 = vst [vmem:[#allocation14_spill] sm:$0xff] %v5025_v57  ;;  %v1548_v15 = vadd.f32 %v3294_v24, %v4829_v29 }
 0x1c2   : > { %v3296_v33 = vpop.f32.mrf.mxu1  ;;  %v5030_v10 = vpop.f32.mrf.mxu0 }
 0x1c3   : > { %v3297_v54 = vadd.f32 %v3296_v33, %v3295_v38  ;;  %v5033_v16 = vadd.f32 %v4911_v14, %v1548_v15 }
 0x1c4   : > { %v3298_v39 = vpop.f32.mrf.mxu1  ;;  %v5035_v25 = vpop.f32.mrf.mxu0 }
 0x1c5   : > { %v1551_v4 = vadd.f32 %v3297_v54, %v4837_v7  ;;  %v3352_v7 = vadd.f32 %v4942_v35, %v4939_v19  ;;  %v3355_v19 = vadd.f32 %v4950_v55, %v4947_v0  ;;  %v3364_v55 = vadd.f32 %v4974_v60, %v4971_v42 }
 0x1c6   : > { %v3299_v51 = vpop.f32.mrf.mxu1  ;;  %v5038_v1 = vpop.f32.mrf.mxu0 }
 0x1c7   : > { %v3300_v2 = vadd.f32 %v3299_v51, %v3298_v39  ;;  %v5041_v57 = vadd.f32 %v4918_v13, %v1551_v4  ;;  %v3346_v13 = vadd.f32 %v4926_v9, %v4923_v5 }
 0x1c8   : > { %v3301_v29 = vpop.f32.mrf.mxu1  ;;  %v5043_v24 = vpop.f32.mrf.mxu0 }
 0x1c9   : > { %5316 = vst [vmem:[#allocation15_spill] sm:$0xff] %v5041_v57  ;;  %v5046_v38 = vadd.f32 %v3300_v2, %v4826_v36  ;;  %v5062_v36 = vld [vmem:[%s5260_s4] ss:$0 sm:$0xff] }
 0x1ca   : > { %v3302_v14 = vpop.f32.mrf.mxu1  ;;  %v5048_v15 = vpop.f32.mrf.mxu0 }
 0x1cb   : > { %v3303_v33 = vadd.f32 %v3302_v14, %v3301_v29 }
 0x1cc   : > { %v5052_v54 = vpop.f32.mrf.mxu0  ;;  %v3578_v39 = vpop.f32.mrf.mxu1 }
 0x1cd   : > { %v5057_v4 = vadd.f32 %v3303_v33, %v4834_v3  ;;  %v2120_v51 = vadd.f32 %v3578_v39, %v3352_v7 }
 0x1ce   : > { %v5064_v2 = vpop.f32.mrf.mxu0  ;;  %v2111_v57 = vpop.f32.mrf.mxu1 }
 0x1cf   : > { %v2240_v35 = vadd.f32 %v2120_v51, %v4848_v37  ;;  %v2112_v29 = vadd.f32 %v3346_v13, %v2111_v57  ;;  %v3349_v37 = vadd.f32 %v4934_v31, %v4931_v45 }
 0x1d0   : > { %v5076_v3 = vpop.f32.mrf.mxu0  ;;  %v3579_v5 = vpop.f32.mrf.mxu1 }
 0x1d1   : > { %v2279_v9 = vadd.f32 %v5062_v36, %v2240_v35  ;;  %v2238_v14 = vadd.f32 %v2112_v29, %v4842_v58  ;;  %v2123_v7 = vadd.f32 %v3579_v5, %v3355_v19  ;;  %v3358_v19 = vadd.f32 %v4958_v34, %v4955_v11 }
 0x1d2   : > { %v5082_v57 = vpop.f32.mrf.mxu0  ;;  %v2114_v0 = vpop.f32.mrf.mxu1 }
 0x1d3   : > { %2311 = vst [vmem:[%s5074_s9 + $0x10] sm:$0xff] %v2279_v9  ;;  %v2277_v33 = vadd.f32 %v5062_v36, %v2238_v14  ;;  %v2241_v39 = vadd.f32 %v2123_v7, %v4851_v48  ;;  %v2115_v13 = vadd.f32 %v3349_v37, %v2114_v0  ;;  %v3367_v48 = vadd.f32 %v4982_v50, %v4979_v28 }
 0x1d4   : > { %v5089_v51 = vpop.f32.mrf.mxu0  ;;  %v3582_v58 = vpop.f32.mrf.mxu1  ;;  %v3361_v0 = vadd.f32 %v4966_v56, %v4963_v47 }
 0x1d5   : > { %2309 = vst [vmem:[%s5074_s9] sm:$0xff] %v2277_v33  ;;  %v2280_v45 = vadd.f32 %v5062_v36, %v2241_v39  ;;  %v2136_v31 = vadd.f32 %v3582_v58, %v3364_v55  ;;  %v2239_v35 = vadd.f32 %v2115_v13, %v4845_v17  ;;  %v2379_v55 = vmul.f32 %v2277_v33, %v2277_v33 }
 0x1d6   : > { %v5096_v42 = vpop.f32.mrf.mxu0  ;;  %v2127_v60 = vpop.f32.mrf.mxu1  ;;  %v3376_v13 = vadd.f32 %v5006_v62, %v5003_v61 }
 0x1d7   : > { %2312 = vst [vmem:[%s5074_s9 + $0x18] sm:$0xff] %v2280_v45  ;;  %v2244_v29 = vadd.f32 %v2136_v31, %v4864_v22  ;;  %v2128_v5 = vadd.f32 %v3358_v19, %v2127_v60  ;;  %v2278_v11 = vadd.f32 %v5062_v36, %v2239_v35  ;;  %v2381_v19 = vmul.f32 %v2279_v9, %v2279_v9 }
 0x1d8   : > { %v5103_v34 = vpop.f32.mrf.mxu0  ;;  %v3583_v14 = vpop.f32.mrf.mxu1  ;;  %v3370_v60 = vadd.f32 %v4990_v41, %v4987_v44  ;;  %v2382_v62 = vmul.f32 %v2280_v45, %v2280_v45 }
 0x1d9   : > { %v2283_v7 = vadd.f32 %v5062_v36, %v2244_v29  ;;  %v2242_v17 = vadd.f32 %v2128_v5, %v4854_v43  ;;  %v2139_v37 = vadd.f32 %v3583_v14, %v3367_v48  ;;  %2310 = vst [vmem:[%s5074_s9 + $0x8] sm:$0xff] %v2278_v11  ;;  %v2341_v28 = vadd.f32 %v2278_v11, %v2277_v33 }
 0x1da   : > { %v2380_v22 = vmul.f32 %v2278_v11, %v2278_v11  ;;  %v5110_v50 = vpop.f32.mrf.mxu0  ;;  %v2130_v39 = vpop.f32.mrf.mxu1  ;;  %v3379_v14 = vadd.f32 %v5014_v21, %v5011_v12  ;;  %v3373_v12 = vadd.f32 %v4998_v52, %v4995_v23 }
 0x1db   : > { %2315 = vst [vmem:[%s5074_s9 + $0x30] sm:$0xff] %v2283_v7  ;;  %v2281_v58 = vadd.f32 %v5062_v36, %v2242_v17  ;;  %v2245_v43 = vadd.f32 %v2139_v37, %v4871_v8  ;;  %v2342_v31 = vadd.f32 %v2341_v28, %v2279_v9  ;;  %v2131_v56 = vadd.f32 %v3361_v0, %v2130_v39 }
 0x1dc   : > { %v2411_v47 = vadd.f32 %v2380_v22, %v2379_v55  ;;  %v5117_v35 = vpop.f32.mrf.mxu0  ;;  %v3586_v33 = vpop.f32.mrf.mxu1 }
 0x1dd   : > { %2313 = vst [vmem:[%s5074_s9 + $0x20] sm:$0xff] %v2281_v58  ;;  %v2284_v48 = vadd.f32 %v5062_v36, %v2245_v43  ;;  %v2152_v61 = vadd.f32 %v3586_v33, %v3376_v13  ;;  %v2343_v5 = vadd.f32 %v2342_v31, %v2280_v45  ;;  %v2243_v8 = vadd.f32 %v2131_v56, %v4859_v27 }
 0x1de   : > { %v2412_v29 = vadd.f32 %v2411_v47, %v2381_v19  ;;  %v5124_v11 = vpop.f32.mrf.mxu0  ;;  %v2143_v9 = vpop.f32.mrf.mxu1  ;;  %v2383_v37 = vmul.f32 %v2281_v58, %v2281_v58  ;;  %v3388_v19 = vadd.f32 %v5038_v1, %v5035_v25  ;;  %v2385_v47 = vmul.f32 %v2283_v7, %v2283_v7 }
 0x1df   : > { %2316 = vst [vmem:[%s5074_s9 + $0x38] sm:$0xff] %v2284_v48  ;;  %v2248_v17 = vadd.f32 %v2152_v61, %v4892_v32  ;;  %v2144_v44 = vadd.f32 %v3370_v60, %v2143_v9  ;;  %v2344_v41 = vadd.f32 %v2343_v5, %v2281_v58  ;;  %v2282_v55 = vadd.f32 %v5062_v36, %v2243_v8 }
 0x1e0   : > { %v2413_v0 = vadd.f32 %v2412_v29, %v2382_v62  ;;  %v5131_v45 = vpop.f32.mrf.mxu0  ;;  %v3587_v27 = vpop.f32.mrf.mxu1  ;;  %v3382_v61 = vadd.f32 %v5022_v59, %v5019_v40  ;;  %v2386_v1 = vmul.f32 %v2284_v48, %v2284_v48  ;;  %v3391_v9 = vadd.f32 %v5048_v15, %v5043_v24 }
 0x1e1   : > { %v2287_v28 = vadd.f32 %v5062_v36, %v2248_v17  ;;  %v2246_v22 = vadd.f32 %v2144_v44, %v4878_v18  ;;  %v2155_v39 = vadd.f32 %v3587_v27, %v3379_v14  ;;  %2314 = vst [vmem:[%s5074_s9 + $0x28] sm:$0xff] %v2282_v55  ;;  %v2345_v32 = vadd.f32 %v2344_v41, %v2282_v55 }
 0x1e2   : > { %v2414_v21 = vadd.f32 %v2413_v0, %v2383_v37  ;;  %v2384_v13 = vmul.f32 %v2282_v55, %v2282_v55  ;;  %v5138_v58 = vpop.f32.mrf.mxu0  ;;  %v2146_v43 = vpop.f32.mrf.mxu1  ;;  %v3385_v24 = vadd.f32 %v5030_v10, %v5027_v53 }
 0x1e3   : > { %2319 = vst [vmem:[%s5074_s9 + $0x50] sm:$0xff] %v2287_v28  ;;  %v2285_v31 = vadd.f32 %v5062_v36, %v2246_v22  ;;  %v2249_v18 = vadd.f32 %v2155_v39, %v4899_v49  ;;  %v2346_v56 = vadd.f32 %v2345_v32, %v2283_v7  ;;  %v2147_v52 = vadd.f32 %v3373_v12, %v2146_v43 }
 0x1e4   : > { %v2415_v23 = vadd.f32 %v2414_v21, %v2384_v13  ;;  %v5145_v33 = vpop.f32.mrf.mxu0  ;;  %v3590_v60 = vpop.f32.mrf.mxu1  ;;  %v3400_v12 = vadd.f32 %v5096_v42, %v5089_v51 }
 0x1e5   : > { %2317 = vst [vmem:[%s5074_s9 + $0x40] sm:$0xff] %v2285_v31  ;;  %v2288_v62 = vadd.f32 %v5062_v36, %v2249_v18  ;;  %v2168_v25 = vadd.f32 %v3590_v60, %v3388_v19  ;;  %v2347_v5 = vadd.f32 %v2346_v56, %v2284_v48  ;;  %v2247_v49 = vadd.f32 %v2147_v52, %v4885_v6 }
 0x1e6   : > { %v2416_v29 = vadd.f32 %v2415_v23, %v2385_v47  ;;  %v3411_v8 = vpop.f32.mrf.mxu0  ;;  %v2159_v7 = vpop.f32.mrf.mxu1  ;;  %v2387_v59 = vmul.f32 %v2285_v31, %v2285_v31  ;;  %v3403_v52 = vadd.f32 %v5110_v50, %v5103_v34  ;;  %v3397_v34 = vadd.f32 %v5082_v57, %v5076_v3 }
 0x1e7   : > { %2320 = vst [vmem:[%s5074_s9 + $0x58] sm:$0xff] %v2288_v62  ;;  %v2252_v14 = vadd.f32 %v2168_v25, %v4921_v20  ;;  %v2160_v17 = vadd.f32 %v3382_v61, %v2159_v7  ;;  %v2348_v40 = vadd.f32 %v2347_v5, %v2285_v31  ;;  %v2286_v41 = vadd.f32 %v5062_v36, %v2247_v49  ;;  %v5317_v5 = vld [vmem:[#allocation4_spill] sm:$0xff] }
 0x1e8   : > { %v2417_v44 = vadd.f32 %v2416_v29, %v2386_v1  ;;  %v5157_v37 = vpop.f32.mrf.mxu0  ;;  %v3591_v48 = vpop.f32.mrf.mxu1  ;;  %v3394_v31 = vadd.f32 %v5064_v2, %v5052_v54  ;;  %v2390_v42 = vmul.f32 %v2288_v62, %v2288_v62 }
 0x1e9   : > { %v2291_v6 = vadd.f32 %v5062_v36, %v2252_v14  ;;  %v2250_v0 = vadd.f32 %v2160_v17, %v4906_v26  ;;  %v2171_v55 = vadd.f32 %v3591_v48, %v3391_v9  ;;  %2318 = vst [vmem:[%s5074_s9 + $0x48] sm:$0xff] %v2286_v41  ;;  %v2349_v20 = vadd.f32 %v2348_v40, %v2286_v41 }
 0x1ea   : > { %v2418_v15 = vadd.f32 %v2417_v44, %v2387_v59  ;;  %v2388_v27 = vmul.f32 %v2286_v41, %v2286_v41  ;;  %v3414_v22 = vpop.f32.mrf.mxu0  ;;  %v2162_v39 = vpop.f32.mrf.mxu1  ;;  %v2389_v26 = vmul.f32 %v2287_v28, %v2287_v28  ;;  %v3412_v40 = vadd.f32 %v3411_v8, %v5145_v33  ;;  %v5318_v44 = vld [vmem:[#allocation6_spill] sm:$0xff] }
 0x1eb   : > { %2323 = vst [vmem:[%s5074_s9 + $0x70] sm:$0xff] %v2291_v6  ;;  %v2289_v21 = vadd.f32 %v5062_v36, %v2250_v0  ;;  %v2253_v32 = vadd.f32 %v2171_v55, %v4929_v63  ;;  %v2350_v13 = vadd.f32 %v2349_v20, %v2287_v28  ;;  %v2163_v53 = vadd.f32 %v3385_v24, %v2162_v39 }
 0x1ec   : > { %v2419_v43 = vadd.f32 %v2418_v15, %v2388_v27  ;;  %v5169_v10 = vpop.f32.mrf.mxu0  ;;  %v3594_v19 = vpop.f32.mrf.mxu1  ;;  %v2393_v48 = vmul.f32 %v2291_v6, %v2291_v6  ;;  %v3406_v15 = vadd.f32 %v5124_v11, %v5117_v35 }
 0x1ed   : > { %2321 = vst [vmem:[%s5074_s9 + $0x60] sm:$0xff] %v2289_v21  ;;  %v2292_v18 = vadd.f32 %v5062_v36, %v2253_v32  ;;  %v2184_v51 = vadd.f32 %v3594_v19, %v3400_v12  ;;  %v2351_v56 = vadd.f32 %v2350_v13, %v2288_v62  ;;  %v2251_v63 = vadd.f32 %v2163_v53, %v4913_v30  ;;  %v5319_v12 = vld [vmem:[#allocation5_spill] sm:$0xff] }
 0x1ee   : > { %v2420_v47 = vadd.f32 %v2419_v43, %v2389_v26  ;;  %v5176_v23 = vpop.f32.mrf.mxu0  ;;  %v2175_v28 = vpop.f32.mrf.mxu1  ;;  %v2391_v61 = vmul.f32 %v2289_v21, %v2289_v21  ;;  %v5320_v13 = vld [vmem:[#allocation9_spill] sm:$0xff] }
 0x1ef   : > { %2324 = vst [vmem:[%s5074_s9 + $0x78] sm:$0xff] %v2292_v18  ;;  %v2256_v60 = vadd.f32 %v2184_v51, %v4953_v46  ;;  %v2176_v54 = vadd.f32 %v3394_v31, %v2175_v28  ;;  %v2352_v2 = vadd.f32 %v2351_v56, %v2289_v21  ;;  %v2290_v1 = vadd.f32 %v5062_v36, %v2251_v63 }
 0x1f0   : > { %v2421_v25 = vadd.f32 %v2420_v47, %v2390_v42  ;;  %v5183_v62 = vpop.f32.mrf.mxu0  ;;  %v3595_v30 = vpop.f32.mrf.mxu1  ;;  %v2394_v33 = vmul.f32 %v2292_v18, %v2292_v18  ;;  %v5321_v47 = vld [vmem:[#allocation7_spill] sm:$0xff] }
 0x1f1   : > { %v2295_v29 = vadd.f32 %v5062_v36, %v2256_v60  ;;  %v2254_v49 = vadd.f32 %v2176_v54, %v5317_v5  ;;  %v2187_v7 = vadd.f32 %v3595_v30, %v3403_v52  ;;  %2322 = vst [vmem:[%s5074_s9 + $0x68] sm:$0xff] %v2290_v1  ;;  %v2353_v46 = vadd.f32 %v2352_v2, %v2290_v1 }
 0x1f2   : > { %v2422_v50 = vadd.f32 %v2421_v25, %v2391_v61  ;;  %v2392_v9 = vmul.f32 %v2290_v1, %v2290_v1  ;;  %v5190_v14 = vpop.f32.mrf.mxu0  ;;  %v2178_v17 = vpop.f32.mrf.mxu1  ;;  %v5322_v25 = vld [vmem:[#allocation10_spill] sm:$0xff] }
 0x1f3   : > { %2327 = vst [vmem:[%s5074_s9 + $0x90] sm:$0xff] %v2295_v29  ;;  %v2293_v59 = vadd.f32 %v5062_v36, %v2254_v49  ;;  %v2257_v41 = vadd.f32 %v2187_v7, %v5318_v44  ;;  %v2354_v0 = vadd.f32 %v2353_v46, %v2291_v6  ;;  %v2179_v3 = vadd.f32 %v3397_v34, %v2178_v17 }
 0x1f4   : > { %v2423_v55 = vadd.f32 %v2422_v50, %v2392_v9  ;;  %v3422_v57 = vpop.f32.mrf.mxu0  ;;  %v3598_v24 = vpop.f32.mrf.mxu1  ;;  %v3415_v6 = vadd.f32 %v3414_v22, %v5157_v37  ;;  %v3409_v37 = vadd.f32 %v5138_v58, %v5131_v45  ;;  %v2397_v30 = vmul.f32 %v2295_v29, %v2295_v29 }
 0x1f5   : > { %2325 = vst [vmem:[%s5074_s9 + $0x80] sm:$0xff] %v2293_v59  ;;  %v2296_v20 = vadd.f32 %v5062_v36, %v2257_v41  ;;  %v2200_v27 = vadd.f32 %v3598_v24, %v3412_v40  ;;  %v2355_v39 = vadd.f32 %v2354_v0, %v2292_v18  ;;  %v2255_v21 = vadd.f32 %v2179_v3, %v5319_v12  ;;  %v5324_v0 = vld [vmem:[#allocation13_spill] sm:$0xff] }
 0x1f6   : > { %v2424_v8 = vadd.f32 %v2423_v55, %v2393_v48  ;;  %v3423_v32 = vpop.f32.mrf.mxu0  ;;  %v2191_v26 = vpop.f32.mrf.mxu1  ;;  %v2395_v35 = vmul.f32 %v2293_v59, %v2293_v59  ;;  %v3418_v58 = vadd.f32 %v5176_v23, %v5169_v10  ;;  %v3421_v12 = vadd.f32 %v5190_v14, %v5183_v62 }
 0x1f7   : > { %2328 = vst [vmem:[%s5074_s9 + $0x98] sm:$0xff] %v2296_v20  ;;  %v2260_v43 = vadd.f32 %v2200_v27, %v5320_v13  ;;  %v2192_v53 = vadd.f32 %v3406_v15, %v2191_v26  ;;  %v2356_v19 = vadd.f32 %v2355_v39, %v2293_v59  ;;  %v2294_v31 = vadd.f32 %v5062_v36, %v2255_v21  ;;  %v5323_v59 = vld [vmem:[#allocation8_spill] sm:$0xff] }
 0x1f8   : > { %v2425_v11 = vadd.f32 %v2424_v8, %v2394_v33  ;;  %v3425_v51 = vpop.f32.mrf.mxu0  ;;  %v3599_v42 = vpop.f32.mrf.mxu1  ;;  %v3424_v2 = vadd.f32 %v3423_v32, %v3422_v57  ;;  %v2398_v9 = vmul.f32 %v2296_v20, %v2296_v20  ;;  %v5325_v33 = vld [vmem:[#allocation11_spill] sm:$0xff] }
 0x1f9   : > { %v2299_v18 = vadd.f32 %v5062_v36, %v2260_v43  ;;  %v2258_v56 = vadd.f32 %v2192_v53, %v5321_v47  ;;  %v2203_v63 = vadd.f32 %v3599_v42, %v3415_v6  ;;  %2326 = vst [vmem:[%s5074_s9 + $0x88] sm:$0xff] %v2294_v31  ;;  %v2357_v28 = vadd.f32 %v2356_v19, %v2294_v31  ;;  %v5326_v53 = vld [vmem:[#allocation14_spill] sm:$0xff] }
 0x1fa   : > { %v2426_v22 = vadd.f32 %v2425_v11, %v2395_v35  ;;  %v2396_v52 = vmul.f32 %v2294_v31, %v2294_v31  ;;  %v3426_v60 = vpop.f32.mrf.mxu0  ;;  %v2194_v54 = vpop.f32.mrf.mxu1 }
 0x1fb   : > { %2331 = vst [vmem:[%s5074_s9 + $0xb0] sm:$0xff] %v2299_v18  ;;  %v2297_v61 = vadd.f32 %v5062_v36, %v2258_v56  ;;  %v2261_v1 = vadd.f32 %v2203_v63, %v5322_v25  ;;  %v2358_v5 = vadd.f32 %v2357_v28, %v2295_v29  ;;  %v2195_v7 = vadd.f32 %v3409_v37, %v2194_v54 }
 0x1fc   : > { %v2427_v49 = vadd.f32 %v2426_v22, %v2396_v52  ;;  %v3428_v34 = vpop.f32.mrf.mxu0  ;;  %v3602_v45 = vpop.f32.mrf.mxu1  ;;  %v3427_v29 = vadd.f32 %v3426_v60, %v3425_v51  ;;  %v2401_v35 = vmul.f32 %v2299_v18, %v2299_v18  ;;  %v5327_v22 = vld [vmem:[#allocation12_spill] sm:$0xff] }
 0x1fd   : > { %2329 = vst [vmem:[%s5074_s9 + $0xa0] sm:$0xff] %v2297_v61  ;;  %v2300_v50 = vadd.f32 %v5062_v36, %v2261_v1  ;;  %v2216_v46 = vadd.f32 %v3602_v45, %v3424_v2  ;;  %v2359_v40 = vadd.f32 %v2358_v5, %v2296_v20  ;;  %v2259_v44 = vadd.f32 %v2195_v7, %v5323_v59 }
 0x1fe   : > { %v2428_v17 = vadd.f32 %v2427_v49, %v2397_v30  ;;  %v3429_v41 = vpop.f32.mrf.mxu0  ;;  %v2207_v48 = vpop.f32.mrf.mxu1  ;;  %v2399_v10 = vmul.f32 %v2297_v61, %v2297_v61  ;;  %v5328_v49 = vld [vmem:[#allocation2_spill] sm:$0xff] }
 0x1ff   : > { %2332 = vst [vmem:[%s5074_s9 + $0xb8] sm:$0xff] %v2300_v50  ;;  %v2264_v55 = vadd.f32 %v2216_v46, %v5324_v0  ;;  %v2208_v3 = vadd.f32 %v3418_v58, %v2207_v48  ;;  %v2360_v57 = vadd.f32 %v2359_v40, %v2297_v61  ;;  %v2298_v24 = vadd.f32 %v5062_v36, %v2259_v44 }
 0x200   : > { %v2429_v23 = vadd.f32 %v2428_v17, %v2398_v9  ;;  %v3431_v15 = vpop.f32.mrf.mxu0  ;;  %v3603_v27 = vpop.f32.mrf.mxu1  ;;  %v3430_v62 = vadd.f32 %v3429_v41, %v3428_v34  ;;  %v2402_v56 = vmul.f32 %v2300_v50, %v2300_v50  ;;  %v1717_v7 = vadd.f32 %v5328_v49, %v5046_v38 }
 0x201   : > { %v2303_v20 = vadd.f32 %v5062_v36, %v2264_v55  ;;  %v2262_v8 = vadd.f32 %v2208_v3, %v5325_v33  ;;  %v2219_v39 = vadd.f32 %v3603_v27, %v3427_v29  ;;  %2330 = vst [vmem:[%s5074_s9 + $0xa8] sm:$0xff] %v2298_v24  ;;  %v2361_v32 = vadd.f32 %v2360_v57, %v2298_v24  ;;  %v5329_v55 = vld [vmem:[#allocation3_spill] sm:$0xff] }
 0x202   : > { %v2430_v21 = vadd.f32 %v2429_v23, %v2399_v10  ;;  %v2400_v26 = vmul.f32 %v2298_v24, %v2298_v24  ;;  %v3432_v6 = vpop.f32.mrf.mxu0  ;;  %v2210_v13 = vpop.f32.mrf.mxu1  ;;  %v5330_v10 = vld [vmem:[#allocation15_spill] sm:$0xff] }
 0x203   : > { %2335 = vst [vmem:[%s5074_s9 + $0xd0] sm:$0xff] %v2303_v20  ;;  %v2301_v43 = vadd.f32 %v5062_v36, %v2262_v8  ;;  %v2265_v19 = vadd.f32 %v2219_v39, %v5326_v53  ;;  %v2362_v11 = vadd.f32 %v2361_v32, %v2299_v18  ;;  %v2211_v51 = vadd.f32 %v3421_v12, %v2210_v13 }
 0x204   : > { %v2431_v31 = vadd.f32 %v2430_v21, %v2400_v26  ;;  %v3434_v42 = vpop.f32.mrf.mxu0  ;;  %v3606_v47 = vpop.f32.mrf.mxu1  ;;  %v3433_v34 = vadd.f32 %v3432_v6, %v3431_v15  ;;  %v2405_v29 = vmul.f32 %v2303_v20, %v2303_v20 }
 0x205   : > { %2333 = vst [vmem:[%s5074_s9 + $0xc0] sm:$0xff] %v2301_v43  ;;  %v2304_v14 = vadd.f32 %v5062_v36, %v2265_v19  ;;  %v2363_v37 = vadd.f32 %v2362_v11, %v2300_v50  ;;  %v2263_v28 = vadd.f32 %v2211_v51, %v5327_v22  ;;  %v2403_v61 = vmul.f32 %v2301_v43, %v2301_v43 }
 0x206   : > { %v2432_v63 = vadd.f32 %v2431_v31, %v2401_v35  ;;  %v3435_v52 = vpop.f32.mrf.mxu0  ;;  %v2223_v60 = vpop.f32.mrf.mxu1 }
 0x207   : > { %2336 = vst [vmem:[%s5074_s9 + $0xd8] sm:$0xff] %v2304_v14  ;;  %v3436_v54 = vadd.f32 %v3435_v52, %v3434_v42  ;;  %v2224_v2 = vadd.f32 %v3430_v62, %v2223_v60  ;;  %v2364_v18 = vadd.f32 %v2363_v37, %v2301_v43  ;;  %v2302_v1 = vadd.f32 %v5062_v36, %v2263_v28 }
 0x208   : > { %v2433_v25 = vadd.f32 %v2432_v63, %v2402_v56  ;;  %v3437_v30 = vpop.f32.mrf.mxu0  ;;  %v3607_v5 = vpop.f32.mrf.mxu1  ;;  %v2406_v24 = vmul.f32 %v2304_v14, %v2304_v14 }
 0x209   : > { %v2232_v45 = vadd.f32 %v3606_v47, %v3436_v54  ;;  %v2266_v58 = vadd.f32 %v2224_v2, %v5033_v16  ;;  %2334 = vst [vmem:[%s5074_s9 + $0xc8] sm:$0xff] %v2302_v1  ;;  %v2365_v46 = vadd.f32 %v2364_v18, %v2302_v1  ;;  %v2404_v9 = vmul.f32 %v2302_v1, %v2302_v1 }
 0x20a   : > { %v2434_v50 = vadd.f32 %v2433_v25, %v2403_v61  ;;  %v3438_v17 = vpop.f32.mrf.mxu0  ;;  %v2226_v40 = vpop.f32.mrf.mxu1  ;;  %v1720_v16 = vadd.f32 %v5329_v55, %v5057_v4 }
 0x20b   : > { %v2268_v59 = vadd.f32 %v2232_v45, %v1717_v7  ;;  %v2305_v44 = vadd.f32 %v5062_v36, %v2266_v58  ;;  %v3439_v41 = vadd.f32 %v3438_v17, %v3437_v30  ;;  %v2227_v48 = vadd.f32 %v3433_v34, %v2226_v40 }
 0x20c   : > { %v2366_v0 = vadd.f32 %v2365_v46, %v2303_v20  ;;  %v2435_v38 = vadd.f32 %v2434_v50, %v2404_v9 }
 0x20d   : > { %v2307_v3 = vadd.f32 %v5062_v36, %v2268_v59  ;;  %2337 = vst [vmem:[%s5074_s9 + $0xe0] sm:$0xff] %v2305_v44  ;;  %v2235_v57 = vadd.f32 %v3607_v5, %v3439_v41  ;;  %v2267_v23 = vadd.f32 %v2227_v48, %v5330_v10  ;;  %v2407_v39 = vmul.f32 %v2305_v44, %v2305_v44 }
 0x20e   : > { %v2436_v15 = vadd.f32 %v2435_v38, %v2405_v29  ;;  %v2367_v27 = vadd.f32 %v2366_v0, %v2304_v14 }
 0x20f   : > { %2339 = vst [vmem:[%s5074_s9 + $0xf0] sm:$0xff] %v2307_v3  ;;  %v2269_v33 = vadd.f32 %v2235_v57, %v1720_v16  ;;  %v2306_v8 = vadd.f32 %v5062_v36, %v2267_v23  ;;  %v2409_v6 = vmul.f32 %v2307_v3, %v2307_v3 }
 0x210   : > { %v2368_v20 = vadd.f32 %v2367_v27, %v2305_v44  ;;  %v2437_v12 = vadd.f32 %v2436_v15, %v2406_v24 }
 0x211   : > { %v2308_v21 = vadd.f32 %v5062_v36, %v2269_v33  ;;  %2338 = vst [vmem:[%s5074_s9 + $0xe8] sm:$0xff] %v2306_v8  ;;  %v2408_v4 = vmul.f32 %v2306_v8, %v2306_v8 }
 0x212   : > { %v2438_v32 = vadd.f32 %v2437_v12, %v2407_v39  ;;  %v2369_v26 = vadd.f32 %v2368_v20, %v2306_v8 }
 0x213   : > { %2340 = vst [vmem:[%s5074_s9 + $0xf8] sm:$0xff] %v2308_v21  ;;  %v2410_v53 = vmul.f32 %v2308_v21, %v2308_v21 }
 0x214   : > { %v2370_v13 = vadd.f32 %v2369_v26, %v2307_v3  ;;  %v2439_v43 = vadd.f32 %v2438_v32, %v2408_v4 }
 0x216   : > { %v2371_v19 = vadd.f32 %v2370_v13, %v2308_v21  ;;  %v2440_v35 = vadd.f32 %v2439_v43, %v2409_v6 }
 0x218   : > { %v2372_v11 = vrot.slane %v2371_v19, 4  ;;  %v2441_v31 = vadd.f32 %v2440_v35, %v2410_v53 }
 0x21a   : > { %v2373_v51 = vadd.f32 %v2372_v11, %v2371_v19  ;;  %v2442_v42 = vrot.slane %v2441_v31, 4 }
 0x21c   : > { %v2374_v47 = vrot.slane %v2373_v51, 2  ;;  %v2443_v62 = vadd.f32 %v2442_v42, %v2441_v31 }
 0x21e   : > { %v2375_v36 = vadd.f32 %v2374_v47, %v2373_v51  ;;  %v2444_v14 = vrot.slane %v2443_v62, 2 }
 0x220   : > { %v2376_v56 = vrot.slane %v2375_v36, 1  ;;  %v2445_v63 = vadd.f32 %v2444_v14, %v2443_v62 }
 0x222   : > { %v2377_v37 = vadd.f32 %v2376_v56, %v2375_v36  ;;  %v2446_v22 = vrot.slane %v2445_v63, 1 }
 0x224   : > { %2378 = vst [vmem:[%s262_s12] sm:$0x1] %v2377_v37  ;;  %v2447_v28 = vadd.f32 %v2446_v22, %v2445_v63 }
 0x226   : > { %2448 = vst [vmem:[%s262_s12 + $0x1] sm:$0x1] %v2447_v28 }
 0x227 PF: > { %s17_s21 = sadd.s32 1, %s3713_s21  }
 0x228   : > { %p14_p4 = scmp.ge.s32.totalorder %s17_s21, 4  }
 0x22a   :  { %16 = sbr.rel (!%p14_p4) target bundleno = 1 (0x1), region = 84 }

</bundles_post_ra>
